<compile_context>
chip_gen: v5e
topology: v5e:2x2
jax: 0.10.0
libtpu: 0.0.40
codegen_flags: <defaults>
</compile_context>

<pallas_src>
import functools
import math

import jax
import jax.numpy as jnp
from jax.experimental import pallas as pl
from jax.experimental.pallas import tpu as pltpu

# ----------------------------- model config (small, synthetic) -----------------------------
VOCAB_SIZE = 128
HIDDEN_SIZE = 64
NUM_HEADS = 4
NUM_KV_HEADS = 2
HEAD_DIM = HIDDEN_SIZE // NUM_HEADS          # 16
Q_SIZE = NUM_HEADS * HEAD_DIM                # 64
KV_SIZE = NUM_KV_HEADS * HEAD_DIM            # 32
INTERMEDIATE_SIZE = 128
NUM_LAYERS = 4
NUM_KV_LAYERS = 2                            # config.num_key_value_layers
NUM_SWIFT_LAYERS = NUM_LAYERS - NUM_KV_LAYERS
RMS_EPS = 1e-6
ROPE_THETA = 10000.0
DTYPE = jnp.float32

QKV_FUSED = 2 * Q_SIZE + 2 * KV_SIZE + KV_SIZE   # [Wq | Wq_rot | Wk | Wk_rot | Wv] = 224
Q_FUSED = 2 * Q_SIZE                             # [Wq | Wq_rot] = 128
KV_FUSED = 3 * KV_SIZE                           # [Wk | Wk_rot | Wv] = 96 per SwiftKV layer


# ------------------------------------ fused forward kernel ---------------------------------
def _forward_kernel(h_ref, cos_ref, sin_ref,
                    std_ln1_ref, std_wqkv_ref, std_wo_ref,
                    std_ln2_ref, std_wgu_ref, std_wd_ref,
                    norm_sw_ref, wkv_sw_ref,
                    sw_ln1_ref, sw_wq_ref, sw_wo_ref,
                    sw_ln2_ref, sw_wgu_ref, sw_wd_ref,
                    norm_ref, out_ref, *, eps, scale):
    f32 = jnp.float32
    hidden = h_ref[...].astype(f32)                       # (T, D)
    T = hidden.shape[0]

    # cos/sin tables loaded once (per-q-head tiled, duplicated-half neox layout).
    cos_q = cos_ref[...].astype(f32)                      # (T, Q_SIZE)
    sin_q = sin_ref[...].astype(f32)
    cos_k = cos_q[:, :KV_SIZE]
    sin_k = sin_q[:, :KV_SIZE]

    # Causal mask built once, reused by every layer's attention.
    row = jax.lax.broadcasted_iota(jnp.int32, (T, T), 0)
    col = jax.lax.broadcasted_iota(jnp.int32, (T, T), 1)
    causal = col <= row
    neg = jnp.finfo(jnp.float32).min

    def rmsnorm(x, w):
        var = jnp.mean(x * x, axis=-1, keepdims=True)
        return x * jax.lax.rsqrt(var + eps) * w

    group = NUM_HEADS // NUM_KV_HEADS

    def attention(q, k, v, wo):
        # Token-major (T, H*Dh).  O-proj folded into the head loop: no output concat;
        # Wo row slices (multiples of 16 rows) are sublane-tile aligned.
        o = jnp.zeros((T, HIDDEN_SIZE), f32)
        for h in range(NUM_HEADS):
            g = h // group
            qh = q[:, h * HEAD_DIM:(h + 1) * HEAD_DIM]
            kh = k[:, g * HEAD_DIM:(g + 1) * HEAD_DIM]
            vh = v[:, g * HEAD_DIM:(g + 1) * HEAD_DIM]
            s = jax.lax.dot_general(qh, kh, (((1,), (1,)), ((), ())),
                                    preferred_element_type=f32) * scale
            s = jnp.where(causal, s, neg)
            m = jnp.max(s, axis=-1, keepdims=True)
            p = jnp.exp(s - m)
            l = jnp.sum(p, axis=-1, keepdims=True)
            oh = jnp.dot(p, vh, preferred_element_type=f32) / l       # exact normalize
            o = o + jnp.dot(oh, wo[h * HEAD_DIM:(h + 1) * HEAD_DIM, :],
                            preferred_element_type=f32)
        return o

    def mlp(x, wgu, wd):
        gu = jnp.dot(x, wgu, preferred_element_type=f32)              # (T, 2*I) lane-dense
        g = gu[:, :INTERMEDIATE_SIZE]
        u = gu[:, INTERMEDIATE_SIZE:]
        return jnp.dot(g * jax.nn.sigmoid(g) * u, wd, preferred_element_type=f32)

    residual = jnp.zeros_like(hidden)   # residual=None path: first add is a no-op

    # ---- prefill runner: standard Llama decoder layers [0, NUM_KV_LAYERS) ----
    for i in range(NUM_KV_LAYERS):
        s = hidden + residual
        residual = s
        n = rmsnorm(s, std_ln1_ref[i].astype(f32))
        # fused [q | q_rot | k | k_rot | v] GEMM; RoPE is purely elementwise afterwards
        qkv = jnp.dot(n, std_wqkv_ref[i].astype(f32), preferred_element_type=f32)
        q = qkv[:, 0:Q_SIZE] * cos_q + qkv[:, Q_SIZE:2 * Q_SIZE] * sin_q
        k = (qkv[:, 2 * Q_SIZE:2 * Q_SIZE + KV_SIZE] * cos_k
             + qkv[:, 2 * Q_SIZE + KV_SIZE:2 * Q_SIZE + 2 * KV_SIZE] * sin_k)
        v = qkv[:, 2 * Q_SIZE + 2 * KV_SIZE:]
        attn = attention(q, k, v, std_wo_ref[i].astype(f32))
        s2 = attn + residual
        residual = s2
        n2 = rmsnorm(s2, std_ln2_ref[i].astype(f32))
        hidden = mlp(n2, std_wgu_ref[i].astype(f32), std_wd_ref[i].astype(f32))

    # ---- norm_swiftkv(hidden + residual) -> stacked kv_proj_swiftkv (+RoPE on K) ----
    swift_n = rmsnorm(hidden + residual, norm_sw_ref[...].astype(f32))
    kv_all = jnp.dot(swift_n, wkv_sw_ref[...].astype(f32),
                     preferred_element_type=f32)           # (T, NUM_SWIFT*[k|k_rot|v])

    # TODO(synk): KV-cache writeback (reshape_and_cache_flash) / attn_metadata-driven
    # swiftkv_select has no Pallas target in this standalone setting.

    # ---- decode runner: SwiftKV decoder layers [NUM_KV_LAYERS, NUM_LAYERS) ----
    for idx in range(NUM_SWIFT_LAYERS):
        off = idx * KV_FUSED
        k_i = (kv_all[:, off:off + KV_SIZE] * cos_k
               + kv_all[:, off + KV_SIZE:off + 2 * KV_SIZE] * sin_k)
        v_i = kv_all[:, off + 2 * KV_SIZE:off + 3 * KV_SIZE]

        s = hidden + residual
        residual = s
        n = rmsnorm(s, sw_ln1_ref[idx].astype(f32))
        qq = jnp.dot(n, sw_wq_ref[idx].astype(f32), preferred_element_type=f32)  # (T, 128)
        q = qq[:, :Q_SIZE] * cos_q + qq[:, Q_SIZE:] * sin_q
        attn = attention(q, k_i, v_i, sw_wo_ref[idx].astype(f32))
        s2 = attn + residual
        residual = s2
        n2 = rmsnorm(s2, sw_ln2_ref[idx].astype(f32))
        hidden = mlp(n2, sw_wgu_ref[idx].astype(f32), sw_wd_ref[idx].astype(f32))

    # ---- final RMSNorm(hidden, residual) ----
    out_ref[...] = rmsnorm(hidden + residual, norm_ref[...].astype(f32)).astype(out_ref.dtype)


# ------------------------------------- glue (plain JAX) -------------------------------------
def rope_tables(positions, head_dim, theta, num_heads):
    """cos/sin tiled per head to (T, num_heads*head_dim), neox duplicated-half layout."""
    half = head_dim // 2
    inv_freq = 1.0 / (theta ** (jnp.arange(0, half, dtype=jnp.float32) * 2.0 / head_dim))
    freqs = positions.astype(jnp.float32)[:, None] * inv_freq[None, :]   # (T, half)
    cos = jnp.cos(freqs)
    sin = jnp.sin(freqs)
    cos_head = jnp.concatenate([cos, cos], axis=-1)
    sin_head = jnp.concatenate([sin, sin], axis=-1)
    return (jnp.tile(cos_head, (1, num_heads)).astype(DTYPE),
            jnp.tile(sin_head, (1, num_heads)).astype(DTYPE))


def rope_rotate_matrix(num_heads, head_dim):
    """Signed permutation R such that x @ R == rotate_half(x) per head (neox style)."""
    half = head_dim // 2
    idx = jnp.arange(half)
    r = jnp.zeros((head_dim, head_dim), jnp.float32)
    r = r.at[idx + half, idx].set(-1.0)
    r = r.at[idx, idx + half].set(1.0)
    return jnp.kron(jnp.eye(num_heads, dtype=jnp.float32), r)


def llama_swiftkv_forward(params, input_ids, positions):
    # Token-embedding gather kept in plain XLA (one op); everything else is one kernel.
    hidden = jnp.take(params["embed"], input_ids, axis=0)                # (T, D)
    cos_q, sin_q = rope_tables(positions, HEAD_DIM, ROPE_THETA, NUM_HEADS)
    T, D = hidden.shape

    vmem_spec = pl.BlockSpec(memory_space=pltpu.MemorySpace.VMEM)
    kernel = functools.partial(_forward_kernel, eps=RMS_EPS,
                               scale=1.0 / math.sqrt(HEAD_DIM))
    return pl.pallas_call(
        kernel,
        out_shape=jax.ShapeDtypeStruct((T, D), hidden.dtype),
        in_specs=[vmem_spec] * 18,
        out_specs=vmem_spec,
    )(hidden, cos_q, sin_q,
      params["std_ln1"], params["std_wqkv"], params["std_wo"],
      params["std_ln2"], params["std_wgu"], params["std_wd"],
      params["norm_swiftkv"], params["wkv_swiftkv_all"],
      params["sw_ln1"], params["sw_wq"], params["sw_wo"],
      params["sw_ln2"], params["sw_wgu"], params["sw_wd"],
      params["norm"])


# ------------------------------------- parameter init ---------------------------------------
def init_params(key):
    def nrm(k, shape, scale=0.05):
        return (scale * jax.random.normal(k, shape, dtype=jnp.float32)).astype(DTYPE)

    rq = rope_rotate_matrix(NUM_HEADS, HEAD_DIM)       # (Q_SIZE, Q_SIZE)
    rk = rope_rotate_matrix(NUM_KV_HEADS, HEAD_DIM)    # (KV_SIZE, KV_SIZE)

    keys = jax.random.split(key, 64)
    ki = iter(keys)

    std_ln1, std_wqkv, std_wo, std_ln2, std_wgu, std_wd = [], [], [], [], [], []
    sw_ln1, sw_wq, sw_wo, sw_ln2, sw_wgu, sw_wd, sw_wkv = [], [], [], [], [], [], []

    for idx in range(NUM_LAYERS):
        ln1 = jnp.ones((1, HIDDEN_SIZE), DTYPE)
        ln2 = jnp.ones((1, HIDDEN_SIZE), DTYPE)
        wo = nrm(next(ki), (Q_SIZE, HIDDEN_SIZE))
        wgu = jnp.concatenate([nrm(next(ki), (HIDDEN_SIZE, INTERMEDIATE_SIZE)),
                               nrm(next(ki), (HIDDEN_SIZE, INTERMEDIATE_SIZE))], axis=1)
        wd = nrm(next(ki), (INTERMEDIATE_SIZE, HIDDEN_SIZE))

        if idx < NUM_KV_LAYERS:
            wq = nrm(next(ki), (HIDDEN_SIZE, Q_SIZE))
            wk = nrm(next(ki), (HIDDEN_SIZE, KV_SIZE))
            wv = nrm(next(ki), (HIDDEN_SIZE, KV_SIZE))
            # RoPE rotate-half folded into the weights: [Wq | Wq@R | Wk | Wk@R | Wv]
            wqkv = jnp.concatenate([wq, wq @ rq, wk, wk @ rk, wv], axis=1)   # (D, 224)
            std_ln1.append(ln1); std_wqkv.append(wqkv); std_wo.append(wo)
            std_ln2.append(ln2); std_wgu.append(wgu); std_wd.append(wd)
        else:
            wq = nrm(next(ki), (HIDDEN_SIZE, Q_SIZE))
            wk = nrm(next(ki), (HIDDEN_SIZE, KV_SIZE))
            wv = nrm(next(ki), (HIDDEN_SIZE, KV_SIZE))
            sw_ln1.append(ln1)
            sw_wq.append(jnp.concatenate([wq, wq @ rq], axis=1))            # (D, 128)
            sw_wo.append(wo); sw_ln2.append(ln2); sw_wgu.append(wgu); sw_wd.append(wd)
            sw_wkv.append(jnp.concatenate([wk, wk @ rk, wv], axis=1))       # (D, 96)

    return {
        "embed": nrm(next(ki), (VOCAB_SIZE, HIDDEN_SIZE), 0.02),
        "std_ln1": jnp.stack(std_ln1), "std_wqkv": jnp.stack(std_wqkv),
        "std_wo": jnp.stack(std_wo), "std_ln2": jnp.stack(std_ln2),
        "std_wgu": jnp.stack(std_wgu), "std_wd": jnp.stack(std_wd),
        "norm_swiftkv": jnp.ones((1, HIDDEN_SIZE), DTYPE),
        "wkv_swiftkv_all": jnp.concatenate(sw_wkv, axis=1),                 # (D, 192)
        "sw_ln1": jnp.stack(sw_ln1), "sw_wq": jnp.stack(sw_wq),
        "sw_wo": jnp.stack(sw_wo), "sw_ln2": jnp.stack(sw_ln2),
        "sw_wgu": jnp.stack(sw_wgu), "sw_wd": jnp.stack(sw_wd),
        "norm": jnp.ones((1, HIDDEN_SIZE), DTYPE),
    }


# --------------------------- pure-JAX reference (explicit rotate_half) ----------------------
def reference_forward(params, input_ids, positions):
    hidden = jnp.take(params["embed"], input_ids, axis=0).astype(jnp.float32)
    cos_q, sin_q = rope_tables(positions, HEAD_DIM, ROPE_THETA, NUM_HEADS)
    cos_k, sin_k = cos_q[:, :KV_SIZE], sin_q[:, :KV_SIZE]
    T = hidden.shape[0]
    mask = jnp.tril(jnp.ones((T, T), bool))

    def rmsnorm(x, w):
        return x * jax.lax.rsqrt(jnp.mean(x * x, -1, keepdims=True) + RMS_EPS) * w

    def rot_half(x, nh):
        half = HEAD_DIM // 2
        xr = x.reshape(T, nh, HEAD_DIM)
        return jnp.concatenate([-xr[..., half:], xr[..., :half]], -1).reshape(T, nh * HEAD_DIM)

    def attn_ref(q, k, v):
        rep = NUM_HEADS // NUM_KV_HEADS
        qh = q.reshape(T, NUM_HEADS, HEAD_DIM)
        kh = jnp.repeat(k.reshape(T, NUM_KV_HEADS, HEAD_DIM), rep, axis=1)
        vh = jnp.repeat(v.reshape(T, NUM_KV_HEADS, HEAD_DIM), rep, axis=1)
        s = jnp.einsum("qhd,khd->hqk", qh, kh) / math.sqrt(HEAD_DIM)
        s = jnp.where(mask[None], s, -jnp.inf)
        p = jax.nn.softmax(s, axis=-1)
        return jnp.einsum("hqk,khd->qhd", p, vh).reshape(T, Q_SIZE)

    residual = jnp.zeros_like(hidden)
    for i in range(NUM_KV_LAYERS):
        s_ = hidden + residual
        residual = s_
        n = rmsnorm(s_, params["std_ln1"][i])
        wqkv = params["std_wqkv"][i]
        q0 = n @ wqkv[:, :Q_SIZE]
        k0 = n @ wqkv[:, 2 * Q_SIZE:2 * Q_SIZE + KV_SIZE]
        v0 = n @ wqkv[:, 2 * Q_SIZE + 2 * KV_SIZE:]
        q = q0 * cos_q + rot_half(q0, NUM_HEADS) * sin_q
        k = k0 * cos_k + rot_half(k0, NUM_KV_HEADS) * sin_k
        a = attn_ref(q, k, v0) @ params["std_wo"][i]
        s2 = a + residual
        residual = s2
        n2 = rmsnorm(s2, params["std_ln2"][i])
        gu = n2 @ params["std_wgu"][i]
        g, u = gu[:, :INTERMEDIATE_SIZE], gu[:, INTERMEDIATE_SIZE:]
        hidden = (g * jax.nn.sigmoid(g) * u) @ params["std_wd"][i]

    swift_n = rmsnorm(hidden + residual, params["norm_swiftkv"])
    ks, vs = [], []
    for idx in range(NUM_SWIFT_LAYERS):
        wkv = params["wkv_swiftkv_all"][:, idx * KV_FUSED:(idx + 1) * KV_FUSED]
        k0 = swift_n @ wkv[:, :KV_SIZE]
        v0 = swift_n @ wkv[:, 2 * KV_SIZE:]
        ks.append(k0 * cos_k + rot_half(k0, NUM_KV_HEADS) * sin_k)
        vs.append(v0)

    for idx in range(NUM_SWIFT_LAYERS):
        s_ = hidden + residual
        residual = s_
        n = rmsnorm(s_, params["sw_ln1"][idx])
        q0 = n @ params["sw_wq"][idx][:, :Q_SIZE]
        q = q0 * cos_q + rot_half(q0, NUM_HEADS) * sin_q
        a = attn_ref(q, ks[idx], vs[idx]) @ params["sw_wo"][idx]
        s2 = a + residual
        residual = s2
        n2 = rmsnorm(s2, params["sw_ln2"][idx])
        gu = n2 @ params["sw_wgu"][idx]
        g, u = gu[:, :INTERMEDIATE_SIZE], gu[:, INTERMEDIATE_SIZE:]
        hidden = (g * jax.nn.sigmoid(g) * u) @ params["sw_wd"][idx]

    return rmsnorm(hidden + residual, params["norm"])


# ------------------------------------------ main --------------------------------------------
if __name__ == "__main__":
    key = jax.random.PRNGKey(0)
    pkey, ikey = jax.random.split(key)
    params = init_params(pkey)

    T = 16
    input_ids = jax.random.randint(ikey, (T,), 0, VOCAB_SIZE, dtype=jnp.int32)
    positions = jnp.arange(T, dtype=jnp.int32)

    fwd = jax.jit(llama_swiftkv_forward)
    out = jax.block_until_ready(fwd(params, input_ids, positions))
    assert out.shape == (T, HIDDEN_SIZE)
    assert bool(jnp.all(jnp.isfinite(out)))

    ref = reference_forward(params, input_ids, positions)
    max_err = float(jnp.max(jnp.abs(out - ref)))
    assert max_err < 5e-2, f"mismatch vs JAX reference: max abs err {max_err}"

    print("KERNEL_OK")
</pallas_src>

<mosaic_0001>
module attributes {stable_mosaic.version = 11 : i64} {
  func.func @_forward_kernel(%arg0: memref<16x64xf32, #tpu.memory_space<vmem>>, %arg1: memref<16x64xf32, #tpu.memory_space<vmem>>, %arg2: memref<16x64xf32, #tpu.memory_space<vmem>>, %arg3: memref<2x1x64xf32, #tpu.memory_space<vmem>>, %arg4: memref<2x64x224xf32, #tpu.memory_space<vmem>>, %arg5: memref<2x64x64xf32, #tpu.memory_space<vmem>>, %arg6: memref<2x1x64xf32, #tpu.memory_space<vmem>>, %arg7: memref<2x64x256xf32, #tpu.memory_space<vmem>>, %arg8: memref<2x128x64xf32, #tpu.memory_space<vmem>>, %arg9: memref<1x64xf32, #tpu.memory_space<vmem>>, %arg10: memref<64x192xf32, #tpu.memory_space<vmem>>, %arg11: memref<2x1x64xf32, #tpu.memory_space<vmem>>, %arg12: memref<2x64x128xf32, #tpu.memory_space<vmem>>, %arg13: memref<2x64x64xf32, #tpu.memory_space<vmem>>, %arg14: memref<2x1x64xf32, #tpu.memory_space<vmem>>, %arg15: memref<2x64x256xf32, #tpu.memory_space<vmem>>, %arg16: memref<2x128x64xf32, #tpu.memory_space<vmem>>, %arg17: memref<1x64xf32, #tpu.memory_space<vmem>>, %arg18: memref<16x64xf32, #tpu.memory_space<vmem>>) attributes {dimension_semantics = [], scalar_prefetch = 0 : i64, scratch_operands = 0 : i64, tpu.core_type = #tpu.core_type<tc>} {
    %c0 = arith.constant 0 : index
    %c0_0 = arith.constant 0 : index
    %0 = vector.load %arg0[%c0, %c0_0] : memref<16x64xf32, #tpu.memory_space<vmem>>, vector<16x64xf32>
    %c0_1 = arith.constant 0 : index
    %c0_2 = arith.constant 0 : index
    %1 = vector.load %arg1[%c0_1, %c0_2] : memref<16x64xf32, #tpu.memory_space<vmem>>, vector<16x64xf32>
    %c0_3 = arith.constant 0 : index
    %c0_4 = arith.constant 0 : index
    %2 = vector.load %arg2[%c0_3, %c0_4] : memref<16x64xf32, #tpu.memory_space<vmem>>, vector<16x64xf32>
    %3 = vector.extract_strided_slice %1 {offsets = [0, 0], sizes = [16, 32], strides = [1, 1]} : vector<16x64xf32> to vector<16x32xf32>
    %4 = vector.extract_strided_slice %2 {offsets = [0, 0], sizes = [16, 32], strides = [1, 1]} : vector<16x64xf32> to vector<16x32xf32>
    %5 = tpu.iota {dimensions = array<i32: 0>} : vector<16x16xi32>
    %6 = tpu.iota {dimensions = array<i32: 1>} : vector<16x16xi32>
    %7 = arith.cmpi sle, %6, %5 : vector<16x16xi32>
    %cst = arith.constant 0.000000e+00 : f32
    %8 = vector.broadcast %cst : f32 to vector<16x64xf32>
    %9 = arith.addf %0, %8 : vector<16x64xf32>
    %c0_5 = arith.constant 0 : index
    %c0_6 = arith.constant 0 : index
    %c0_7 = arith.constant 0 : index
    %10 = vector.load %arg3[%c0_5, %c0_6, %c0_7] : memref<2x1x64xf32, #tpu.memory_space<vmem>>, vector<1x1x64xf32>
    %11 = vector.shape_cast %10 : vector<1x1x64xf32> to vector<1x64xf32>
    %12 = arith.mulf %9, %9 : vector<16x64xf32>
    %cst_8 = arith.constant dense<0.000000e+00> : vector<16xf32>
    %13 = vector.multi_reduction <add>, %12, %cst_8 [1] : vector<16x64xf32> to vector<16xf32>
    %14 = vector.shape_cast %13 : vector<16xf32> to vector<16x1xf32>
    %cst_9 = arith.constant 6.400000e+01 : f32
    %15 = vector.broadcast %cst_9 : f32 to vector<16x1xf32>
    %16 = arith.divf %14, %15 : vector<16x1xf32>
    %cst_10 = arith.constant 9.99999997E-7 : f32
    %17 = vector.broadcast %cst_10 : f32 to vector<16x1xf32>
    %18 = arith.addf %16, %17 : vector<16x1xf32>
    %19 = math.rsqrt %18 : vector<16x1xf32>
    %20 = vector.broadcast %19 : vector<16x1xf32> to vector<16x64xf32>
    %21 = arith.mulf %9, %20 : vector<16x64xf32>
    %22 = vector.broadcast %11 : vector<1x64xf32> to vector<16x64xf32>
    %23 = arith.mulf %21, %22 : vector<16x64xf32>
    %c0_11 = arith.constant 0 : index
    %c0_12 = arith.constant 0 : index
    %c0_13 = arith.constant 0 : index
    %24 = vector.load %arg4[%c0_11, %c0_12, %c0_13] : memref<2x64x224xf32, #tpu.memory_space<vmem>>, vector<1x64x224xf32>
    %25 = vector.shape_cast %24 : vector<1x64x224xf32> to vector<64x224xf32>
    %cst_14 = arith.constant dense<0.000000e+00> : vector<16x224xf32>
    %26 = tpu.matmul %23, %25, %cst_14 {dimension_numbers = #tpu.dot_dimension_numbers<[1], [0], [0], [1], [0, 0, 1, 1], [], []>} : vector<16x64xf32>, vector<64x224xf32>, vector<16x224xf32> -> vector<16x224xf32>
    %27 = vector.extract_strided_slice %26 {offsets = [0, 0], sizes = [16, 64], strides = [1, 1]} : vector<16x224xf32> to vector<16x64xf32>
    %28 = arith.mulf %27, %1 : vector<16x64xf32>
    %29 = vector.extract_strided_slice %26 {offsets = [0, 64], sizes = [16, 64], strides = [1, 1]} : vector<16x224xf32> to vector<16x64xf32>
    %30 = arith.mulf %29, %2 : vector<16x64xf32>
    %31 = arith.addf %28, %30 : vector<16x64xf32>
    %32 = vector.extract_strided_slice %26 {offsets = [0, 128], sizes = [16, 32], strides = [1, 1]} : vector<16x224xf32> to vector<16x32xf32>
    %33 = arith.mulf %32, %3 : vector<16x32xf32>
    %34 = vector.extract_strided_slice %26 {offsets = [0, 160], sizes = [16, 32], strides = [1, 1]} : vector<16x224xf32> to vector<16x32xf32>
    %35 = arith.mulf %34, %4 : vector<16x32xf32>
    %36 = arith.addf %33, %35 : vector<16x32xf32>
    %37 = vector.extract_strided_slice %26 {offsets = [0, 192], sizes = [16, 32], strides = [1, 1]} : vector<16x224xf32> to vector<16x32xf32>
    %c0_15 = arith.constant 0 : index
    %c0_16 = arith.constant 0 : index
    %c0_17 = arith.constant 0 : index
    %38 = vector.load %arg5[%c0_15, %c0_16, %c0_17] : memref<2x64x64xf32, #tpu.memory_space<vmem>>, vector<1x64x64xf32>
    %39 = vector.shape_cast %38 : vector<1x64x64xf32> to vector<64x64xf32>
    %cst_18 = arith.constant 0.000000e+00 : f32
    %40 = vector.broadcast %cst_18 : f32 to vector<16x64xf32>
    %41 = vector.extract_strided_slice %31 {offsets = [0, 0], sizes = [16, 16], strides = [1, 1]} : vector<16x64xf32> to vector<16x16xf32>
    %42 = vector.extract_strided_slice %36 {offsets = [0, 0], sizes = [16, 16], strides = [1, 1]} : vector<16x32xf32> to vector<16x16xf32>
    %43 = vector.extract_strided_slice %37 {offsets = [0, 0], sizes = [16, 16], strides = [1, 1]} : vector<16x32xf32> to vector<16x16xf32>
    %cst_19 = arith.constant dense<0.000000e+00> : vector<16x16xf32>
    %44 = tpu.matmul %41, %42, %cst_19 {dimension_numbers = #tpu.dot_dimension_numbers<[1], [1], [0], [0], [0, 0, 1, 0], [], []>} : vector<16x16xf32>, vector<16x16xf32>, vector<16x16xf32> -> vector<16x16xf32>
    %cst_20 = arith.constant 2.500000e-01 : f32
    %45 = vector.broadcast %cst_20 : f32 to vector<16x16xf32>
    %46 = arith.mulf %44, %45 : vector<16x16xf32>
    %cst_21 = arith.constant -3.40282347E+38 : f32
    %47 = vector.broadcast %cst_21 : f32 to vector<16x16xf32>
    %48 = arith.select %7, %46, %47 : vector<16x16xi1>, vector<16x16xf32>
    %cst_22 = arith.constant dense<0xFF800000> : vector<16xf32>
    %49 = vector.multi_reduction <maximumf>, %48, %cst_22 [1] : vector<16x16xf32> to vector<16xf32>
    %50 = vector.shape_cast %49 : vector<16xf32> to vector<16x1xf32>
    %51 = vector.broadcast %50 : vector<16x1xf32> to vector<16x16xf32>
    %52 = arith.subf %48, %51 : vector<16x16xf32>
    %53 = math.exp %52 : vector<16x16xf32>
    %cst_23 = arith.constant dense<0.000000e+00> : vector<16xf32>
    %54 = vector.multi_reduction <add>, %53, %cst_23 [1] : vector<16x16xf32> to vector<16xf32>
    %55 = vector.shape_cast %54 : vector<16xf32> to vector<16x1xf32>
    %cst_24 = arith.constant dense<0.000000e+00> : vector<16x16xf32>
    %56 = tpu.matmul %53, %43, %cst_24 {dimension_numbers = #tpu.dot_dimension_numbers<[1], [0], [0], [1], [0, 0, 1, 1], [], []>} : vector<16x16xf32>, vector<16x16xf32>, vector<16x16xf32> -> vector<16x16xf32>
    %57 = vector.broadcast %55 : vector<16x1xf32> to vector<16x16xf32>
    %58 = arith.divf %56, %57 : vector<16x16xf32>
    %59 = vector.extract_strided_slice %39 {offsets = [0, 0], sizes = [16, 64], strides = [1, 1]} : vector<64x64xf32> to vector<16x64xf32>
    %cst_25 = arith.constant dense<0.000000e+00> : vector<16x64xf32>
    %60 = tpu.matmul %58, %59, %cst_25 {dimension_numbers = #tpu.dot_dimension_numbers<[1], [0], [0], [1], [0, 0, 1, 1], [], []>} : vector<16x16xf32>, vector<16x64xf32>, vector<16x64xf32> -> vector<16x64xf32>
    %61 = arith.addf %40, %60 : vector<16x64xf32>
    %62 = vector.extract_strided_slice %31 {offsets = [0, 16], sizes = [16, 16], strides = [1, 1]} : vector<16x64xf32> to vector<16x16xf32>
    %63 = vector.extract_strided_slice %36 {offsets = [0, 0], sizes = [16, 16], strides = [1, 1]} : vector<16x32xf32> to vector<16x16xf32>
    %64 = vector.extract_strided_slice %37 {offsets = [0, 0], sizes = [16, 16], strides = [1, 1]} : vector<16x32xf32> to vector<16x16xf32>
    %cst_26 = arith.constant dense<0.000000e+00> : vector<16x16xf32>
    %65 = tpu.matmul %62, %63, %cst_26 {dimension_numbers = #tpu.dot_dimension_numbers<[1], [1], [0], [0], [0, 0, 1, 0], [], []>} : vector<16x16xf32>, vector<16x16xf32>, vector<16x16xf32> -> vector<16x16xf32>
    %cst_27 = arith.constant 2.500000e-01 : f32
    %66 = vector.broadcast %cst_27 : f32 to vector<16x16xf32>
    %67 = arith.mulf %65, %66 : vector<16x16xf32>
    %cst_28 = arith.constant -3.40282347E+38 : f32
    %68 = vector.broadcast %cst_28 : f32 to vector<16x16xf32>
    %69 = arith.select %7, %67, %68 : vector<16x16xi1>, vector<16x16xf32>
    %cst_29 = arith.constant dense<0xFF800000> : vector<16xf32>
    %70 = vector.multi_reduction <maximumf>, %69, %cst_29 [1] : vector<16x16xf32> to vector<16xf32>
    %71 = vector.shape_cast %70 : vector<16xf32> to vector<16x1xf32>
    %72 = vector.broadcast %71 : vector<16x1xf32> to vector<16x16xf32>
    %73 = arith.subf %69, %72 : vector<16x16xf32>
    %74 = math.exp %73 : vector<16x16xf32>
    %cst_30 = arith.constant dense<0.000000e+00> : vector<16xf32>
    %75 = vector.multi_reduction <add>, %74, %cst_30 [1] : vector<16x16xf32> to vector<16xf32>
    %76 = vector.shape_cast %75 : vector<16xf32> to vector<16x1xf32>
    %cst_31 = arith.constant dense<0.000000e+00> : vector<16x16xf32>
    %77 = tpu.matmul %74, %64, %cst_31 {dimension_numbers = #tpu.dot_dimension_numbers<[1], [0], [0], [1], [0, 0, 1, 1], [], []>} : vector<16x16xf32>, vector<16x16xf32>, vector<16x16xf32> -> vector<16x16xf32>
    %78 = vector.broadcast %76 : vector<16x1xf32> to vector<16x16xf32>
    %79 = arith.divf %77, %78 : vector<16x16xf32>
    %80 = vector.extract_strided_slice %39 {offsets = [16, 0], sizes = [16, 64], strides = [1, 1]} : vector<64x64xf32> to vector<16x64xf32>
    %cst_32 = arith.constant dense<0.000000e+00> : vector<16x64xf32>
    %81 = tpu.matmul %79, %80, %cst_32 {dimension_numbers = #tpu.dot_dimension_numbers<[1], [0], [0], [1], [0, 0, 1, 1], [], []>} : vector<16x16xf32>, vector<16x64xf32>, vector<16x64xf32> -> vector<16x64xf32>
    %82 = arith.addf %61, %81 : vector<16x64xf32>
    %83 = vector.extract_strided_slice %31 {offsets = [0, 32], sizes = [16, 16], strides = [1, 1]} : vector<16x64xf32> to vector<16x16xf32>
    %84 = vector.extract_strided_slice %36 {offsets = [0, 16], sizes = [16, 16], strides = [1, 1]} : vector<16x32xf32> to vector<16x16xf32>
    %85 = vector.extract_strided_slice %37 {offsets = [0, 16], sizes = [16, 16], strides = [1, 1]} : vector<16x32xf32> to vector<16x16xf32>
    %cst_33 = arith.constant dense<0.000000e+00> : vector<16x16xf32>
    %86 = tpu.matmul %83, %84, %cst_33 {dimension_numbers = #tpu.dot_dimension_numbers<[1], [1], [0], [0], [0, 0, 1, 0], [], []>} : vector<16x16xf32>, vector<16x16xf32>, vector<16x16xf32> -> vector<16x16xf32>
    %cst_34 = arith.constant 2.500000e-01 : f32
    %87 = vector.broadcast %cst_34 : f32 to vector<16x16xf32>
    %88 = arith.mulf %86, %87 : vector<16x16xf32>
    %cst_35 = arith.constant -3.40282347E+38 : f32
    %89 = vector.broadcast %cst_35 : f32 to vector<16x16xf32>
    %90 = arith.select %7, %88, %89 : vector<16x16xi1>, vector<16x16xf32>
    %cst_36 = arith.constant dense<0xFF800000> : vector<16xf32>
    %91 = vector.multi_reduction <maximumf>, %90, %cst_36 [1] : vector<16x16xf32> to vector<16xf32>
    %92 = vector.shape_cast %91 : vector<16xf32> to vector<16x1xf32>
    %93 = vector.broadcast %92 : vector<16x1xf32> to vector<16x16xf32>
    %94 = arith.subf %90, %93 : vector<16x16xf32>
    %95 = math.exp %94 : vector<16x16xf32>
    %cst_37 = arith.constant dense<0.000000e+00> : vector<16xf32>
    %96 = vector.multi_reduction <add>, %95, %cst_37 [1] : vector<16x16xf32> to vector<16xf32>
    %97 = vector.shape_cast %96 : vector<16xf32> to vector<16x1xf32>
    %cst_38 = arith.constant dense<0.000000e+00> : vector<16x16xf32>
    %98 = tpu.matmul %95, %85, %cst_38 {dimension_numbers = #tpu.dot_dimension_numbers<[1], [0], [0], [1], [0, 0, 1, 1], [], []>} : vector<16x16xf32>, vector<16x16xf32>, vector<16x16xf32> -> vector<16x16xf32>
    %99 = vector.broadcast %97 : vector<16x1xf32> to vector<16x16xf32>
    %100 = arith.divf %98, %99 : vector<16x16xf32>
    %101 = vector.extract_strided_slice %39 {offsets = [32, 0], sizes = [16, 64], strides = [1, 1]} : vector<64x64xf32> to vector<16x64xf32>
    %cst_39 = arith.constant dense<0.000000e+00> : vector<16x64xf32>
    %102 = tpu.matmul %100, %101, %cst_39 {dimension_numbers = #tpu.dot_dimension_numbers<[1], [0], [0], [1], [0, 0, 1, 1], [], []>} : vector<16x16xf32>, vector<16x64xf32>, vector<16x64xf32> -> vector<16x64xf32>
    %103 = arith.addf %82, %102 : vector<16x64xf32>
    %104 = vector.extract_strided_slice %31 {offsets = [0, 48], sizes = [16, 16], strides = [1, 1]} : vector<16x64xf32> to vector<16x16xf32>
    %105 = vector.extract_strided_slice %36 {offsets = [0, 16], sizes = [16, 16], strides = [1, 1]} : vector<16x32xf32> to vector<16x16xf32>
    %106 = vector.extract_strided_slice %37 {offsets = [0, 16], sizes = [16, 16], strides = [1, 1]} : vector<16x32xf32> to vector<16x16xf32>
    %cst_40 = arith.constant dense<0.000000e+00> : vector<16x16xf32>
    %107 = tpu.matmul %104, %105, %cst_40 {dimension_numbers = #tpu.dot_dimension_numbers<[1], [1], [0], [0], [0, 0, 1, 0], [], []>} : vector<16x16xf32>, vector<16x16xf32>, vector<16x16xf32> -> vector<16x16xf32>
    %cst_41 = arith.constant 2.500000e-01 : f32
    %108 = vector.broadcast %cst_41 : f32 to vector<16x16xf32>
    %109 = arith.mulf %107, %108 : vector<16x16xf32>
    %cst_42 = arith.constant -3.40282347E+38 : f32
    %110 = vector.broadcast %cst_42 : f32 to vector<16x16xf32>
    %111 = arith.select %7, %109, %110 : vector<16x16xi1>, vector<16x16xf32>
    %cst_43 = arith.constant dense<0xFF800000> : vector<16xf32>
    %112 = vector.multi_reduction <maximumf>, %111, %cst_43 [1] : vector<16x16xf32> to vector<16xf32>
    %113 = vector.shape_cast %112 : vector<16xf32> to vector<16x1xf32>
    %114 = vector.broadcast %113 : vector<16x1xf32> to vector<16x16xf32>
    %115 = arith.subf %111, %114 : vector<16x16xf32>
    %116 = math.exp %115 : vector<16x16xf32>
    %cst_44 = arith.constant dense<0.000000e+00> : vector<16xf32>
    %117 = vector.multi_reduction <add>, %116, %cst_44 [1] : vector<16x16xf32> to vector<16xf32>
    %118 = vector.shape_cast %117 : vector<16xf32> to vector<16x1xf32>
    %cst_45 = arith.constant dense<0.000000e+00> : vector<16x16xf32>
    %119 = tpu.matmul %116, %106, %cst_45 {dimension_numbers = #tpu.dot_dimension_numbers<[1], [0], [0], [1], [0, 0, 1, 1], [], []>} : vector<16x16xf32>, vector<16x16xf32>, vector<16x16xf32> -> vector<16x16xf32>
    %120 = vector.broadcast %118 : vector<16x1xf32> to vector<16x16xf32>
    %121 = arith.divf %119, %120 : vector<16x16xf32>
    %122 = vector.extract_strided_slice %39 {offsets = [48, 0], sizes = [16, 64], strides = [1, 1]} : vector<64x64xf32> to vector<16x64xf32>
    %cst_46 = arith.constant dense<0.000000e+00> : vector<16x64xf32>
    %123 = tpu.matmul %121, %122, %cst_46 {dimension_numbers = #tpu.dot_dimension_numbers<[1], [0], [0], [1], [0, 0, 1, 1], [], []>} : vector<16x16xf32>, vector<16x64xf32>, vector<16x64xf32> -> vector<16x64xf32>
    %124 = arith.addf %103, %123 : vector<16x64xf32>
    %125 = arith.addf %124, %9 : vector<16x64xf32>
    %c0_47 = arith.constant 0 : index
    %c0_48 = arith.constant 0 : index
    %c0_49 = arith.constant 0 : index
    %126 = vector.load %arg6[%c0_47, %c0_48, %c0_49] : memref<2x1x64xf32, #tpu.memory_space<vmem>>, vector<1x1x64xf32>
    %127 = vector.shape_cast %126 : vector<1x1x64xf32> to vector<1x64xf32>
    %128 = arith.mulf %125, %125 : vector<16x64xf32>
    %cst_50 = arith.constant dense<0.000000e+00> : vector<16xf32>
    %129 = vector.multi_reduction <add>, %128, %cst_50 [1] : vector<16x64xf32> to vector<16xf32>
    %130 = vector.shape_cast %129 : vector<16xf32> to vector<16x1xf32>
    %cst_51 = arith.constant 6.400000e+01 : f32
    %131 = vector.broadcast %cst_51 : f32 to vector<16x1xf32>
    %132 = arith.divf %130, %131 : vector<16x1xf32>
    %cst_52 = arith.constant 9.99999997E-7 : f32
    %133 = vector.broadcast %cst_52 : f32 to vector<16x1xf32>
    %134 = arith.addf %132, %133 : vector<16x1xf32>
    %135 = math.rsqrt %134 : vector<16x1xf32>
    %136 = vector.broadcast %135 : vector<16x1xf32> to vector<16x64xf32>
    %137 = arith.mulf %125, %136 : vector<16x64xf32>
    %138 = vector.broadcast %127 : vector<1x64xf32> to vector<16x64xf32>
    %139 = arith.mulf %137, %138 : vector<16x64xf32>
    %c0_53 = arith.constant 0 : index
    %c0_54 = arith.constant 0 : index
    %c0_55 = arith.constant 0 : index
    %140 = vector.load %arg7[%c0_53, %c0_54, %c0_55] : memref<2x64x256xf32, #tpu.memory_space<vmem>>, vector<1x64x256xf32>
    %141 = vector.shape_cast %140 : vector<1x64x256xf32> to vector<64x256xf32>
    %c0_56 = arith.constant 0 : index
    %c0_57 = arith.constant 0 : index
    %c0_58 = arith.constant 0 : index
    %142 = vector.load %arg8[%c0_56, %c0_57, %c0_58] : memref<2x128x64xf32, #tpu.memory_space<vmem>>, vector<1x128x64xf32>
    %143 = vector.shape_cast %142 : vector<1x128x64xf32> to vector<128x64xf32>
    %cst_59 = arith.constant dense<0.000000e+00> : vector<16x256xf32>
    %144 = tpu.matmul %139, %141, %cst_59 {dimension_numbers = #tpu.dot_dimension_numbers<[1], [0], [0], [1], [0, 0, 1, 1], [], []>} : vector<16x64xf32>, vector<64x256xf32>, vector<16x256xf32> -> vector<16x256xf32>
    %145 = vector.extract_strided_slice %144 {offsets = [0, 0], sizes = [16, 128], strides = [1, 1]} : vector<16x256xf32> to vector<16x128xf32>
    %146 = vector.extract_strided_slice %144 {offsets = [0, 128], sizes = [16, 128], strides = [1, 1]} : vector<16x256xf32> to vector<16x128xf32>
    %147 = arith.negf %145 : vector<16x128xf32>
    %148 = math.exp %147 : vector<16x128xf32>
    %cst_60 = arith.constant 1.000000e+00 : f32
    %149 = vector.broadcast %cst_60 : f32 to vector<16x128xf32>
    %150 = arith.addf %149, %148 : vector<16x128xf32>
    %151 = arith.divf %149, %150 : vector<16x128xf32>
    %152 = arith.mulf %145, %151 : vector<16x128xf32>
    %153 = arith.mulf %152, %146 : vector<16x128xf32>
    %cst_61 = arith.constant dense<0.000000e+00> : vector<16x64xf32>
    %154 = tpu.matmul %153, %143, %cst_61 {dimension_numbers = #tpu.dot_dimension_numbers<[1], [0], [0], [1], [0, 0, 1, 1], [], []>} : vector<16x128xf32>, vector<128x64xf32>, vector<16x64xf32> -> vector<16x64xf32>
    %155 = arith.addf %154, %125 : vector<16x64xf32>
    %c1 = arith.constant 1 : index
    %c0_62 = arith.constant 0 : index
    %c0_63 = arith.constant 0 : index
    %156 = vector.load %arg3[%c1, %c0_62, %c0_63] : memref<2x1x64xf32, #tpu.memory_space<vmem>>, vector<1x1x64xf32>
    %157 = vector.shape_cast %156 : vector<1x1x64xf32> to vector<1x64xf32>
    %158 = arith.mulf %155, %155 : vector<16x64xf32>
    %cst_64 = arith.constant dense<0.000000e+00> : vector<16xf32>
    %159 = vector.multi_reduction <add>, %158, %cst_64 [1] : vector<16x64xf32> to vector<16xf32>
    %160 = vector.shape_cast %159 : vector<16xf32> to vector<16x1xf32>
    %cst_65 = arith.constant 6.400000e+01 : f32
    %161 = vector.broadcast %cst_65 : f32 to vector<16x1xf32>
    %162 = arith.divf %160, %161 : vector<16x1xf32>
    %cst_66 = arith.constant 9.99999997E-7 : f32
    %163 = vector.broadcast %cst_66 : f32 to vector<16x1xf32>
    %164 = arith.addf %162, %163 : vector<16x1xf32>
    %165 = math.rsqrt %164 : vector<16x1xf32>
    %166 = vector.broadcast %165 : vector<16x1xf32> to vector<16x64xf32>
    %167 = arith.mulf %155, %166 : vector<16x64xf32>
    %168 = vector.broadcast %157 : vector<1x64xf32> to vector<16x64xf32>
    %169 = arith.mulf %167, %168 : vector<16x64xf32>
    %c1_67 = arith.constant 1 : index
    %c0_68 = arith.constant 0 : index
    %c0_69 = arith.constant 0 : index
    %170 = vector.load %arg4[%c1_67, %c0_68, %c0_69] : memref<2x64x224xf32, #tpu.memory_space<vmem>>, vector<1x64x224xf32>
    %171 = vector.shape_cast %170 : vector<1x64x224xf32> to vector<64x224xf32>
    %cst_70 = arith.constant dense<0.000000e+00> : vector<16x224xf32>
    %172 = tpu.matmul %169, %171, %cst_70 {dimension_numbers = #tpu.dot_dimension_numbers<[1], [0], [0], [1], [0, 0, 1, 1], [], []>} : vector<16x64xf32>, vector<64x224xf32>, vector<16x224xf32> -> vector<16x224xf32>
    %173 = vector.extract_strided_slice %172 {offsets = [0, 0], sizes = [16, 64], strides = [1, 1]} : vector<16x224xf32> to vector<16x64xf32>
    %174 = arith.mulf %173, %1 : vector<16x64xf32>
    %175 = vector.extract_strided_slice %172 {offsets = [0, 64], sizes = [16, 64], strides = [1, 1]} : vector<16x224xf32> to vector<16x64xf32>
    %176 = arith.mulf %175, %2 : vector<16x64xf32>
    %177 = arith.addf %174, %176 : vector<16x64xf32>
    %178 = vector.extract_strided_slice %172 {offsets = [0, 128], sizes = [16, 32], strides = [1, 1]} : vector<16x224xf32> to vector<16x32xf32>
    %179 = arith.mulf %178, %3 : vector<16x32xf32>
    %180 = vector.extract_strided_slice %172 {offsets = [0, 160], sizes = [16, 32], strides = [1, 1]} : vector<16x224xf32> to vector<16x32xf32>
    %181 = arith.mulf %180, %4 : vector<16x32xf32>
    %182 = arith.addf %179, %181 : vector<16x32xf32>
    %183 = vector.extract_strided_slice %172 {offsets = [0, 192], sizes = [16, 32], strides = [1, 1]} : vector<16x224xf32> to vector<16x32xf32>
    %c1_71 = arith.constant 1 : index
    %c0_72 = arith.constant 0 : index
    %c0_73 = arith.constant 0 : index
    %184 = vector.load %arg5[%c1_71, %c0_72, %c0_73] : memref<2x64x64xf32, #tpu.memory_space<vmem>>, vector<1x64x64xf32>
    %185 = vector.shape_cast %184 : vector<1x64x64xf32> to vector<64x64xf32>
    %cst_74 = arith.constant 0.000000e+00 : f32
    %186 = vector.broadcast %cst_74 : f32 to vector<16x64xf32>
    %187 = vector.extract_strided_slice %177 {offsets = [0, 0], sizes = [16, 16], strides = [1, 1]} : vector<16x64xf32> to vector<16x16xf32>
    %188 = vector.extract_strided_slice %182 {offsets = [0, 0], sizes = [16, 16], strides = [1, 1]} : vector<16x32xf32> to vector<16x16xf32>
    %189 = vector.extract_strided_slice %183 {offsets = [0, 0], sizes = [16, 16], strides = [1, 1]} : vector<16x32xf32> to vector<16x16xf32>
    %cst_75 = arith.constant dense<0.000000e+00> : vector<16x16xf32>
    %190 = tpu.matmul %187, %188, %cst_75 {dimension_numbers = #tpu.dot_dimension_numbers<[1], [1], [0], [0], [0, 0, 1, 0], [], []>} : vector<16x16xf32>, vector<16x16xf32>, vector<16x16xf32> -> vector<16x16xf32>
    %cst_76 = arith.constant 2.500000e-01 : f32
    %191 = vector.broadcast %cst_76 : f32 to vector<16x16xf32>
    %192 = arith.mulf %190, %191 : vector<16x16xf32>
    %cst_77 = arith.constant -3.40282347E+38 : f32
    %193 = vector.broadcast %cst_77 : f32 to vector<16x16xf32>
    %194 = arith.select %7, %192, %193 : vector<16x16xi1>, vector<16x16xf32>
    %cst_78 = arith.constant dense<0xFF800000> : vector<16xf32>
    %195 = vector.multi_reduction <maximumf>, %194, %cst_78 [1] : vector<16x16xf32> to vector<16xf32>
    %196 = vector.shape_cast %195 : vector<16xf32> to vector<16x1xf32>
    %197 = vector.broadcast %196 : vector<16x1xf32> to vector<16x16xf32>
    %198 = arith.subf %194, %197 : vector<16x16xf32>
    %199 = math.exp %198 : vector<16x16xf32>
    %cst_79 = arith.constant dense<0.000000e+00> : vector<16xf32>
    %200 = vector.multi_reduction <add>, %199, %cst_79 [1] : vector<16x16xf32> to vector<16xf32>
    %201 = vector.shape_cast %200 : vector<16xf32> to vector<16x1xf32>
    %cst_80 = arith.constant dense<0.000000e+00> : vector<16x16xf32>
    %202 = tpu.matmul %199, %189, %cst_80 {dimension_numbers = #tpu.dot_dimension_numbers<[1], [0], [0], [1], [0, 0, 1, 1], [], []>} : vector<16x16xf32>, vector<16x16xf32>, vector<16x16xf32> -> vector<16x16xf32>
    %203 = vector.broadcast %201 : vector<16x1xf32> to vector<16x16xf32>
    %204 = arith.divf %202, %203 : vector<16x16xf32>
    %205 = vector.extract_strided_slice %185 {offsets = [0, 0], sizes = [16, 64], strides = [1, 1]} : vector<64x64xf32> to vector<16x64xf32>
    %cst_81 = arith.constant dense<0.000000e+00> : vector<16x64xf32>
    %206 = tpu.matmul %204, %205, %cst_81 {dimension_numbers = #tpu.dot_dimension_numbers<[1], [0], [0], [1], [0, 0, 1, 1], [], []>} : vector<16x16xf32>, vector<16x64xf32>, vector<16x64xf32> -> vector<16x64xf32>
    %207 = arith.addf %186, %206 : vector<16x64xf32>
    %208 = vector.extract_strided_slice %177 {offsets = [0, 16], sizes = [16, 16], strides = [1, 1]} : vector<16x64xf32> to vector<16x16xf32>
    %209 = vector.extract_strided_slice %182 {offsets = [0, 0], sizes = [16, 16], strides = [1, 1]} : vector<16x32xf32> to vector<16x16xf32>
    %210 = vector.extract_strided_slice %183 {offsets = [0, 0], sizes = [16, 16], strides = [1, 1]} : vector<16x32xf32> to vector<16x16xf32>
    %cst_82 = arith.constant dense<0.000000e+00> : vector<16x16xf32>
    %211 = tpu.matmul %208, %209, %cst_82 {dimension_numbers = #tpu.dot_dimension_numbers<[1], [1], [0], [0], [0, 0, 1, 0], [], []>} : vector<16x16xf32>, vector<16x16xf32>, vector<16x16xf32> -> vector<16x16xf32>
    %cst_83 = arith.constant 2.500000e-01 : f32
    %212 = vector.broadcast %cst_83 : f32 to vector<16x16xf32>
    %213 = arith.mulf %211, %212 : vector<16x16xf32>
    %cst_84 = arith.constant -3.40282347E+38 : f32
    %214 = vector.broadcast %cst_84 : f32 to vector<16x16xf32>
    %215 = arith.select %7, %213, %214 : vector<16x16xi1>, vector<16x16xf32>
    %cst_85 = arith.constant dense<0xFF800000> : vector<16xf32>
    %216 = vector.multi_reduction <maximumf>, %215, %cst_85 [1] : vector<16x16xf32> to vector<16xf32>
    %217 = vector.shape_cast %216 : vector<16xf32> to vector<16x1xf32>
    %218 = vector.broadcast %217 : vector<16x1xf32> to vector<16x16xf32>
    %219 = arith.subf %215, %218 : vector<16x16xf32>
    %220 = math.exp %219 : vector<16x16xf32>
    %cst_86 = arith.constant dense<0.000000e+00> : vector<16xf32>
    %221 = vector.multi_reduction <add>, %220, %cst_86 [1] : vector<16x16xf32> to vector<16xf32>
    %222 = vector.shape_cast %221 : vector<16xf32> to vector<16x1xf32>
    %cst_87 = arith.constant dense<0.000000e+00> : vector<16x16xf32>
    %223 = tpu.matmul %220, %210, %cst_87 {dimension_numbers = #tpu.dot_dimension_numbers<[1], [0], [0], [1], [0, 0, 1, 1], [], []>} : vector<16x16xf32>, vector<16x16xf32>, vector<16x16xf32> -> vector<16x16xf32>
    %224 = vector.broadcast %222 : vector<16x1xf32> to vector<16x16xf32>
    %225 = arith.divf %223, %224 : vector<16x16xf32>
    %226 = vector.extract_strided_slice %185 {offsets = [16, 0], sizes = [16, 64], strides = [1, 1]} : vector<64x64xf32> to vector<16x64xf32>
    %cst_88 = arith.constant dense<0.000000e+00> : vector<16x64xf32>
    %227 = tpu.matmul %225, %226, %cst_88 {dimension_numbers = #tpu.dot_dimension_numbers<[1], [0], [0], [1], [0, 0, 1, 1], [], []>} : vector<16x16xf32>, vector<16x64xf32>, vector<16x64xf32> -> vector<16x64xf32>
    %228 = arith.addf %207, %227 : vector<16x64xf32>
    %229 = vector.extract_strided_slice %177 {offsets = [0, 32], sizes = [16, 16], strides = [1, 1]} : vector<16x64xf32> to vector<16x16xf32>
    %230 = vector.extract_strided_slice %182 {offsets = [0, 16], sizes = [16, 16], strides = [1, 1]} : vector<16x32xf32> to vector<16x16xf32>
    %231 = vector.extract_strided_slice %183 {offsets = [0, 16], sizes = [16, 16], strides = [1, 1]} : vector<16x32xf32> to vector<16x16xf32>
    %cst_89 = arith.constant dense<0.000000e+00> : vector<16x16xf32>
    %232 = tpu.matmul %229, %230, %cst_89 {dimension_numbers = #tpu.dot_dimension_numbers<[1], [1], [0], [0], [0, 0, 1, 0], [], []>} : vector<16x16xf32>, vector<16x16xf32>, vector<16x16xf32> -> vector<16x16xf32>
    %cst_90 = arith.constant 2.500000e-01 : f32
    %233 = vector.broadcast %cst_90 : f32 to vector<16x16xf32>
    %234 = arith.mulf %232, %233 : vector<16x16xf32>
    %cst_91 = arith.constant -3.40282347E+38 : f32
    %235 = vector.broadcast %cst_91 : f32 to vector<16x16xf32>
    %236 = arith.select %7, %234, %235 : vector<16x16xi1>, vector<16x16xf32>
    %cst_92 = arith.constant dense<0xFF800000> : vector<16xf32>
    %237 = vector.multi_reduction <maximumf>, %236, %cst_92 [1] : vector<16x16xf32> to vector<16xf32>
    %238 = vector.shape_cast %237 : vector<16xf32> to vector<16x1xf32>
    %239 = vector.broadcast %238 : vector<16x1xf32> to vector<16x16xf32>
    %240 = arith.subf %236, %239 : vector<16x16xf32>
    %241 = math.exp %240 : vector<16x16xf32>
    %cst_93 = arith.constant dense<0.000000e+00> : vector<16xf32>
    %242 = vector.multi_reduction <add>, %241, %cst_93 [1] : vector<16x16xf32> to vector<16xf32>
    %243 = vector.shape_cast %242 : vector<16xf32> to vector<16x1xf32>
    %cst_94 = arith.constant dense<0.000000e+00> : vector<16x16xf32>
    %244 = tpu.matmul %241, %231, %cst_94 {dimension_numbers = #tpu.dot_dimension_numbers<[1], [0], [0], [1], [0, 0, 1, 1], [], []>} : vector<16x16xf32>, vector<16x16xf32>, vector<16x16xf32> -> vector<16x16xf32>
    %245 = vector.broadcast %243 : vector<16x1xf32> to vector<16x16xf32>
    %246 = arith.divf %244, %245 : vector<16x16xf32>
    %247 = vector.extract_strided_slice %185 {offsets = [32, 0], sizes = [16, 64], strides = [1, 1]} : vector<64x64xf32> to vector<16x64xf32>
    %cst_95 = arith.constant dense<0.000000e+00> : vector<16x64xf32>
    %248 = tpu.matmul %246, %247, %cst_95 {dimension_numbers = #tpu.dot_dimension_numbers<[1], [0], [0], [1], [0, 0, 1, 1], [], []>} : vector<16x16xf32>, vector<16x64xf32>, vector<16x64xf32> -> vector<16x64xf32>
    %249 = arith.addf %228, %248 : vector<16x64xf32>
    %250 = vector.extract_strided_slice %177 {offsets = [0, 48], sizes = [16, 16], strides = [1, 1]} : vector<16x64xf32> to vector<16x16xf32>
    %251 = vector.extract_strided_slice %182 {offsets = [0, 16], sizes = [16, 16], strides = [1, 1]} : vector<16x32xf32> to vector<16x16xf32>
    %252 = vector.extract_strided_slice %183 {offsets = [0, 16], sizes = [16, 16], strides = [1, 1]} : vector<16x32xf32> to vector<16x16xf32>
    %cst_96 = arith.constant dense<0.000000e+00> : vector<16x16xf32>
    %253 = tpu.matmul %250, %251, %cst_96 {dimension_numbers = #tpu.dot_dimension_numbers<[1], [1], [0], [0], [0, 0, 1, 0], [], []>} : vector<16x16xf32>, vector<16x16xf32>, vector<16x16xf32> -> vector<16x16xf32>
    %cst_97 = arith.constant 2.500000e-01 : f32
    %254 = vector.broadcast %cst_97 : f32 to vector<16x16xf32>
    %255 = arith.mulf %253, %254 : vector<16x16xf32>
    %cst_98 = arith.constant -3.40282347E+38 : f32
    %256 = vector.broadcast %cst_98 : f32 to vector<16x16xf32>
    %257 = arith.select %7, %255, %256 : vector<16x16xi1>, vector<16x16xf32>
    %cst_99 = arith.constant dense<0xFF800000> : vector<16xf32>
    %258 = vector.multi_reduction <maximumf>, %257, %cst_99 [1] : vector<16x16xf32> to vector<16xf32>
    %259 = vector.shape_cast %258 : vector<16xf32> to vector<16x1xf32>
    %260 = vector.broadcast %259 : vector<16x1xf32> to vector<16x16xf32>
    %261 = arith.subf %257, %260 : vector<16x16xf32>
    %262 = math.exp %261 : vector<16x16xf32>
    %cst_100 = arith.constant dense<0.000000e+00> : vector<16xf32>
    %263 = vector.multi_reduction <add>, %262, %cst_100 [1] : vector<16x16xf32> to vector<16xf32>
    %264 = vector.shape_cast %263 : vector<16xf32> to vector<16x1xf32>
    %cst_101 = arith.constant dense<0.000000e+00> : vector<16x16xf32>
    %265 = tpu.matmul %262, %252, %cst_101 {dimension_numbers = #tpu.dot_dimension_numbers<[1], [0], [0], [1], [0, 0, 1, 1], [], []>} : vector<16x16xf32>, vector<16x16xf32>, vector<16x16xf32> -> vector<16x16xf32>
    %266 = vector.broadcast %264 : vector<16x1xf32> to vector<16x16xf32>
    %267 = arith.divf %265, %266 : vector<16x16xf32>
    %268 = vector.extract_strided_slice %185 {offsets = [48, 0], sizes = [16, 64], strides = [1, 1]} : vector<64x64xf32> to vector<16x64xf32>
    %cst_102 = arith.constant dense<0.000000e+00> : vector<16x64xf32>
    %269 = tpu.matmul %267, %268, %cst_102 {dimension_numbers = #tpu.dot_dimension_numbers<[1], [0], [0], [1], [0, 0, 1, 1], [], []>} : vector<16x16xf32>, vector<16x64xf32>, vector<16x64xf32> -> vector<16x64xf32>
    %270 = arith.addf %249, %269 : vector<16x64xf32>
    %271 = arith.addf %270, %155 : vector<16x64xf32>
    %c1_103 = arith.constant 1 : index
    %c0_104 = arith.constant 0 : index
    %c0_105 = arith.constant 0 : index
    %272 = vector.load %arg6[%c1_103, %c0_104, %c0_105] : memref<2x1x64xf32, #tpu.memory_space<vmem>>, vector<1x1x64xf32>
    %273 = vector.shape_cast %272 : vector<1x1x64xf32> to vector<1x64xf32>
    %274 = arith.mulf %271, %271 : vector<16x64xf32>
    %cst_106 = arith.constant dense<0.000000e+00> : vector<16xf32>
    %275 = vector.multi_reduction <add>, %274, %cst_106 [1] : vector<16x64xf32> to vector<16xf32>
    %276 = vector.shape_cast %275 : vector<16xf32> to vector<16x1xf32>
    %cst_107 = arith.constant 6.400000e+01 : f32
    %277 = vector.broadcast %cst_107 : f32 to vector<16x1xf32>
    %278 = arith.divf %276, %277 : vector<16x1xf32>
    %cst_108 = arith.constant 9.99999997E-7 : f32
    %279 = vector.broadcast %cst_108 : f32 to vector<16x1xf32>
    %280 = arith.addf %278, %279 : vector<16x1xf32>
    %281 = math.rsqrt %280 : vector<16x1xf32>
    %282 = vector.broadcast %281 : vector<16x1xf32> to vector<16x64xf32>
    %283 = arith.mulf %271, %282 : vector<16x64xf32>
    %284 = vector.broadcast %273 : vector<1x64xf32> to vector<16x64xf32>
    %285 = arith.mulf %283, %284 : vector<16x64xf32>
    %c1_109 = arith.constant 1 : index
    %c0_110 = arith.constant 0 : index
    %c0_111 = arith.constant 0 : index
    %286 = vector.load %arg7[%c1_109, %c0_110, %c0_111] : memref<2x64x256xf32, #tpu.memory_space<vmem>>, vector<1x64x256xf32>
    %287 = vector.shape_cast %286 : vector<1x64x256xf32> to vector<64x256xf32>
    %c1_112 = arith.constant 1 : index
    %c0_113 = arith.constant 0 : index
    %c0_114 = arith.constant 0 : index
    %288 = vector.load %arg8[%c1_112, %c0_113, %c0_114] : memref<2x128x64xf32, #tpu.memory_space<vmem>>, vector<1x128x64xf32>
    %289 = vector.shape_cast %288 : vector<1x128x64xf32> to vector<128x64xf32>
    %cst_115 = arith.constant dense<0.000000e+00> : vector<16x256xf32>
    %290 = tpu.matmul %285, %287, %cst_115 {dimension_numbers = #tpu.dot_dimension_numbers<[1], [0], [0], [1], [0, 0, 1, 1], [], []>} : vector<16x64xf32>, vector<64x256xf32>, vector<16x256xf32> -> vector<16x256xf32>
    %291 = vector.extract_strided_slice %290 {offsets = [0, 0], sizes = [16, 128], strides = [1, 1]} : vector<16x256xf32> to vector<16x128xf32>
    %292 = vector.extract_strided_slice %290 {offsets = [0, 128], sizes = [16, 128], strides = [1, 1]} : vector<16x256xf32> to vector<16x128xf32>
    %293 = arith.negf %291 : vector<16x128xf32>
    %294 = math.exp %293 : vector<16x128xf32>
    %cst_116 = arith.constant 1.000000e+00 : f32
    %295 = vector.broadcast %cst_116 : f32 to vector<16x128xf32>
    %296 = arith.addf %295, %294 : vector<16x128xf32>
    %297 = arith.divf %295, %296 : vector<16x128xf32>
    %298 = arith.mulf %291, %297 : vector<16x128xf32>
    %299 = arith.mulf %298, %292 : vector<16x128xf32>
    %cst_117 = arith.constant dense<0.000000e+00> : vector<16x64xf32>
    %300 = tpu.matmul %299, %289, %cst_117 {dimension_numbers = #tpu.dot_dimension_numbers<[1], [0], [0], [1], [0, 0, 1, 1], [], []>} : vector<16x128xf32>, vector<128x64xf32>, vector<16x64xf32> -> vector<16x64xf32>
    %301 = arith.addf %300, %271 : vector<16x64xf32>
    %c0_118 = arith.constant 0 : index
    %c0_119 = arith.constant 0 : index
    %302 = vector.load %arg9[%c0_118, %c0_119] : memref<1x64xf32, #tpu.memory_space<vmem>>, vector<1x64xf32>
    %303 = arith.mulf %301, %301 : vector<16x64xf32>
    %cst_120 = arith.constant dense<0.000000e+00> : vector<16xf32>
    %304 = vector.multi_reduction <add>, %303, %cst_120 [1] : vector<16x64xf32> to vector<16xf32>
    %305 = vector.shape_cast %304 : vector<16xf32> to vector<16x1xf32>
    %cst_121 = arith.constant 6.400000e+01 : f32
    %306 = vector.broadcast %cst_121 : f32 to vector<16x1xf32>
    %307 = arith.divf %305, %306 : vector<16x1xf32>
    %cst_122 = arith.constant 9.99999997E-7 : f32
    %308 = vector.broadcast %cst_122 : f32 to vector<16x1xf32>
    %309 = arith.addf %307, %308 : vector<16x1xf32>
    %310 = math.rsqrt %309 : vector<16x1xf32>
    %311 = vector.broadcast %310 : vector<16x1xf32> to vector<16x64xf32>
    %312 = arith.mulf %301, %311 : vector<16x64xf32>
    %313 = vector.broadcast %302 : vector<1x64xf32> to vector<16x64xf32>
    %314 = arith.mulf %312, %313 : vector<16x64xf32>
    %c0_123 = arith.constant 0 : index
    %c0_124 = arith.constant 0 : index
    %315 = vector.load %arg10[%c0_123, %c0_124] : memref<64x192xf32, #tpu.memory_space<vmem>>, vector<64x192xf32>
    %cst_125 = arith.constant dense<0.000000e+00> : vector<16x192xf32>
    %316 = tpu.matmul %314, %315, %cst_125 {dimension_numbers = #tpu.dot_dimension_numbers<[1], [0], [0], [1], [0, 0, 1, 1], [], []>} : vector<16x64xf32>, vector<64x192xf32>, vector<16x192xf32> -> vector<16x192xf32>
    %317 = vector.extract_strided_slice %316 {offsets = [0, 0], sizes = [16, 32], strides = [1, 1]} : vector<16x192xf32> to vector<16x32xf32>
    %318 = arith.mulf %317, %3 : vector<16x32xf32>
    %319 = vector.extract_strided_slice %316 {offsets = [0, 32], sizes = [16, 32], strides = [1, 1]} : vector<16x192xf32> to vector<16x32xf32>
    %320 = arith.mulf %319, %4 : vector<16x32xf32>
    %321 = arith.addf %318, %320 : vector<16x32xf32>
    %322 = vector.extract_strided_slice %316 {offsets = [0, 64], sizes = [16, 32], strides = [1, 1]} : vector<16x192xf32> to vector<16x32xf32>
    %323 = arith.addf %300, %271 : vector<16x64xf32>
    %c0_126 = arith.constant 0 : index
    %c0_127 = arith.constant 0 : index
    %c0_128 = arith.constant 0 : index
    %324 = vector.load %arg11[%c0_126, %c0_127, %c0_128] : memref<2x1x64xf32, #tpu.memory_space<vmem>>, vector<1x1x64xf32>
    %325 = vector.shape_cast %324 : vector<1x1x64xf32> to vector<1x64xf32>
    %326 = arith.mulf %323, %323 : vector<16x64xf32>
    %cst_129 = arith.constant dense<0.000000e+00> : vector<16xf32>
    %327 = vector.multi_reduction <add>, %326, %cst_129 [1] : vector<16x64xf32> to vector<16xf32>
    %328 = vector.shape_cast %327 : vector<16xf32> to vector<16x1xf32>
    %cst_130 = arith.constant 6.400000e+01 : f32
    %329 = vector.broadcast %cst_130 : f32 to vector<16x1xf32>
    %330 = arith.divf %328, %329 : vector<16x1xf32>
    %cst_131 = arith.constant 9.99999997E-7 : f32
    %331 = vector.broadcast %cst_131 : f32 to vector<16x1xf32>
    %332 = arith.addf %330, %331 : vector<16x1xf32>
    %333 = math.rsqrt %332 : vector<16x1xf32>
    %334 = vector.broadcast %333 : vector<16x1xf32> to vector<16x64xf32>
    %335 = arith.mulf %323, %334 : vector<16x64xf32>
    %336 = vector.broadcast %325 : vector<1x64xf32> to vector<16x64xf32>
    %337 = arith.mulf %335, %336 : vector<16x64xf32>
    %c0_132 = arith.constant 0 : index
    %c0_133 = arith.constant 0 : index
    %c0_134 = arith.constant 0 : index
    %338 = vector.load %arg12[%c0_132, %c0_133, %c0_134] : memref<2x64x128xf32, #tpu.memory_space<vmem>>, vector<1x64x128xf32>
    %339 = vector.shape_cast %338 : vector<1x64x128xf32> to vector<64x128xf32>
    %cst_135 = arith.constant dense<0.000000e+00> : vector<16x128xf32>
    %340 = tpu.matmul %337, %339, %cst_135 {dimension_numbers = #tpu.dot_dimension_numbers<[1], [0], [0], [1], [0, 0, 1, 1], [], []>} : vector<16x64xf32>, vector<64x128xf32>, vector<16x128xf32> -> vector<16x128xf32>
    %341 = vector.extract_strided_slice %340 {offsets = [0, 0], sizes = [16, 64], strides = [1, 1]} : vector<16x128xf32> to vector<16x64xf32>
    %342 = arith.mulf %341, %1 : vector<16x64xf32>
    %343 = vector.extract_strided_slice %340 {offsets = [0, 64], sizes = [16, 64], strides = [1, 1]} : vector<16x128xf32> to vector<16x64xf32>
    %344 = arith.mulf %343, %2 : vector<16x64xf32>
    %345 = arith.addf %342, %344 : vector<16x64xf32>
    %c0_136 = arith.constant 0 : index
    %c0_137 = arith.constant 0 : index
    %c0_138 = arith.constant 0 : index
    %346 = vector.load %arg13[%c0_136, %c0_137, %c0_138] : memref<2x64x64xf32, #tpu.memory_space<vmem>>, vector<1x64x64xf32>
    %347 = vector.shape_cast %346 : vector<1x64x64xf32> to vector<64x64xf32>
    %cst_139 = arith.constant 0.000000e+00 : f32
    %348 = vector.broadcast %cst_139 : f32 to vector<16x64xf32>
    %349 = vector.extract_strided_slice %345 {offsets = [0, 0], sizes = [16, 16], strides = [1, 1]} : vector<16x64xf32> to vector<16x16xf32>
    %350 = vector.extract_strided_slice %321 {offsets = [0, 0], sizes = [16, 16], strides = [1, 1]} : vector<16x32xf32> to vector<16x16xf32>
    %351 = vector.extract_strided_slice %322 {offsets = [0, 0], sizes = [16, 16], strides = [1, 1]} : vector<16x32xf32> to vector<16x16xf32>
    %cst_140 = arith.constant dense<0.000000e+00> : vector<16x16xf32>
    %352 = tpu.matmul %349, %350, %cst_140 {dimension_numbers = #tpu.dot_dimension_numbers<[1], [1], [0], [0], [0, 0, 1, 0], [], []>} : vector<16x16xf32>, vector<16x16xf32>, vector<16x16xf32> -> vector<16x16xf32>
    %cst_141 = arith.constant 2.500000e-01 : f32
    %353 = vector.broadcast %cst_141 : f32 to vector<16x16xf32>
    %354 = arith.mulf %352, %353 : vector<16x16xf32>
    %cst_142 = arith.constant -3.40282347E+38 : f32
    %355 = vector.broadcast %cst_142 : f32 to vector<16x16xf32>
    %356 = arith.select %7, %354, %355 : vector<16x16xi1>, vector<16x16xf32>
    %cst_143 = arith.constant dense<0xFF800000> : vector<16xf32>
    %357 = vector.multi_reduction <maximumf>, %356, %cst_143 [1] : vector<16x16xf32> to vector<16xf32>
    %358 = vector.shape_cast %357 : vector<16xf32> to vector<16x1xf32>
    %359 = vector.broadcast %358 : vector<16x1xf32> to vector<16x16xf32>
    %360 = arith.subf %356, %359 : vector<16x16xf32>
    %361 = math.exp %360 : vector<16x16xf32>
    %cst_144 = arith.constant dense<0.000000e+00> : vector<16xf32>
    %362 = vector.multi_reduction <add>, %361, %cst_144 [1] : vector<16x16xf32> to vector<16xf32>
    %363 = vector.shape_cast %362 : vector<16xf32> to vector<16x1xf32>
    %cst_145 = arith.constant dense<0.000000e+00> : vector<16x16xf32>
    %364 = tpu.matmul %361, %351, %cst_145 {dimension_numbers = #tpu.dot_dimension_numbers<[1], [0], [0], [1], [0, 0, 1, 1], [], []>} : vector<16x16xf32>, vector<16x16xf32>, vector<16x16xf32> -> vector<16x16xf32>
    %365 = vector.broadcast %363 : vector<16x1xf32> to vector<16x16xf32>
    %366 = arith.divf %364, %365 : vector<16x16xf32>
    %367 = vector.extract_strided_slice %347 {offsets = [0, 0], sizes = [16, 64], strides = [1, 1]} : vector<64x64xf32> to vector<16x64xf32>
    %cst_146 = arith.constant dense<0.000000e+00> : vector<16x64xf32>
    %368 = tpu.matmul %366, %367, %cst_146 {dimension_numbers = #tpu.dot_dimension_numbers<[1], [0], [0], [1], [0, 0, 1, 1], [], []>} : vector<16x16xf32>, vector<16x64xf32>, vector<16x64xf32> -> vector<16x64xf32>
    %369 = arith.addf %348, %368 : vector<16x64xf32>
    %370 = vector.extract_strided_slice %345 {offsets = [0, 16], sizes = [16, 16], strides = [1, 1]} : vector<16x64xf32> to vector<16x16xf32>
    %371 = vector.extract_strided_slice %321 {offsets = [0, 0], sizes = [16, 16], strides = [1, 1]} : vector<16x32xf32> to vector<16x16xf32>
    %372 = vector.extract_strided_slice %322 {offsets = [0, 0], sizes = [16, 16], strides = [1, 1]} : vector<16x32xf32> to vector<16x16xf32>
    %cst_147 = arith.constant dense<0.000000e+00> : vector<16x16xf32>
    %373 = tpu.matmul %370, %371, %cst_147 {dimension_numbers = #tpu.dot_dimension_numbers<[1], [1], [0], [0], [0, 0, 1, 0], [], []>} : vector<16x16xf32>, vector<16x16xf32>, vector<16x16xf32> -> vector<16x16xf32>
    %cst_148 = arith.constant 2.500000e-01 : f32
    %374 = vector.broadcast %cst_148 : f32 to vector<16x16xf32>
    %375 = arith.mulf %373, %374 : vector<16x16xf32>
    %cst_149 = arith.constant -3.40282347E+38 : f32
    %376 = vector.broadcast %cst_149 : f32 to vector<16x16xf32>
    %377 = arith.select %7, %375, %376 : vector<16x16xi1>, vector<16x16xf32>
    %cst_150 = arith.constant dense<0xFF800000> : vector<16xf32>
    %378 = vector.multi_reduction <maximumf>, %377, %cst_150 [1] : vector<16x16xf32> to vector<16xf32>
    %379 = vector.shape_cast %378 : vector<16xf32> to vector<16x1xf32>
    %380 = vector.broadcast %379 : vector<16x1xf32> to vector<16x16xf32>
    %381 = arith.subf %377, %380 : vector<16x16xf32>
    %382 = math.exp %381 : vector<16x16xf32>
    %cst_151 = arith.constant dense<0.000000e+00> : vector<16xf32>
    %383 = vector.multi_reduction <add>, %382, %cst_151 [1] : vector<16x16xf32> to vector<16xf32>
    %384 = vector.shape_cast %383 : vector<16xf32> to vector<16x1xf32>
    %cst_152 = arith.constant dense<0.000000e+00> : vector<16x16xf32>
    %385 = tpu.matmul %382, %372, %cst_152 {dimension_numbers = #tpu.dot_dimension_numbers<[1], [0], [0], [1], [0, 0, 1, 1], [], []>} : vector<16x16xf32>, vector<16x16xf32>, vector<16x16xf32> -> vector<16x16xf32>
    %386 = vector.broadcast %384 : vector<16x1xf32> to vector<16x16xf32>
    %387 = arith.divf %385, %386 : vector<16x16xf32>
    %388 = vector.extract_strided_slice %347 {offsets = [16, 0], sizes = [16, 64], strides = [1, 1]} : vector<64x64xf32> to vector<16x64xf32>
    %cst_153 = arith.constant dense<0.000000e+00> : vector<16x64xf32>
    %389 = tpu.matmul %387, %388, %cst_153 {dimension_numbers = #tpu.dot_dimension_numbers<[1], [0], [0], [1], [0, 0, 1, 1], [], []>} : vector<16x16xf32>, vector<16x64xf32>, vector<16x64xf32> -> vector<16x64xf32>
    %390 = arith.addf %369, %389 : vector<16x64xf32>
    %391 = vector.extract_strided_slice %345 {offsets = [0, 32], sizes = [16, 16], strides = [1, 1]} : vector<16x64xf32> to vector<16x16xf32>
    %392 = vector.extract_strided_slice %321 {offsets = [0, 16], sizes = [16, 16], strides = [1, 1]} : vector<16x32xf32> to vector<16x16xf32>
    %393 = vector.extract_strided_slice %322 {offsets = [0, 16], sizes = [16, 16], strides = [1, 1]} : vector<16x32xf32> to vector<16x16xf32>
    %cst_154 = arith.constant dense<0.000000e+00> : vector<16x16xf32>
    %394 = tpu.matmul %391, %392, %cst_154 {dimension_numbers = #tpu.dot_dimension_numbers<[1], [1], [0], [0], [0, 0, 1, 0], [], []>} : vector<16x16xf32>, vector<16x16xf32>, vector<16x16xf32> -> vector<16x16xf32>
    %cst_155 = arith.constant 2.500000e-01 : f32
    %395 = vector.broadcast %cst_155 : f32 to vector<16x16xf32>
    %396 = arith.mulf %394, %395 : vector<16x16xf32>
    %cst_156 = arith.constant -3.40282347E+38 : f32
    %397 = vector.broadcast %cst_156 : f32 to vector<16x16xf32>
    %398 = arith.select %7, %396, %397 : vector<16x16xi1>, vector<16x16xf32>
    %cst_157 = arith.constant dense<0xFF800000> : vector<16xf32>
    %399 = vector.multi_reduction <maximumf>, %398, %cst_157 [1] : vector<16x16xf32> to vector<16xf32>
    %400 = vector.shape_cast %399 : vector<16xf32> to vector<16x1xf32>
    %401 = vector.broadcast %400 : vector<16x1xf32> to vector<16x16xf32>
    %402 = arith.subf %398, %401 : vector<16x16xf32>
    %403 = math.exp %402 : vector<16x16xf32>
    %cst_158 = arith.constant dense<0.000000e+00> : vector<16xf32>
    %404 = vector.multi_reduction <add>, %403, %cst_158 [1] : vector<16x16xf32> to vector<16xf32>
    %405 = vector.shape_cast %404 : vector<16xf32> to vector<16x1xf32>
    %cst_159 = arith.constant dense<0.000000e+00> : vector<16x16xf32>
    %406 = tpu.matmul %403, %393, %cst_159 {dimension_numbers = #tpu.dot_dimension_numbers<[1], [0], [0], [1], [0, 0, 1, 1], [], []>} : vector<16x16xf32>, vector<16x16xf32>, vector<16x16xf32> -> vector<16x16xf32>
    %407 = vector.broadcast %405 : vector<16x1xf32> to vector<16x16xf32>
    %408 = arith.divf %406, %407 : vector<16x16xf32>
    %409 = vector.extract_strided_slice %347 {offsets = [32, 0], sizes = [16, 64], strides = [1, 1]} : vector<64x64xf32> to vector<16x64xf32>
    %cst_160 = arith.constant dense<0.000000e+00> : vector<16x64xf32>
    %410 = tpu.matmul %408, %409, %cst_160 {dimension_numbers = #tpu.dot_dimension_numbers<[1], [0], [0], [1], [0, 0, 1, 1], [], []>} : vector<16x16xf32>, vector<16x64xf32>, vector<16x64xf32> -> vector<16x64xf32>
    %411 = arith.addf %390, %410 : vector<16x64xf32>
    %412 = vector.extract_strided_slice %345 {offsets = [0, 48], sizes = [16, 16], strides = [1, 1]} : vector<16x64xf32> to vector<16x16xf32>
    %413 = vector.extract_strided_slice %321 {offsets = [0, 16], sizes = [16, 16], strides = [1, 1]} : vector<16x32xf32> to vector<16x16xf32>
    %414 = vector.extract_strided_slice %322 {offsets = [0, 16], sizes = [16, 16], strides = [1, 1]} : vector<16x32xf32> to vector<16x16xf32>
    %cst_161 = arith.constant dense<0.000000e+00> : vector<16x16xf32>
    %415 = tpu.matmul %412, %413, %cst_161 {dimension_numbers = #tpu.dot_dimension_numbers<[1], [1], [0], [0], [0, 0, 1, 0], [], []>} : vector<16x16xf32>, vector<16x16xf32>, vector<16x16xf32> -> vector<16x16xf32>
    %cst_162 = arith.constant 2.500000e-01 : f32
    %416 = vector.broadcast %cst_162 : f32 to vector<16x16xf32>
    %417 = arith.mulf %415, %416 : vector<16x16xf32>
    %cst_163 = arith.constant -3.40282347E+38 : f32
    %418 = vector.broadcast %cst_163 : f32 to vector<16x16xf32>
    %419 = arith.select %7, %417, %418 : vector<16x16xi1>, vector<16x16xf32>
    %cst_164 = arith.constant dense<0xFF800000> : vector<16xf32>
    %420 = vector.multi_reduction <maximumf>, %419, %cst_164 [1] : vector<16x16xf32> to vector<16xf32>
    %421 = vector.shape_cast %420 : vector<16xf32> to vector<16x1xf32>
    %422 = vector.broadcast %421 : vector<16x1xf32> to vector<16x16xf32>
    %423 = arith.subf %419, %422 : vector<16x16xf32>
    %424 = math.exp %423 : vector<16x16xf32>
    %cst_165 = arith.constant dense<0.000000e+00> : vector<16xf32>
    %425 = vector.multi_reduction <add>, %424, %cst_165 [1] : vector<16x16xf32> to vector<16xf32>
    %426 = vector.shape_cast %425 : vector<16xf32> to vector<16x1xf32>
    %cst_166 = arith.constant dense<0.000000e+00> : vector<16x16xf32>
    %427 = tpu.matmul %424, %414, %cst_166 {dimension_numbers = #tpu.dot_dimension_numbers<[1], [0], [0], [1], [0, 0, 1, 1], [], []>} : vector<16x16xf32>, vector<16x16xf32>, vector<16x16xf32> -> vector<16x16xf32>
    %428 = vector.broadcast %426 : vector<16x1xf32> to vector<16x16xf32>
    %429 = arith.divf %427, %428 : vector<16x16xf32>
    %430 = vector.extract_strided_slice %347 {offsets = [48, 0], sizes = [16, 64], strides = [1, 1]} : vector<64x64xf32> to vector<16x64xf32>
    %cst_167 = arith.constant dense<0.000000e+00> : vector<16x64xf32>
    %431 = tpu.matmul %429, %430, %cst_167 {dimension_numbers = #tpu.dot_dimension_numbers<[1], [0], [0], [1], [0, 0, 1, 1], [], []>} : vector<16x16xf32>, vector<16x64xf32>, vector<16x64xf32> -> vector<16x64xf32>
    %432 = arith.addf %411, %431 : vector<16x64xf32>
    %433 = arith.addf %432, %323 : vector<16x64xf32>
    %c0_168 = arith.constant 0 : index
    %c0_169 = arith.constant 0 : index
    %c0_170 = arith.constant 0 : index
    %434 = vector.load %arg14[%c0_168, %c0_169, %c0_170] : memref<2x1x64xf32, #tpu.memory_space<vmem>>, vector<1x1x64xf32>
    %435 = vector.shape_cast %434 : vector<1x1x64xf32> to vector<1x64xf32>
    %436 = arith.mulf %433, %433 : vector<16x64xf32>
    %cst_171 = arith.constant dense<0.000000e+00> : vector<16xf32>
    %437 = vector.multi_reduction <add>, %436, %cst_171 [1] : vector<16x64xf32> to vector<16xf32>
    %438 = vector.shape_cast %437 : vector<16xf32> to vector<16x1xf32>
    %cst_172 = arith.constant 6.400000e+01 : f32
    %439 = vector.broadcast %cst_172 : f32 to vector<16x1xf32>
    %440 = arith.divf %438, %439 : vector<16x1xf32>
    %cst_173 = arith.constant 9.99999997E-7 : f32
    %441 = vector.broadcast %cst_173 : f32 to vector<16x1xf32>
    %442 = arith.addf %440, %441 : vector<16x1xf32>
    %443 = math.rsqrt %442 : vector<16x1xf32>
    %444 = vector.broadcast %443 : vector<16x1xf32> to vector<16x64xf32>
    %445 = arith.mulf %433, %444 : vector<16x64xf32>
    %446 = vector.broadcast %435 : vector<1x64xf32> to vector<16x64xf32>
    %447 = arith.mulf %445, %446 : vector<16x64xf32>
    %c0_174 = arith.constant 0 : index
    %c0_175 = arith.constant 0 : index
    %c0_176 = arith.constant 0 : index
    %448 = vector.load %arg15[%c0_174, %c0_175, %c0_176] : memref<2x64x256xf32, #tpu.memory_space<vmem>>, vector<1x64x256xf32>
    %449 = vector.shape_cast %448 : vector<1x64x256xf32> to vector<64x256xf32>
    %c0_177 = arith.constant 0 : index
    %c0_178 = arith.constant 0 : index
    %c0_179 = arith.constant 0 : index
    %450 = vector.load %arg16[%c0_177, %c0_178, %c0_179] : memref<2x128x64xf32, #tpu.memory_space<vmem>>, vector<1x128x64xf32>
    %451 = vector.shape_cast %450 : vector<1x128x64xf32> to vector<128x64xf32>
    %cst_180 = arith.constant dense<0.000000e+00> : vector<16x256xf32>
    %452 = tpu.matmul %447, %449, %cst_180 {dimension_numbers = #tpu.dot_dimension_numbers<[1], [0], [0], [1], [0, 0, 1, 1], [], []>} : vector<16x64xf32>, vector<64x256xf32>, vector<16x256xf32> -> vector<16x256xf32>
    %453 = vector.extract_strided_slice %452 {offsets = [0, 0], sizes = [16, 128], strides = [1, 1]} : vector<16x256xf32> to vector<16x128xf32>
    %454 = vector.extract_strided_slice %452 {offsets = [0, 128], sizes = [16, 128], strides = [1, 1]} : vector<16x256xf32> to vector<16x128xf32>
    %455 = arith.negf %453 : vector<16x128xf32>
    %456 = math.exp %455 : vector<16x128xf32>
    %cst_181 = arith.constant 1.000000e+00 : f32
    %457 = vector.broadcast %cst_181 : f32 to vector<16x128xf32>
    %458 = arith.addf %457, %456 : vector<16x128xf32>
    %459 = arith.divf %457, %458 : vector<16x128xf32>
    %460 = arith.mulf %453, %459 : vector<16x128xf32>
    %461 = arith.mulf %460, %454 : vector<16x128xf32>
    %cst_182 = arith.constant dense<0.000000e+00> : vector<16x64xf32>
    %462 = tpu.matmul %461, %451, %cst_182 {dimension_numbers = #tpu.dot_dimension_numbers<[1], [0], [0], [1], [0, 0, 1, 1], [], []>} : vector<16x128xf32>, vector<128x64xf32>, vector<16x64xf32> -> vector<16x64xf32>
    %463 = vector.extract_strided_slice %316 {offsets = [0, 96], sizes = [16, 32], strides = [1, 1]} : vector<16x192xf32> to vector<16x32xf32>
    %464 = arith.mulf %463, %3 : vector<16x32xf32>
    %465 = vector.extract_strided_slice %316 {offsets = [0, 128], sizes = [16, 32], strides = [1, 1]} : vector<16x192xf32> to vector<16x32xf32>
    %466 = arith.mulf %465, %4 : vector<16x32xf32>
    %467 = arith.addf %464, %466 : vector<16x32xf32>
    %468 = vector.extract_strided_slice %316 {offsets = [0, 160], sizes = [16, 32], strides = [1, 1]} : vector<16x192xf32> to vector<16x32xf32>
    %469 = arith.addf %462, %433 : vector<16x64xf32>
    %c1_183 = arith.constant 1 : index
    %c0_184 = arith.constant 0 : index
    %c0_185 = arith.constant 0 : index
    %470 = vector.load %arg11[%c1_183, %c0_184, %c0_185] : memref<2x1x64xf32, #tpu.memory_space<vmem>>, vector<1x1x64xf32>
    %471 = vector.shape_cast %470 : vector<1x1x64xf32> to vector<1x64xf32>
    %472 = arith.mulf %469, %469 : vector<16x64xf32>
    %cst_186 = arith.constant dense<0.000000e+00> : vector<16xf32>
    %473 = vector.multi_reduction <add>, %472, %cst_186 [1] : vector<16x64xf32> to vector<16xf32>
    %474 = vector.shape_cast %473 : vector<16xf32> to vector<16x1xf32>
    %cst_187 = arith.constant 6.400000e+01 : f32
    %475 = vector.broadcast %cst_187 : f32 to vector<16x1xf32>
    %476 = arith.divf %474, %475 : vector<16x1xf32>
    %cst_188 = arith.constant 9.99999997E-7 : f32
    %477 = vector.broadcast %cst_188 : f32 to vector<16x1xf32>
    %478 = arith.addf %476, %477 : vector<16x1xf32>
    %479 = math.rsqrt %478 : vector<16x1xf32>
    %480 = vector.broadcast %479 : vector<16x1xf32> to vector<16x64xf32>
    %481 = arith.mulf %469, %480 : vector<16x64xf32>
    %482 = vector.broadcast %471 : vector<1x64xf32> to vector<16x64xf32>
    %483 = arith.mulf %481, %482 : vector<16x64xf32>
    %c1_189 = arith.constant 1 : index
    %c0_190 = arith.constant 0 : index
    %c0_191 = arith.constant 0 : index
    %484 = vector.load %arg12[%c1_189, %c0_190, %c0_191] : memref<2x64x128xf32, #tpu.memory_space<vmem>>, vector<1x64x128xf32>
    %485 = vector.shape_cast %484 : vector<1x64x128xf32> to vector<64x128xf32>
    %cst_192 = arith.constant dense<0.000000e+00> : vector<16x128xf32>
    %486 = tpu.matmul %483, %485, %cst_192 {dimension_numbers = #tpu.dot_dimension_numbers<[1], [0], [0], [1], [0, 0, 1, 1], [], []>} : vector<16x64xf32>, vector<64x128xf32>, vector<16x128xf32> -> vector<16x128xf32>
    %487 = vector.extract_strided_slice %486 {offsets = [0, 0], sizes = [16, 64], strides = [1, 1]} : vector<16x128xf32> to vector<16x64xf32>
    %488 = arith.mulf %487, %1 : vector<16x64xf32>
    %489 = vector.extract_strided_slice %486 {offsets = [0, 64], sizes = [16, 64], strides = [1, 1]} : vector<16x128xf32> to vector<16x64xf32>
    %490 = arith.mulf %489, %2 : vector<16x64xf32>
    %491 = arith.addf %488, %490 : vector<16x64xf32>
    %c1_193 = arith.constant 1 : index
    %c0_194 = arith.constant 0 : index
    %c0_195 = arith.constant 0 : index
    %492 = vector.load %arg13[%c1_193, %c0_194, %c0_195] : memref<2x64x64xf32, #tpu.memory_space<vmem>>, vector<1x64x64xf32>
    %493 = vector.shape_cast %492 : vector<1x64x64xf32> to vector<64x64xf32>
    %cst_196 = arith.constant 0.000000e+00 : f32
    %494 = vector.broadcast %cst_196 : f32 to vector<16x64xf32>
    %495 = vector.extract_strided_slice %491 {offsets = [0, 0], sizes = [16, 16], strides = [1, 1]} : vector<16x64xf32> to vector<16x16xf32>
    %496 = vector.extract_strided_slice %467 {offsets = [0, 0], sizes = [16, 16], strides = [1, 1]} : vector<16x32xf32> to vector<16x16xf32>
    %497 = vector.extract_strided_slice %468 {offsets = [0, 0], sizes = [16, 16], strides = [1, 1]} : vector<16x32xf32> to vector<16x16xf32>
    %cst_197 = arith.constant dense<0.000000e+00> : vector<16x16xf32>
    %498 = tpu.matmul %495, %496, %cst_197 {dimension_numbers = #tpu.dot_dimension_numbers<[1], [1], [0], [0], [0, 0, 1, 0], [], []>} : vector<16x16xf32>, vector<16x16xf32>, vector<16x16xf32> -> vector<16x16xf32>
    %cst_198 = arith.constant 2.500000e-01 : f32
    %499 = vector.broadcast %cst_198 : f32 to vector<16x16xf32>
    %500 = arith.mulf %498, %499 : vector<16x16xf32>
    %cst_199 = arith.constant -3.40282347E+38 : f32
    %501 = vector.broadcast %cst_199 : f32 to vector<16x16xf32>
    %502 = arith.select %7, %500, %501 : vector<16x16xi1>, vector<16x16xf32>
    %cst_200 = arith.constant dense<0xFF800000> : vector<16xf32>
    %503 = vector.multi_reduction <maximumf>, %502, %cst_200 [1] : vector<16x16xf32> to vector<16xf32>
    %504 = vector.shape_cast %503 : vector<16xf32> to vector<16x1xf32>
    %505 = vector.broadcast %504 : vector<16x1xf32> to vector<16x16xf32>
    %506 = arith.subf %502, %505 : vector<16x16xf32>
    %507 = math.exp %506 : vector<16x16xf32>
    %cst_201 = arith.constant dense<0.000000e+00> : vector<16xf32>
    %508 = vector.multi_reduction <add>, %507, %cst_201 [1] : vector<16x16xf32> to vector<16xf32>
    %509 = vector.shape_cast %508 : vector<16xf32> to vector<16x1xf32>
    %cst_202 = arith.constant dense<0.000000e+00> : vector<16x16xf32>
    %510 = tpu.matmul %507, %497, %cst_202 {dimension_numbers = #tpu.dot_dimension_numbers<[1], [0], [0], [1], [0, 0, 1, 1], [], []>} : vector<16x16xf32>, vector<16x16xf32>, vector<16x16xf32> -> vector<16x16xf32>
    %511 = vector.broadcast %509 : vector<16x1xf32> to vector<16x16xf32>
    %512 = arith.divf %510, %511 : vector<16x16xf32>
    %513 = vector.extract_strided_slice %493 {offsets = [0, 0], sizes = [16, 64], strides = [1, 1]} : vector<64x64xf32> to vector<16x64xf32>
    %cst_203 = arith.constant dense<0.000000e+00> : vector<16x64xf32>
    %514 = tpu.matmul %512, %513, %cst_203 {dimension_numbers = #tpu.dot_dimension_numbers<[1], [0], [0], [1], [0, 0, 1, 1], [], []>} : vector<16x16xf32>, vector<16x64xf32>, vector<16x64xf32> -> vector<16x64xf32>
    %515 = arith.addf %494, %514 : vector<16x64xf32>
    %516 = vector.extract_strided_slice %491 {offsets = [0, 16], sizes = [16, 16], strides = [1, 1]} : vector<16x64xf32> to vector<16x16xf32>
    %517 = vector.extract_strided_slice %467 {offsets = [0, 0], sizes = [16, 16], strides = [1, 1]} : vector<16x32xf32> to vector<16x16xf32>
    %518 = vector.extract_strided_slice %468 {offsets = [0, 0], sizes = [16, 16], strides = [1, 1]} : vector<16x32xf32> to vector<16x16xf32>
    %cst_204 = arith.constant dense<0.000000e+00> : vector<16x16xf32>
    %519 = tpu.matmul %516, %517, %cst_204 {dimension_numbers = #tpu.dot_dimension_numbers<[1], [1], [0], [0], [0, 0, 1, 0], [], []>} : vector<16x16xf32>, vector<16x16xf32>, vector<16x16xf32> -> vector<16x16xf32>
    %cst_205 = arith.constant 2.500000e-01 : f32
    %520 = vector.broadcast %cst_205 : f32 to vector<16x16xf32>
    %521 = arith.mulf %519, %520 : vector<16x16xf32>
    %cst_206 = arith.constant -3.40282347E+38 : f32
    %522 = vector.broadcast %cst_206 : f32 to vector<16x16xf32>
    %523 = arith.select %7, %521, %522 : vector<16x16xi1>, vector<16x16xf32>
    %cst_207 = arith.constant dense<0xFF800000> : vector<16xf32>
    %524 = vector.multi_reduction <maximumf>, %523, %cst_207 [1] : vector<16x16xf32> to vector<16xf32>
    %525 = vector.shape_cast %524 : vector<16xf32> to vector<16x1xf32>
    %526 = vector.broadcast %525 : vector<16x1xf32> to vector<16x16xf32>
    %527 = arith.subf %523, %526 : vector<16x16xf32>
    %528 = math.exp %527 : vector<16x16xf32>
    %cst_208 = arith.constant dense<0.000000e+00> : vector<16xf32>
    %529 = vector.multi_reduction <add>, %528, %cst_208 [1] : vector<16x16xf32> to vector<16xf32>
    %530 = vector.shape_cast %529 : vector<16xf32> to vector<16x1xf32>
    %cst_209 = arith.constant dense<0.000000e+00> : vector<16x16xf32>
    %531 = tpu.matmul %528, %518, %cst_209 {dimension_numbers = #tpu.dot_dimension_numbers<[1], [0], [0], [1], [0, 0, 1, 1], [], []>} : vector<16x16xf32>, vector<16x16xf32>, vector<16x16xf32> -> vector<16x16xf32>
    %532 = vector.broadcast %530 : vector<16x1xf32> to vector<16x16xf32>
    %533 = arith.divf %531, %532 : vector<16x16xf32>
    %534 = vector.extract_strided_slice %493 {offsets = [16, 0], sizes = [16, 64], strides = [1, 1]} : vector<64x64xf32> to vector<16x64xf32>
    %cst_210 = arith.constant dense<0.000000e+00> : vector<16x64xf32>
    %535 = tpu.matmul %533, %534, %cst_210 {dimension_numbers = #tpu.dot_dimension_numbers<[1], [0], [0], [1], [0, 0, 1, 1], [], []>} : vector<16x16xf32>, vector<16x64xf32>, vector<16x64xf32> -> vector<16x64xf32>
    %536 = arith.addf %515, %535 : vector<16x64xf32>
    %537 = vector.extract_strided_slice %491 {offsets = [0, 32], sizes = [16, 16], strides = [1, 1]} : vector<16x64xf32> to vector<16x16xf32>
    %538 = vector.extract_strided_slice %467 {offsets = [0, 16], sizes = [16, 16], strides = [1, 1]} : vector<16x32xf32> to vector<16x16xf32>
    %539 = vector.extract_strided_slice %468 {offsets = [0, 16], sizes = [16, 16], strides = [1, 1]} : vector<16x32xf32> to vector<16x16xf32>
    %cst_211 = arith.constant dense<0.000000e+00> : vector<16x16xf32>
    %540 = tpu.matmul %537, %538, %cst_211 {dimension_numbers = #tpu.dot_dimension_numbers<[1], [1], [0], [0], [0, 0, 1, 0], [], []>} : vector<16x16xf32>, vector<16x16xf32>, vector<16x16xf32> -> vector<16x16xf32>
    %cst_212 = arith.constant 2.500000e-01 : f32
    %541 = vector.broadcast %cst_212 : f32 to vector<16x16xf32>
    %542 = arith.mulf %540, %541 : vector<16x16xf32>
    %cst_213 = arith.constant -3.40282347E+38 : f32
    %543 = vector.broadcast %cst_213 : f32 to vector<16x16xf32>
    %544 = arith.select %7, %542, %543 : vector<16x16xi1>, vector<16x16xf32>
    %cst_214 = arith.constant dense<0xFF800000> : vector<16xf32>
    %545 = vector.multi_reduction <maximumf>, %544, %cst_214 [1] : vector<16x16xf32> to vector<16xf32>
    %546 = vector.shape_cast %545 : vector<16xf32> to vector<16x1xf32>
    %547 = vector.broadcast %546 : vector<16x1xf32> to vector<16x16xf32>
    %548 = arith.subf %544, %547 : vector<16x16xf32>
    %549 = math.exp %548 : vector<16x16xf32>
    %cst_215 = arith.constant dense<0.000000e+00> : vector<16xf32>
    %550 = vector.multi_reduction <add>, %549, %cst_215 [1] : vector<16x16xf32> to vector<16xf32>
    %551 = vector.shape_cast %550 : vector<16xf32> to vector<16x1xf32>
    %cst_216 = arith.constant dense<0.000000e+00> : vector<16x16xf32>
    %552 = tpu.matmul %549, %539, %cst_216 {dimension_numbers = #tpu.dot_dimension_numbers<[1], [0], [0], [1], [0, 0, 1, 1], [], []>} : vector<16x16xf32>, vector<16x16xf32>, vector<16x16xf32> -> vector<16x16xf32>
    %553 = vector.broadcast %551 : vector<16x1xf32> to vector<16x16xf32>
    %554 = arith.divf %552, %553 : vector<16x16xf32>
    %555 = vector.extract_strided_slice %493 {offsets = [32, 0], sizes = [16, 64], strides = [1, 1]} : vector<64x64xf32> to vector<16x64xf32>
    %cst_217 = arith.constant dense<0.000000e+00> : vector<16x64xf32>
    %556 = tpu.matmul %554, %555, %cst_217 {dimension_numbers = #tpu.dot_dimension_numbers<[1], [0], [0], [1], [0, 0, 1, 1], [], []>} : vector<16x16xf32>, vector<16x64xf32>, vector<16x64xf32> -> vector<16x64xf32>
    %557 = arith.addf %536, %556 : vector<16x64xf32>
    %558 = vector.extract_strided_slice %491 {offsets = [0, 48], sizes = [16, 16], strides = [1, 1]} : vector<16x64xf32> to vector<16x16xf32>
    %559 = vector.extract_strided_slice %467 {offsets = [0, 16], sizes = [16, 16], strides = [1, 1]} : vector<16x32xf32> to vector<16x16xf32>
    %560 = vector.extract_strided_slice %468 {offsets = [0, 16], sizes = [16, 16], strides = [1, 1]} : vector<16x32xf32> to vector<16x16xf32>
    %cst_218 = arith.constant dense<0.000000e+00> : vector<16x16xf32>
    %561 = tpu.matmul %558, %559, %cst_218 {dimension_numbers = #tpu.dot_dimension_numbers<[1], [1], [0], [0], [0, 0, 1, 0], [], []>} : vector<16x16xf32>, vector<16x16xf32>, vector<16x16xf32> -> vector<16x16xf32>
    %cst_219 = arith.constant 2.500000e-01 : f32
    %562 = vector.broadcast %cst_219 : f32 to vector<16x16xf32>
    %563 = arith.mulf %561, %562 : vector<16x16xf32>
    %cst_220 = arith.constant -3.40282347E+38 : f32
    %564 = vector.broadcast %cst_220 : f32 to vector<16x16xf32>
    %565 = arith.select %7, %563, %564 : vector<16x16xi1>, vector<16x16xf32>
    %cst_221 = arith.constant dense<0xFF800000> : vector<16xf32>
    %566 = vector.multi_reduction <maximumf>, %565, %cst_221 [1] : vector<16x16xf32> to vector<16xf32>
    %567 = vector.shape_cast %566 : vector<16xf32> to vector<16x1xf32>
    %568 = vector.broadcast %567 : vector<16x1xf32> to vector<16x16xf32>
    %569 = arith.subf %565, %568 : vector<16x16xf32>
    %570 = math.exp %569 : vector<16x16xf32>
    %cst_222 = arith.constant dense<0.000000e+00> : vector<16xf32>
    %571 = vector.multi_reduction <add>, %570, %cst_222 [1] : vector<16x16xf32> to vector<16xf32>
    %572 = vector.shape_cast %571 : vector<16xf32> to vector<16x1xf32>
    %cst_223 = arith.constant dense<0.000000e+00> : vector<16x16xf32>
    %573 = tpu.matmul %570, %560, %cst_223 {dimension_numbers = #tpu.dot_dimension_numbers<[1], [0], [0], [1], [0, 0, 1, 1], [], []>} : vector<16x16xf32>, vector<16x16xf32>, vector<16x16xf32> -> vector<16x16xf32>
    %574 = vector.broadcast %572 : vector<16x1xf32> to vector<16x16xf32>
    %575 = arith.divf %573, %574 : vector<16x16xf32>
    %576 = vector.extract_strided_slice %493 {offsets = [48, 0], sizes = [16, 64], strides = [1, 1]} : vector<64x64xf32> to vector<16x64xf32>
    %cst_224 = arith.constant dense<0.000000e+00> : vector<16x64xf32>
    %577 = tpu.matmul %575, %576, %cst_224 {dimension_numbers = #tpu.dot_dimension_numbers<[1], [0], [0], [1], [0, 0, 1, 1], [], []>} : vector<16x16xf32>, vector<16x64xf32>, vector<16x64xf32> -> vector<16x64xf32>
    %578 = arith.addf %557, %577 : vector<16x64xf32>
    %579 = arith.addf %578, %469 : vector<16x64xf32>
    %c1_225 = arith.constant 1 : index
    %c0_226 = arith.constant 0 : index
    %c0_227 = arith.constant 0 : index
    %580 = vector.load %arg14[%c1_225, %c0_226, %c0_227] : memref<2x1x64xf32, #tpu.memory_space<vmem>>, vector<1x1x64xf32>
    %581 = vector.shape_cast %580 : vector<1x1x64xf32> to vector<1x64xf32>
    %582 = arith.mulf %579, %579 : vector<16x64xf32>
    %cst_228 = arith.constant dense<0.000000e+00> : vector<16xf32>
    %583 = vector.multi_reduction <add>, %582, %cst_228 [1] : vector<16x64xf32> to vector<16xf32>
    %584 = vector.shape_cast %583 : vector<16xf32> to vector<16x1xf32>
    %cst_229 = arith.constant 6.400000e+01 : f32
    %585 = vector.broadcast %cst_229 : f32 to vector<16x1xf32>
    %586 = arith.divf %584, %585 : vector<16x1xf32>
    %cst_230 = arith.constant 9.99999997E-7 : f32
    %587 = vector.broadcast %cst_230 : f32 to vector<16x1xf32>
    %588 = arith.addf %586, %587 : vector<16x1xf32>
    %589 = math.rsqrt %588 : vector<16x1xf32>
    %590 = vector.broadcast %589 : vector<16x1xf32> to vector<16x64xf32>
    %591 = arith.mulf %579, %590 : vector<16x64xf32>
    %592 = vector.broadcast %581 : vector<1x64xf32> to vector<16x64xf32>
    %593 = arith.mulf %591, %592 : vector<16x64xf32>
    %c1_231 = arith.constant 1 : index
    %c0_232 = arith.constant 0 : index
    %c0_233 = arith.constant 0 : index
    %594 = vector.load %arg15[%c1_231, %c0_232, %c0_233] : memref<2x64x256xf32, #tpu.memory_space<vmem>>, vector<1x64x256xf32>
    %595 = vector.shape_cast %594 : vector<1x64x256xf32> to vector<64x256xf32>
    %c1_234 = arith.constant 1 : index
    %c0_235 = arith.constant 0 : index
    %c0_236 = arith.constant 0 : index
    %596 = vector.load %arg16[%c1_234, %c0_235, %c0_236] : memref<2x128x64xf32, #tpu.memory_space<vmem>>, vector<1x128x64xf32>
    %597 = vector.shape_cast %596 : vector<1x128x64xf32> to vector<128x64xf32>
    %cst_237 = arith.constant dense<0.000000e+00> : vector<16x256xf32>
    %598 = tpu.matmul %593, %595, %cst_237 {dimension_numbers = #tpu.dot_dimension_numbers<[1], [0], [0], [1], [0, 0, 1, 1], [], []>} : vector<16x64xf32>, vector<64x256xf32>, vector<16x256xf32> -> vector<16x256xf32>
    %599 = vector.extract_strided_slice %598 {offsets = [0, 0], sizes = [16, 128], strides = [1, 1]} : vector<16x256xf32> to vector<16x128xf32>
    %600 = vector.extract_strided_slice %598 {offsets = [0, 128], sizes = [16, 128], strides = [1, 1]} : vector<16x256xf32> to vector<16x128xf32>
    %601 = arith.negf %599 : vector<16x128xf32>
    %602 = math.exp %601 : vector<16x128xf32>
    %cst_238 = arith.constant 1.000000e+00 : f32
    %603 = vector.broadcast %cst_238 : f32 to vector<16x128xf32>
    %604 = arith.addf %603, %602 : vector<16x128xf32>
    %605 = arith.divf %603, %604 : vector<16x128xf32>
    %606 = arith.mulf %599, %605 : vector<16x128xf32>
    %607 = arith.mulf %606, %600 : vector<16x128xf32>
    %cst_239 = arith.constant dense<0.000000e+00> : vector<16x64xf32>
    %608 = tpu.matmul %607, %597, %cst_239 {dimension_numbers = #tpu.dot_dimension_numbers<[1], [0], [0], [1], [0, 0, 1, 1], [], []>} : vector<16x128xf32>, vector<128x64xf32>, vector<16x64xf32> -> vector<16x64xf32>
    %609 = arith.addf %608, %579 : vector<16x64xf32>
    %c0_240 = arith.constant 0 : index
    %c0_241 = arith.constant 0 : index
    %610 = vector.load %arg17[%c0_240, %c0_241] : memref<1x64xf32, #tpu.memory_space<vmem>>, vector<1x64xf32>
    %611 = arith.mulf %609, %609 : vector<16x64xf32>
    %cst_242 = arith.constant dense<0.000000e+00> : vector<16xf32>
    %612 = vector.multi_reduction <add>, %611, %cst_242 [1] : vector<16x64xf32> to vector<16xf32>
    %613 = vector.shape_cast %612 : vector<16xf32> to vector<16x1xf32>
    %cst_243 = arith.constant 6.400000e+01 : f32
    %614 = vector.broadcast %cst_243 : f32 to vector<16x1xf32>
    %615 = arith.divf %613, %614 : vector<16x1xf32>
    %cst_244 = arith.constant 9.99999997E-7 : f32
    %616 = vector.broadcast %cst_244 : f32 to vector<16x1xf32>
    %617 = arith.addf %615, %616 : vector<16x1xf32>
    %618 = math.rsqrt %617 : vector<16x1xf32>
    %619 = vector.broadcast %618 : vector<16x1xf32> to vector<16x64xf32>
    %620 = arith.mulf %609, %619 : vector<16x64xf32>
    %621 = vector.broadcast %610 : vector<1x64xf32> to vector<16x64xf32>
    %622 = arith.mulf %620, %621 : vector<16x64xf32>
    %c0_245 = arith.constant 0 : index
    %c0_246 = arith.constant 0 : index
    %623 = vector.load %arg18[%c0_245, %c0_246] : memref<16x64xf32, #tpu.memory_space<vmem>>, vector<16x64xf32>
    tpu.vector_store %arg18[%c0_245, %c0_246], %622 {strides = array<i32>} : memref<16x64xf32, #tpu.memory_space<vmem>>, vector<16x64xf32>,
    return
  }
}

</mosaic_0001>

<bundles_post_ra>
// kernel: tile.14
= control target key start
LH: loop header
LB: loop body
LE: loop exit
PB: predicated region body
PF: predicated region fallthrough
CT: control target
= control target key end

     0   :  { %vm68_vm0 = vcmask 1047556   ;;  %s167_s9 = smov 32   ;;  %s168_s10 = smov 16   ;;  %vm70_vm1 = vcmask 130048   ;;  %vm89_vm2 = vcmask 523648   ;;  %vm110_vm3 = vcmask 392448   ;;  %s259_s0 = inlined_call_operand.vmem [shape: f32[16,4,16], index: 0, kind: input, shape index: {}]   ;;  %s260_s1 = inlined_call_operand.vmem [shape: f32[16,64], index: 1, kind: output, shape index: {}]  }
   0x1   :  { %v152_v0 = vld [vmem:[%s259_s0 + $0x1c] sm:$0xf]  ;;  %v153_v1 = vld [vmem:[%s259_s0 + $0x18] sm:$0xf]  ;;  %v154_v2 = vld [vmem:[%s259_s0 + $0x14] sm:$0xf] }
   0x2   :  { %39 = vst [vmem:[#allocation0 + $0x38] sm:$0xf] %v152_v0  ;;  %v155_v3 = vld [vmem:[%s259_s0 + $0x10] sm:$0xf]  ;;  %v156_v4 = vld [vmem:[%s259_s0 + $0xc] sm:$0xf] }
   0x3   :  { %43 = vst [vmem:[#allocation0 + $0x30] sm:$0xf] %v153_v1  ;;  %v157_v5 = vld [vmem:[%s259_s0 + $0x8] sm:$0xf]  ;;  %v158_v6 = vld [vmem:[%s259_s0 + $0x4] sm:$0xf] }
   0x4   :  { %47 = vst [vmem:[#allocation0 + $0x28] sm:$0xf] %v154_v2  ;;  %v64_v7 = vld [vmem:[%s259_s0] sm:$0xf]  ;;  %v144_v8 = vld [vmem:[%s259_s0 + $0x3c] sm:$0xf] }
   0x5   :  { %51 = vst [vmem:[#allocation0 + $0x20] sm:$0xf] %v155_v3  ;;  %v145_v9 = vld [vmem:[%s259_s0 + $0x38] sm:$0xf]  ;;  %v146_v10 = vld [vmem:[%s259_s0 + $0x34] sm:$0xf] }
   0x6   :  { %55 = vst [vmem:[#allocation0 + $0x18] sm:$0xf] %v156_v4  ;;  %v147_v11 = vld [vmem:[%s259_s0 + $0x30] sm:$0xf]  ;;  %v148_v12 = vld [vmem:[%s259_s0 + $0x2c] sm:$0xf] }
   0x7   :  { %59 = vst [vmem:[#allocation0 + $0x10] sm:$0xf] %v157_v5  ;;  %v149_v13 = vld [vmem:[%s259_s0 + $0x28] sm:$0xf]  ;;  %v150_v15 = vld [vmem:[%s259_s0 + $0x24] sm:$0xf] }
   0x8   :  { %63 = vst [vmem:[#allocation0 + $0x8] sm:$0xf] %v158_v6  ;;  %v151_v17 = vld [vmem:[%s259_s0 + $0x20] sm:$0xf]  ;;  %s166_s0 = smov 48   ;;  %vm131_vm4 = vcmask 261248  }
   0x9   :  { %65 = vst [vmem:[#allocation0] sm:$0xf] %v64_v7 }
   0xa   :  { %7 = vst [vmem:[#allocation0 + $0x78] sm:$0xf] %v144_v8 }
   0xb   :  { %11 = vst [vmem:[#allocation0 + $0x70] sm:$0xf] %v145_v9 }
   0xc   :  { %v84_v14 = vld [vmem:[#allocation0 + $0x3] ss:$8 sm:$0xf0]   ;;  %15 = vst [vmem:[#allocation0 + $0x68] sm:$0xf] %v146_v10 }
   0xd   :  { %v105_v16 = vld [vmem:[#allocation0 + $0x2] ss:$8 sm:$0xf0]   ;;  %19 = vst [vmem:[#allocation0 + $0x60] sm:$0xf] %v147_v11 }
   0xe   :  { %23 = vst [vmem:[#allocation0 + $0x58] sm:$0xf] %v148_v12  ;;  %v126_v18 = vld [vmem:[#allocation0 + $0x1] ss:$8 sm:$0xf0]  }
   0xf   :  { %27 = vst [vmem:[#allocation0 + $0x50] sm:$0xf] %v149_v13  ;;  %v67_v35 = vld [vmem:[#allocation0] ss:$8 sm:$0xf0]  }
  0x10   :  { %v82_v19 = vld [vmem:[#allocation0 + $0x3] ss:$8 sm:$0xf]   ;;  %v103_v20 = vld [vmem:[#allocation0 + $0x2] ss:$8 sm:$0xf]  }
  0x11   :  { %v86_v21 = vsel %vm68_vm0, %v84_v14, %v82_v19  ;;  %v107_v22 = vsel %vm68_vm0, %v105_v16, %v103_v20  ;;  %v124_v23 = vld [vmem:[#allocation0 + $0x1] ss:$8 sm:$0xf]   ;;  %31 = vst [vmem:[#allocation0 + $0x48] sm:$0xf] %v150_v15 }
  0x12   :  { %87 = vrot.lane.b32.xlu0 %v86_v21, %s166_s0  ;;  %108 = vrot.lane.b32.xlu1 %v107_v22, %s167_s9  ;;  %v128_v24 = vsel %vm68_vm0, %v126_v18, %v124_v23  ;;  %35 = vst [vmem:[#allocation0 + $0x40] sm:$0xf] %v151_v17  ;;  %v66_v34 = vld [vmem:[#allocation0] ss:$8 sm:$0xf]  }
  0x13   :  { %129 = vrot.lane.b32.xlu2 %v128_v24, %s168_s10  ;;  %v69_v36 = vsel %vm68_vm0, %v67_v35, %v66_v34 }
  0x14   :  { %v94_v25 = vld [vmem:[#allocation0 + $0x43] ss:$8 sm:$0xf0]   ;;  %v115_v26 = vld [vmem:[#allocation0 + $0x42] ss:$8 sm:$0xf0]  }
  0x15   :  { %v136_v27 = vld [vmem:[#allocation0 + $0x41] ss:$8 sm:$0xf0]   ;;  %71 = vst.msk [vmem:[%s260_s1] sm:$0xff] %vm70_vm1, %v69_v36  }
  0x16   :  { %v75_v38 = vld [vmem:[#allocation0 + $0x40] ss:$8 sm:$0xf0]  }
  0x19   :  { %v92_v28 = vld [vmem:[#allocation0 + $0x43] ss:$8 sm:$0xf]   ;;  %v113_v29 = vld [vmem:[#allocation0 + $0x42] ss:$8 sm:$0xf]  }
  0x1a   :  { %v96_v30 = vsel %vm68_vm0, %v94_v25, %v92_v28  ;;  %v117_v31 = vsel %vm68_vm0, %v115_v26, %v113_v29  ;;  %v134_v32 = vld [vmem:[#allocation0 + $0x41] ss:$8 sm:$0xf]   ;;  %v73_v37 = vld [vmem:[#allocation0 + $0x40] ss:$8 sm:$0xf]  }
  0x1b   :  { %97 = vrot.lane.b32.xlu0 %v96_v30, %s166_s0  ;;  %118 = vrot.lane.b32.xlu1 %v117_v31, %s167_s9  ;;  %v138_v33 = vsel %vm68_vm0, %v136_v27, %v134_v32  ;;  %v77_v40 = vsel %vm68_vm0, %v75_v38, %v73_v37 }
  0x1c   :  { %139 = vrot.lane.b32.xlu2 %v138_v33, %s168_s10  ;;  %159 = vst.msk [vmem:[%s260_s1 + $0x8] sm:$0xff] %vm70_vm1, %v77_v40  }
  0x6d   :  { %v130_v39 = vpop.permute.xlu2 %129  }
  0x76   :  { %v140_v41 = vpop.permute.xlu2 %139  }
  0x84   :  { %v88_v42 = vpop.permute.xlu0 %87   ;;  %v109_v43 = vpop.permute.xlu1 %108  }
  0x85   :  { %90 = vst.msk [vmem:[%s260_s1] sm:$0xff] %vm89_vm2, %v88_v42  }
  0x86   :  { %111 = vst.msk [vmem:[%s260_s1] sm:$0xff] %vm110_vm3, %v109_v43  }
  0x87   :  { %132 = vst.msk [vmem:[%s260_s1] sm:$0xff] %vm131_vm4, %v130_v39  }
  0x8d   :  { %v98_v44 = vpop.permute.xlu0 %97   ;;  %v119_v45 = vpop.permute.xlu1 %118  }
  0x8e   :  { %160 = vst.msk [vmem:[%s260_s1 + $0x8] sm:$0xff] %vm89_vm2, %v98_v44  }
  0x8f   :  { %161 = vst.msk [vmem:[%s260_s1 + $0x8] sm:$0xff] %vm110_vm3, %v119_v45  }
  0x90   :  { %162 = vst.msk [vmem:[%s260_s1 + $0x8] sm:$0xff] %vm131_vm4, %v140_v41  }

// kernel: llama_swiftkv_forward.1
= control target key start
LH: loop header
LB: loop body
LE: loop exit
PB: predicated region body
PF: predicated region fallthrough
CT: control target
= control target key end

     0   :  { %s5961_s0 = inlined_call_operand.vmem [shape: f32[16,64], index: 0, kind: input, shape index: {}]   ;;  %s5962_s1 = inlined_call_operand.vmem [shape: f32[16,64], index: 1, kind: input, shape index: {}]   ;;  %s5963_s2 = inlined_call_operand.vmem [shape: f32[16,64], index: 2, kind: input, shape index: {}]   ;;  %s5964_s3 = inlined_call_operand.vmem [shape: f32[2,1,64], index: 3, kind: input, shape index: {}]   ;;  %s5965_s4 = inlined_call_operand.vmem [shape: f32[2,64,224], index: 4, kind: input, shape index: {}]   ;;  %s5966_s5 = inlined_call_operand.vmem [shape: f32[2,64,64], index: 5, kind: input, shape index: {}]   ;;  %s5967_s6 = inlined_call_operand.vmem [shape: f32[2,1,64], index: 6, kind: input, shape index: {}]   ;;  %s5968_s7 = inlined_call_operand.vmem [shape: f32[2,64,256], index: 7, kind: input, shape index: {}]   ;;  %s5969_s8 = inlined_call_operand.vmem [shape: f32[2,128,64], index: 8, kind: input, shape index: {}]   ;;  %s5970_s9 = inlined_call_operand.vmem [shape: f32[1,64], index: 9, kind: input, shape index: {}]   ;;  %s5971_s10 = inlined_call_operand.vmem [shape: f32[64,192], index: 10, kind: input, shape index: {}]   ;;  %s5972_s11 = inlined_call_operand.vmem [shape: f32[2,1,64], index: 11, kind: input, shape index: {}]   ;;  %s5973_s12 = inlined_call_operand.vmem [shape: f32[2,64,128], index: 12, kind: input, shape index: {}]   ;;  %s5974_s13 = inlined_call_operand.hbm [shape: f32[2,64,64], index: 13, kind: input, shape index: {}]   ;;  %s5975_s14 = inlined_call_operand.vmem [shape: f32[2,1,64], index: 14, kind: input, shape index: {}]   ;;  %s5976_s15 = inlined_call_operand.vmem [shape: f32[2,64,256], index: 15, kind: input, shape index: {}]   ;;  %s5977_s16 = inlined_call_operand.vmem [shape: f32[2,128,64], index: 16, kind: input, shape index: {}]   ;;  %s5978_s17 = inlined_call_operand.vmem [shape: f32[1,64], index: 17, kind: input, shape index: {}]   ;;  %s5979_s18 = inlined_call_operand.hbm [shape: f32[16,64], index: 18, kind: output, shape index: {}]  }
   0x1   :  { %5989 = sst [smem:[#allocation8_spill]] %s5961_s0 }
   0x2   :  { %5990 = sst [smem:[#allocation9_spill]] %s5962_s1 }
   0x3   :  { %5991 = sst [smem:[#allocation10_spill]] %s5963_s2 }
   0x4   :  { %23 = vsyncpa [#allocation3], 0 }
   0x5   :  { %24 = vsyncpa [#allocation4], 0  ;;  %s55_s29 = sshll.u32 %s5974_s13, 4  ;;  %s4517_s30 = smov [#allocation2]   ;;  %s56_s29 = int_to_ptr.hbm [resolvable:$true] %s55_s29 }
   0x6   :  { %s57_s0 = sshll.u32 %s4517_s30, 4  ;;  %s5983_s19 = smov 128   ;;  %s58_s0 = int_to_ptr.vmem [resolvable:$true] %s57_s0 }
   0x7   :  { %s5984_s1 = smov 8  }
   0x8   :  { %63 = dma.hbm_to_vmem [thread:$0]  %s56_s29, 2048, %s58_s0, [#allocation3], %s5983_s19, %s5983_s19, %s5984_s1  }
   0x9   :  { %4513 = dma.done.wait [#allocation3], 2048  }
   0xa   :  { %4514 = vsyncadd [#allocation3], 4294965248  ;;  %s5992_s22 = sld [smem:[#allocation8_spill]]  ;;  %vm94_vm0 = vcmask 523264   ;;  %v4520_v6 = vmov 64.0   ;;  %v153_v8 = vld [vmem:[%s5965_s4 + $0x70] sm:$0xff] }
   0xb   :  { %4259 = vrcp.f32 %v4520_v6  ;;  %169 = vmatpush.msra.mxu1 %v153_v8  ;;  %v151_v9 = vld [vmem:[%s5965_s4 + $0x60] sm:$0xff]  ;;  %v149_v11 = vld [vmem:[%s5965_s4 + $0x50] sm:$0xff]  ;;  %v154_v20 = vld [vmem:[%s5965_s4 + $0x78] sm:$0xff]  ;;  %s5993_s29 = sld [smem:[#allocation10_spill]]  ;;  %s5985_s30 = smov 32   ;;  %vm257_vm8 = vcmask 130048  }
   0xc   :  { %v147_v12 = vld [vmem:[%s5965_s4 + $0x40] sm:$0xff]  ;;  %v145_v14 = vld [vmem:[%s5965_s4 + $0x30] sm:$0xff]  ;;  %v152_v21 = vld [vmem:[%s5965_s4 + $0x68] sm:$0xff]  ;;  %s4522_s21 = smov 64   ;;  %s4523_s2 = smov 96  }
   0xd   :  { %170 = vmatpush.msra.mxu1 %v151_v9  ;;  %v143_v15 = vld [vmem:[%s5965_s4 + $0x20] sm:$0xff]  ;;  %v141_v17 = vld [vmem:[%s5965_s4 + $0x10] sm:$0xff]  ;;  %v150_v22 = vld [vmem:[%s5965_s4 + $0x58] sm:$0xff]  ;;  %s5994_s0 = sld [smem:[#allocation9_spill]]  ;;  %s4524_s13 = smov 112  }
   0xe   :  { %v139_v18 = vld [vmem:[%s5965_s4] sm:$0xff]  ;;  %v148_v24 = vld [vmem:[%s5965_s4 + $0x48] sm:$0xff]  ;;  %v146_v28 = vld [vmem:[%s5965_s4 + $0x38] sm:$0xff]  ;;  %s4525_s23 = smov 80   ;;  %s5987_s24 = smov 48  }
   0xf   :  { %171 = vmatpush.msra.mxu1 %v149_v11  ;;  %v144_v29 = vld [vmem:[%s5965_s4 + $0x28] sm:$0xff]  ;;  %v142_v30 = vld [vmem:[%s5965_s4 + $0x18] sm:$0xff]  ;;  %v4249_v45 = vld [vmem:[%s5964_s3] ss:$0 sm:$0xff]  ;;  %s5999_s27 = smov 48   ;;  %s4528_s28 = smov [#allocation5]  }
  0x10   :  { %v4633_v0 = vld [vmem:[%s5992_s22] sm:$0xff]  ;;  %v4640_v2 = vld [vmem:[%s5992_s22 + $0x8] sm:$0xff] }
  0x11   :  { %v92_v1 = vmul.f32 %v4633_v0, %v4633_v0  ;;  %v93_v4 = vmul.f32 %v4640_v2, %v4640_v2  ;;  %v4260_v7 = vpop.eup %4259  ;;  %172 = vmatpush.msra.mxu1 %v147_v12  ;;  %v140_v31 = vld [vmem:[%s5965_s4 + $0x8] sm:$0xff]  ;;  %v80_v42 = vld [vmem:[%s5993_s29] sm:$0xff] }
  0x12   :  { %v102_v10 = vmul.f32 64.0, %v4260_v7  ;;  %vm106_vm1 = vweird.f32 %v4260_v7  ;;  %v81_v36 = vld [vmem:[%s5993_s29 + $0x8] sm:$0xff]  ;;  %211 = vrot.lane.b32.xlu2 %v80_v42, %s4522_s21  ;;  %v4745_v8 = vld [vmem:[%s5966_s5] sm:$0xff] }
  0x13   :  { %v95_v3 = vsel %vm94_vm0, %v92_v1, 0.0  ;;  %v98_v5 = vsel %vm94_vm0, %v93_v4, 0.0  ;;  %173 = vmatpush.msra.mxu1 %v145_v14  ;;  %233 = vrot.lane.b32.xlu1 %v81_v36, %s5985_s30  ;;  %v79_v9 = vld [vmem:[%s5994_s0 + $0x8] sm:$0xff] }
  0x14   :  { %96 = vadd.xlane.f32.xlu0 %v95_v3  ;;  %v103_v13 = vsub.f32 1.0, %v102_v10 }
  0x15   :  { %174 = vmatpush.msra.mxu1 %v143_v15 }
  0x16   :  { %v104_v16 = vmul.f32 %v4260_v7, %v103_v13  ;;  %v78_v13 = vld [vmem:[%s5994_s0] sm:$0xff] }
  0x17   :  { %175 = vmatpush.msra.mxu1 %v141_v17 }
  0x18   :  { %v105_v19 = vadd.f32 %v4260_v7, %v104_v16 }
  0x19   :  { %176 = vmatpush.msra.mxu1 %v139_v18 }
  0x1a   :  { %v4679_v23 = vsel %vm106_vm1, %v4260_v7, %v105_v19  ;;  %213 = vrot.lane.b32.xlu2 %v81_v36, %s4522_s21  ;;  %v4740_v7 = vld [vmem:[%s5966_s5 + $0x8] sm:$0xff] }
  0x1b   :  { %192 = vmatpush.msrb.mxu1 %v154_v20  ;;  %231 = vrot.lane.b32.xlu1 %v80_v42, %s5985_s30 }
  0x1c   :  { %99 = vadd.xlane.f32.xlu0 %v98_v5 }
  0x1d   :  { %193 = vmatpush.msrb.mxu1 %v152_v21 }
  0x1f   :  { %194 = vmatpush.msrb.mxu1 %v150_v22 }
  0x21   :  { %195 = vmatpush.msrb.mxu1 %v148_v24 }
  0x23   :  { %196 = vmatpush.msrb.mxu1 %v146_v28  ;;  %v82_v28 = vlaneseq }
  0x25   :  { %197 = vmatpush.msrb.mxu1 %v144_v29  ;;  %v83_v29 = vshrl.u32 %v82_v28, 7 }
  0x27   :  { %198 = vmatpush.msrb.mxu1 %v142_v30  ;;  %v86_v30 = vand.u32 127, %v82_v28  ;;  %v84_v36 = vadd.s32 8, %v83_v29 }
  0x29   :  { %199 = vmatpush.msrb.mxu1 %v140_v31  ;;  %vm4763_vm9 = vcmp.le.s32.totalorder %v86_v30, %v83_v29  ;;  %vm4770_vm10 = vcmp.le.s32.totalorder %v86_v30, %v84_v36 }
  0x6c   :  { %v4717_v56 = vpop.permute.xlu2 %211 }
  0x74   :  { %v4727_v1 = vpop.permute.xlu2 %213 }
  0x85   :  { %v4721_v59 = vpop.permute.xlu1 %233 }
  0x87   :  { %v97_v25 = vpop.xlane.xlu0 %96 }
  0x88   :  { %v108_v26 = vmul.f32 %v4679_v23, %v97_v25 }
  0x8a   :  { %v110_v27 = vadd.f32 1e-06, %v108_v26 }
  0x8c   :  { %4261 = vrsqrt.f32 %v110_v27  ;;  %vm118_vm3 = vweird.f32 %v110_v27 }
  0x8d   :  { %v4723_v61 = vpop.permute.xlu1 %231 }
  0x8f   :  { %v100_v32 = vpop.xlane.xlu0 %99 }
  0x90   :  { %v109_v33 = vmul.f32 %v4679_v23, %v100_v32 }
  0x92   :  { %v4262_v34 = vpop.eup %4261  ;;  %v111_v35 = vadd.f32 1e-06, %v109_v33 }
  0x93   :  { %v113_v37 = vmul.f32 %v4262_v34, %v110_v27  ;;  %vm119_vm2 = vweird.f32 %v4262_v34 }
  0x94   :  { %4263 = vrsqrt.f32 %v111_v35  ;;  %vm120_vm4 = vmor %vm118_vm3, %vm119_vm2  ;;  %vm128_vm6 = vweird.f32 %v111_v35 }
  0x95   :  { %v114_v38 = vmul.f32 %v4262_v34, %v113_v37 }
  0x97   :  { %v115_v39 = vmul.f32 0.5, %v114_v38 }
  0x99   :  { %v116_v40 = vsub.f32 1.5, %v115_v39 }
  0x9a   :  { %v4264_v41 = vpop.eup %4263 }
  0x9b   :  { %v117_v43 = vmul.f32 %v4262_v34, %v116_v40  ;;  %v123_v44 = vmul.f32 %v4264_v41, %v111_v35  ;;  %vm129_vm5 = vweird.f32 %v4264_v41 }
  0x9c   :  { %vm130_vm7 = vmor %vm128_vm6, %vm129_vm5 }
  0x9d   :  { %v124_v46 = vmul.f32 %v4264_v41, %v123_v44  ;;  %v121_v47 = vsel %vm120_vm4, %v4262_v34, %v117_v43 }
  0x9e   :  { %v132_v48 = vmul.f32 %v121_v47, %v4633_v0 }
  0x9f   :  { %v125_v49 = vmul.f32 0.5, %v124_v46 }
  0xa0   :  { %v137_v50 = vmul.f32 %v4249_v45, %v132_v48 }
  0xa1   :  { %v126_v51 = vsub.f32 1.5, %v125_v49 }
  0xa2   :  { %3927 = vmatmul.msk.f32.vlgmr.msra.gmra.mxu1 %vm94_vm0, %v137_v50 }
  0xa3   :  { %v127_v52 = vmul.f32 %v4264_v41, %v126_v51  ;;  %4195 = vmatpush.msra.mxu1 %v4740_v7 }
  0xa5   :  { %v131_v53 = vsel %vm130_vm7, %v4264_v41, %v127_v52  ;;  %4196 = vmatpush.msra.mxu1 %v4745_v8 }
  0xa6   :  { %v133_v54 = vmul.f32 %v131_v53, %v4640_v2 }
  0xa8   :  { %v138_v55 = vmul.f32 %v4249_v45, %v133_v54 }
  0xaa   :  { %3928 = vmatmul.msk.f32.gmra.mxu1 %vm94_vm0, %v138_v55 }
  0xb2   :  { %3929 = vmatmul.msk.f32.vlgmr.msrb.gmra.mxu1 %vm94_vm0, %v137_v50 }
  0xba   :  { %3930 = vmatmul.msk.f32.gmra.mxu1 %vm94_vm0, %v138_v55 }
 0x11f   :  { %v178_v57 = vpop.f32.mrf.mxu1 }
 0x120   :  { %v217_v58 = vmul.f32 %v4717_v56, %v178_v57  ;;  %v207_v18 = vmul.f32 %v178_v57, %v78_v13 }
 0x122   :  { %221 = vrot.lane.b32.xlu2 %v217_v58, %s4522_s21 }
 0x127   :  { %v181_v60 = vpop.f32.mrf.mxu1 }
 0x128   :  { %v218_v4 = vmul.f32 %v4727_v1, %v181_v60  ;;  %v208_v25 = vmul.f32 %v181_v60, %v79_v9 }
 0x12f   :  { %v201_v62 = vpop.f32.mrf.mxu1 }
 0x130   :  { %v237_v63 = vmul.f32 %v4723_v61, %v201_v62  ;;  %v229_v15 = vmul.f32 %v201_v62, %v78_v13 }
 0x132   :  { %241 = vrot.lane.b32.xlu1 %v237_v63, %s4523_s2 }
 0x137   :  { %v204_v3 = vpop.f32.mrf.mxu1 }
 0x138   :  { %v238_v5 = vmul.f32 %v4721_v59, %v204_v3  ;;  %v4733_v6 = vpack.i.bf16 %v201_v62, %v204_v3  ;;  %v230_v10 = vmul.f32 %v204_v3, %v79_v9 }
 0x13a   :  { %223 = vrot.lane.b32.xlu1 %v218_v4, %s4522_s21  ;;  %243 = vrot.lane.b32.xlu0 %v238_v5, %s4523_s2 }
 0x142   :  { %4210 = vrot.lane.b32.xlu0 %v4733_v6, %s4522_s21 }
 0x17c   :  { %v222_v16 = vpop.permute.xlu2 %221 }
 0x17d   :  { %v227_v19 = vadd.f32 %v222_v16, %v207_v18 }
 0x1a4   :  { %v242_v14 = vpop.permute.xlu1 %241 }
 0x1a5   :  { %v247_v17 = vadd.f32 %v242_v14, %v229_v15 }
 0x1ac   :  { %v244_v11 = vpop.permute.xlu0 %243  ;;  %v224_v24 = vpop.permute.xlu1 %223 }
 0x1ad   :  { %v248_v12 = vadd.f32 %v244_v11, %v230_v10  ;;  %v228_v26 = vadd.f32 %v224_v24, %v208_v25 }
 0x1af   :  { %558 = vrot.lane.b32.xlu0 %v248_v12, %s4524_s13  ;;  %3931 = vmatpush.xpose.msk.msra.mxu2 %vm257_vm8, %v248_v12 }
 0x1b3   :  { %3932 = vmatpush.xpose.msk.msra.mxu2 %vm257_vm8, %v247_v17 }
 0x1b4   :  { %v4211_v20 = vpop.permute.xlu0 %4210 }
 0x1b5   :  { %v4212_v21 = vunpack.i.l.bf16 %v4211_v20  ;;  %v4213_v22 = vunpack.i.h.bf16 %v4211_v20 }
 0x1b6   :  { %3933 = vmatmul.msk.f32.vlgmr.msra.gmra.mxu2 %vm257_vm8, %v227_v19 }
 0x1b7   :  { %343 = vmatpush.msra.mxu3 %v4212_v21  ;;  %455 = vmatpush.msrb.mxu2 %v4212_v21 }
 0x1b9   :  { %344 = vmatpush.msra.mxu3 %v4213_v22  ;;  %456 = vmatpush.msrb.mxu2 %v4213_v22 }
 0x1bb   :  { %3937 = vmatpush.xpose.msk.msrb.mxu3 %vm257_vm8, %v248_v12 }
 0x1be   :  { %3934 = vmatmul.msk.f32.gmra.mxu2 %vm257_vm8, %v228_v26 }
 0x1bf   :  { %3938 = vmatpush.xpose.msk.msrb.mxu3 %vm257_vm8, %v247_v17 }
 0x221   :  { %v559_v27 = vpop.permute.xlu0 %558 }
 0x222   :  { %3955 = vmatpush.xpose.msk.msrb.mxu1 %vm257_vm8, %v559_v27 }
 0x239   :  { %v287_v31 = vpop.f32.mrf.mxu2 }
 0x23a   :  { %v293_v33 = vmul.f32 0.25, %v287_v31 }
 0x23c   :  { %v295_v34 = vsel %vm4763_vm9, %v293_v33, -3.4028235e+38 }
 0x23d   :  { %v297_v35 = vsel %vm257_vm8, %v295_v34, -inf }
 0x23e   :  { %298 = vmax.xlane.f32.xlu2 %v297_v35 }
 0x241   :  { %v290_v37 = vpop.f32.mrf.mxu2 }
 0x242   :  { %v294_v39 = vmul.f32 0.25, %v290_v37 }
 0x244   :  { %v296_v40 = vsel %vm4770_vm10, %v294_v39, -3.4028235e+38 }
 0x245   :  { %v300_v41 = vsel %vm257_vm8, %v296_v40, -inf }
 0x246   :  { %301 = vmax.xlane.f32.xlu1 %v300_v41 }
 0x256   :  { %382 = vrot.lane.b32.xlu2 %v227_v19, %s4524_s13 }
 0x25e   :  { %556 = vrot.lane.b32.xlu2 %v247_v17, %s4524_s13 }
 0x25f   :  { %384 = vrot.lane.b32.xlu1 %v228_v26, %s4524_s13 }
 0x266   :  { %552 = vrot.lane.b32.xlu2 %v227_v19, %s4523_s2 }
 0x267   :  { %709 = vrot.lane.b32.xlu1 %v227_v19, %s4525_s23 }
 0x26e   :  { %554 = vrot.lane.b32.xlu2 %v228_v26, %s4523_s2 }
 0x2b1   :  { %v299_v42 = vpop.xlane.xlu2 %298 }
 0x2b2   :  { %v303_v43 = vsub.f32 %v295_v34, %v299_v42 }
 0x2b4   :  { %v305_v44 = vmul.f32 1.442695, %v303_v43 }
 0x2b6   :  { %4265 = vpow2.f32 %v305_v44 }
 0x2b9   :  { %v383_v45 = vpop.permute.xlu2 %382  ;;  %v302_v46 = vpop.xlane.xlu1 %301 }
 0x2ba   :  { %v304_v47 = vsub.f32 %v296_v40, %v302_v46 }
 0x2bc   :  { %v4783_v48 = vpop.eup %4265  ;;  %v307_v49 = vmul.f32 1.442695, %v304_v47 }
 0x2bd   :  { %3935 = vmatmul.msk.f32.vlgmr.msra.gmra.mxu3 %vm257_vm8, %v4783_v48 }
 0x2be   :  { %4267 = vpow2.f32 %v307_v49  ;;  %3947 = vmatpush.xpose.msk.msra.mxu3 %vm257_vm8, %v559_v27 }
 0x2c1   :  { %v557_v50 = vpop.permute.xlu2 %556 }
 0x2c2   :  { %3948 = vmatpush.xpose.msk.msra.mxu3 %vm257_vm8, %v557_v50  ;;  %3956 = vmatpush.xpose.msk.msrb.mxu1 %vm257_vm8, %v557_v50 }
 0x2c4   :  { %v4268_v51 = vpop.eup %4267 }
 0x2c5   :  { %3936 = vmatmul.msk.f32.gmra.mxu3 %vm257_vm8, %v4268_v51  ;;  %v312_v52 = vsel %vm257_vm8, %v4268_v51, 0.0 }
 0x2c6   :  { %313 = vadd.xlane.f32.xlu0 %v312_v52 }
 0x2c9   :  { %v553_v54 = vpop.permute.xlu2 %552 }
 0x2cd   :  { %3939 = vmatmul.msk.f32.vlgmr.msrb.gmra.mxu3 %vm257_vm8, %v383_v45 }
 0x2d1   :  { %v385_v53 = vpop.permute.xlu1 %384  ;;  %v555_v55 = vpop.permute.xlu2 %554 }
 0x2d5   :  { %3940 = vmatmul.msk.f32.gmra.mxu3 %vm257_vm8, %v385_v53 }
 0x2d9   :  { %v710_v18 = vpop.permute.xlu1 %709 }
 0x2da   :  { %711 = vrot.lane.b32.xlu0 %v228_v26, %s4525_s23 }
 0x2dd   :  { %3949 = vmatmul.msk.f32.vlgmr.msra.gmra.mxu3 %vm257_vm8, %v553_v54 }
 0x2e5   :  { %3950 = vmatmul.msk.f32.gmra.mxu3 %vm257_vm8, %v555_v55 }
 0x339   :  { %v314_v57 = vpop.xlane.xlu0 %313 }
 0x33a   :  { %4269 = vrcp.f32 %v314_v57  ;;  %v378_v3 = vand.u32 2147483648, %v314_v57  ;;  %v376_v5 = vand.u32 2147483647, %v314_v57  ;;  %vm372_vm12 = vweird.f32 %v314_v57 }
 0x33c   :  { %v379_v11 = vor.u32 1.1754944e-38, %v378_v3  ;;  %vm377_vm14 = vcmp.eq.f32.partialorder %v376_v5, 8.507059e+37 }
 0x340   :  { %v4270_v58 = vpop.eup %4269  ;;  %v4797_v60 = vpop.f32.mrf.mxu3 }
 0x341   :  { %v368_v62 = vmul.f32 %v4270_v58, %v314_v57  ;;  %vm373_vm11 = vweird.f32 %v4270_v58  ;;  %v309_v57 = vsel %vm257_vm8, %v4783_v48, 0.0  ;;  %v251_v48 = vld [vmem:[%s5966_s5 + $0x10] sm:$0xff] }
 0x342   :  { %vm374_vm13 = vmor %vm372_vm12, %vm373_vm11 }
 0x343   :  { %v369_v63 = vsub.f32 1.0, %v368_v62 }
 0x345   :  { %v370_v4 = vmul.f32 %v4270_v58, %v369_v63 }
 0x347   :  { %v371_v9 = vadd.f32 %v4270_v58, %v370_v4 }
 0x348   :  { %v349_v10 = vpop.f32.mrf.mxu3 }
 0x349   :  { %v375_v12 = vsel %vm374_vm13, %v4270_v58, %v371_v9 }
 0x34a   :  { %v380_v13 = vsel %vm377_vm14, %v379_v11, %v375_v12  ;;  %v252_v11 = vld [vmem:[%s5966_s5 + $0x18] sm:$0xff] }
 0x34b   :  { %v381_v14 = vmul.f32 %v380_v13, %v349_v10  ;;  %514 = vmatpush.msra.mxu0 %v252_v11 }
 0x34c   :  { %v712_v24 = vpop.permute.xlu0 %711 }
 0x34d   :  { %3946 = vmatmul.msk.f32.vlgmr.msra.gmra.mxu1 %vm257_vm8, %v381_v14  ;;  %515 = vmatpush.msra.mxu0 %v251_v48  ;;  %v254_v48 = vld [vmem:[%s5966_s5 + $0x28] sm:$0xff] }
 0x34f   :  { %543 = vmatpush.msrb.mxu0 %v4740_v7 }
 0x350   :  { %v407_v15 = vpop.f32.mrf.mxu3 }
 0x351   :  { %v413_v16 = vmul.f32 0.25, %v407_v15  ;;  %544 = vmatpush.msrb.mxu0 %v4745_v8 }
 0x353   :  { %v415_v17 = vsel %vm4763_vm9, %v413_v16, -3.4028235e+38 }
 0x354   :  { %v417_v19 = vsel %vm257_vm8, %v415_v17, -inf }
 0x355   :  { %418 = vmax.xlane.f32.xlu1 %v417_v19  ;;  %3957 = vmatmul.msk.f32.vlgmr.msrb.gmra.mxu1 %vm257_vm8, %v710_v18 }
 0x358   :  { %v410_v20 = vpop.f32.mrf.mxu3 }
 0x359   :  { %v414_v21 = vmul.f32 0.25, %v410_v20 }
 0x35b   :  { %v416_v22 = vsel %vm4770_vm10, %v414_v21, -3.4028235e+38 }
 0x35c   :  { %v420_v25 = vsel %vm257_vm8, %v416_v22, -inf }
 0x35d   :  { %421 = vmax.xlane.f32.xlu2 %v420_v25  ;;  %3958 = vmatmul.msk.f32.gmra.mxu1 %vm257_vm8, %v712_v24 }
 0x360   :  { %v585_v26 = vpop.f32.mrf.mxu3 }
 0x361   :  { %v591_v27 = vmul.f32 0.25, %v585_v26 }
 0x363   :  { %v593_v28 = vsel %vm4763_vm9, %v591_v27, -3.4028235e+38 }
 0x364   :  { %v595_v29 = vsel %vm257_vm8, %v593_v28, -inf }
 0x365   :  { %596 = vmax.xlane.f32.xlu1 %v595_v29 }
 0x368   :  { %v588_v30 = vpop.f32.mrf.mxu3 }
 0x369   :  { %v592_v31 = vmul.f32 0.25, %v588_v30 }
 0x36b   :  { %v594_v33 = vsel %vm4770_vm10, %v592_v31, -3.4028235e+38 }
 0x36c   :  { %v598_v34 = vsel %vm257_vm8, %v594_v33, -inf }
 0x36d   :  { %599 = vmax.xlane.f32.xlu1 %v598_v34 }
 0x3c8   :  { %v419_v35 = vpop.xlane.xlu1 %418 }
 0x3c9   :  { %v423_v36 = vsub.f32 %v415_v17, %v419_v35 }
 0x3ca   :  { %v4814_v37 = vpop.f32.mrf.mxu1 }
 0x3cb   :  { %v425_v39 = vmul.f32 1.442695, %v423_v36 }
 0x3cd   :  { %4271 = vpow2.f32 %v425_v39 }
 0x3d0   :  { %v422_v40 = vpop.xlane.xlu2 %421 }
 0x3d1   :  { %v424_v41 = vsub.f32 %v416_v22, %v422_v40 }
 0x3d2   :  { %v734_v42 = vpop.f32.mrf.mxu1 }
 0x3d3   :  { %v4272_v43 = vpop.eup %4271  ;;  %v427_v44 = vmul.f32 1.442695, %v424_v41  ;;  %v740_v45 = vmul.f32 0.25, %v734_v42 }
 0x3d4   :  { %3941 = vmatmul.msk.f32.vlgmr.msrb.gmra.mxu2 %vm257_vm8, %v4272_v43  ;;  %v429_v55 = vsel %vm257_vm8, %v4272_v43, 0.0 }
 0x3d5   :  { %4273 = vpow2.f32 %v427_v44  ;;  %v742_v46 = vsel %vm4763_vm9, %v740_v45, -3.4028235e+38 }
 0x3d6   :  { %v744_v47 = vsel %vm257_vm8, %v742_v46, -inf }
 0x3d7   :  { %745 = vmax.xlane.f32.xlu0 %v744_v47 }
 0x3d8   :  { %v597_v58 = vpop.xlane.xlu1 %596 }
 0x3d9   :  { %v601_v62 = vsub.f32 %v593_v28, %v597_v58 }
 0x3da   :  { %v737_v49 = vpop.f32.mrf.mxu1 }
 0x3db   :  { %v4274_v50 = vpop.eup %4273  ;;  %v741_v51 = vmul.f32 0.25, %v737_v49  ;;  %v603_v63 = vmul.f32 1.442695, %v601_v62 }
 0x3dc   :  { %3942 = vmatmul.msk.f32.gmra.mxu2 %vm257_vm8, %v4274_v50  ;;  %v432_v52 = vsel %vm257_vm8, %v4274_v50, 0.0 }
 0x3dd   :  { %433 = vadd.xlane.f32.xlu1 %v432_v52  ;;  %v743_v53 = vsel %vm4770_vm10, %v741_v51, -3.4028235e+38  ;;  %4275 = vpow2.f32 %v603_v63 }
 0x3de   :  { %v747_v54 = vsel %vm257_vm8, %v743_v53, -inf }
 0x3df   :  { %748 = vmax.xlane.f32.xlu2 %v747_v54 }
 0x3e0   :  { %v600_v5 = vpop.xlane.xlu1 %599 }
 0x3e3   :  { %v4276_v3 = vpop.eup %4275 }
 0x3e4   :  { %v607_v4 = vsel %vm257_vm8, %v4276_v3, 0.0 }
 0x3e7   :  { %430 = vadd.xlane.f32.xlu2 %v429_v55 }
 0x3eb   :  { %4215 = vrot.lane.b32.xlu0 %v4733_v6, %s5987_s24  ;;  %v602_v6 = vsub.f32 %v594_v33, %v600_v5 }
 0x3ed   :  { %v605_v13 = vmul.f32 1.442695, %v602_v6 }
 0x3ef   :  { %310 = vadd.xlane.f32.xlu2 %v309_v57 }
 0x415   :  { %608 = vadd.xlane.f32.xlu0 %v607_v4 }
 0x44a   :  { %v746_v9 = vpop.xlane.xlu0 %745 }
 0x44b   :  { %v750_v10 = vsub.f32 %v742_v46, %v746_v9 }
 0x44d   :  { %v752_v12 = vmul.f32 1.442695, %v750_v10 }
 0x44f   :  { %4277 = vpow2.f32 %v752_v12 }
 0x450   :  { %v4839_v14 = vpop.xlane.xlu1 %433  ;;  %4279 = vpow2.f32 %v605_v13  ;;  %v256_v13 = vld [vmem:[%s5966_s5 + $0x38] sm:$0xff] }
 0x451   :  { %4281 = vrcp.f32 %v4839_v14  ;;  %v490_v49 = vand.u32 2147483648, %v4839_v14  ;;  %vm484_vm5 = vweird.f32 %v4839_v14  ;;  %v488_v51 = vand.u32 2147483647, %v4839_v14 }
 0x452   :  { %v749_v15 = vpop.xlane.xlu2 %748 }
 0x453   :  { %v751_v16 = vsub.f32 %v743_v53, %v749_v15  ;;  %v491_v57 = vor.u32 1.1754944e-38, %v490_v49  ;;  %vm489_vm7 = vcmp.eq.f32.partialorder %v488_v51, 8.507059e+37 }
 0x455   :  { %v4278_v17 = vpop.eup %4277  ;;  %v754_v18 = vmul.f32 1.442695, %v751_v16 }
 0x456   :  { %v756_v19 = vsel %vm257_vm8, %v4278_v17, 0.0  ;;  %v4280_v20 = vpop.eup %4279 }
 0x457   :  { %4283 = vpow2.f32 %v754_v18  ;;  %757 = vadd.xlane.f32.xlu1 %v756_v19  ;;  %v4282_v22 = vpop.eup %4281  ;;  %v610_v27 = vsel %vm257_vm8, %v4280_v20, 0.0  ;;  %v458_v43 = vpop.f32.mrf.mxu2 }
 0x458   :  { %v480_v8 = vmul.f32 %v4282_v22, %v4839_v14  ;;  %vm485_vm2 = vweird.f32 %v4282_v22  ;;  %v253_v14 = vld [vmem:[%s5966_s5 + $0x20] sm:$0xff] }
 0x459   :  { %vm486_vm6 = vmor %vm484_vm5, %vm485_vm2 }
 0x45a   :  { %v431_v21 = vpop.xlane.xlu2 %430  ;;  %v481_v30 = vsub.f32 1.0, %v480_v8 }
 0x45b   :  { %4285 = vrcp.f32 %v431_v21  ;;  %v475_v35 = vand.u32 2147483648, %v431_v21  ;;  %v473_v40 = vand.u32 2147483647, %v431_v21  ;;  %vm469_vm1 = vweird.f32 %v431_v21 }
 0x45c   :  { %v482_v36 = vmul.f32 %v4282_v22, %v481_v30 }
 0x45d   :  { %v4284_v7 = vpop.eup %4283  ;;  %v4216_v24 = vpop.permute.xlu0 %4215  ;;  %v476_v44 = vor.u32 1.1754944e-38, %v475_v35  ;;  %vm474_vm4 = vcmp.eq.f32.partialorder %v473_v40, 8.507059e+37 }
 0x45e   :  { %v4217_v25 = vunpack.i.l.bf16 %v4216_v24  ;;  %v759_v26 = vsel %vm257_vm8, %v4284_v7, 0.0  ;;  %v4218_v28 = vunpack.i.h.bf16 %v4216_v24  ;;  %v483_v45 = vadd.f32 %v4282_v22, %v482_v36 }
 0x45f   :  { %760 = vadd.xlane.f32.xlu2 %v759_v26  ;;  %611 = vadd.xlane.f32.xlu1 %v610_v27  ;;  %v461_v63 = vpop.f32.mrf.mxu2 }
 0x460   :  { %639 = vmatpush.msra.mxu2 %v4217_v25  ;;  %782 = vmatpush.msrb.mxu3 %v4217_v25  ;;  %v487_v54 = vsel %vm486_vm6, %v4282_v22, %v483_v45 }
 0x461   :  { %v4286_v29 = vpop.eup %4285  ;;  %v492_v58 = vsel %vm489_vm7, %v491_v57, %v487_v54 }
 0x462   :  { %v465_v31 = vmul.f32 %v4286_v29, %v431_v21  ;;  %640 = vmatpush.msra.mxu2 %v4218_v28  ;;  %783 = vmatpush.msrb.mxu3 %v4218_v28  ;;  %v311_v33 = vpop.xlane.xlu2 %310  ;;  %vm470_vm15 = vweird.f32 %v4286_v29  ;;  %v493_v4 = vmul.f32 %v492_v58, %v461_v63 }
 0x463   :  { %4287 = vrcp.f32 %v311_v33  ;;  %3951 = vmatmul.msk.f32.vlgmr.msra.gmra.mxu2 %vm257_vm8, %v4276_v3  ;;  %3959 = vmatmul.msk.f32.vlgmr.msrb.gmra.mxu3 %vm257_vm8, %v4278_v17  ;;  %vm471_vm3 = vmor %vm469_vm1, %vm470_vm15  ;;  %v363_v3 = vand.u32 2147483648, %v311_v33  ;;  %vm357_vm12 = vweird.f32 %v311_v33  ;;  %v361_v5 = vand.u32 2147483647, %v311_v33 }
 0x464   :  { %v466_v34 = vsub.f32 1.0, %v465_v31  ;;  %841 = vmatpush.msrb.mxu2 %v256_v13 }
 0x465   :  { %v364_v10 = vor.u32 1.1754944e-38, %v363_v3  ;;  %vm362_vm14 = vcmp.eq.f32.partialorder %v361_v5, 8.507059e+37 }
 0x466   :  { %v467_v39 = vmul.f32 %v4286_v29, %v466_v34 }
 0x468   :  { %v468_v41 = vadd.f32 %v4286_v29, %v467_v39 }
 0x469   :  { %v4288_v42 = vpop.eup %4287 }
 0x46a   :  { %v353_v46 = vmul.f32 %v4288_v42, %v311_v33  ;;  %v472_v47 = vsel %vm471_vm3, %v4286_v29, %v468_v41  ;;  %vm358_vm11 = vweird.f32 %v4288_v42 }
 0x46b   :  { %3952 = vmatmul.msk.f32.gmra.mxu2 %vm257_vm8, %v4280_v20  ;;  %3960 = vmatmul.msk.f32.gmra.mxu3 %vm257_vm8, %v4284_v7  ;;  %v477_v50 = vsel %vm474_vm4, %v476_v44, %v472_v47  ;;  %vm359_vm13 = vmor %vm357_vm12, %vm358_vm11 }
 0x46c   :  { %v354_v52 = vsub.f32 1.0, %v353_v46  ;;  %v478_v53 = vmul.f32 %v477_v50, %v458_v43 }
 0x46e   :  { %v355_v55 = vmul.f32 %v4288_v42, %v354_v52  ;;  %3943 = vmatmul.msk.f32.vlgmr.msra.gmra.mxu0 %vm257_vm8, %v478_v53 }
 0x46f   :  { %698 = vmatpush.msra.mxu0 %v254_v48 }
 0x470   :  { %v356_v62 = vadd.f32 %v4288_v42, %v355_v55 }
 0x471   :  { %699 = vmatpush.msra.mxu0 %v253_v14 }
 0x472   :  { %v360_v9 = vsel %vm359_vm13, %v4288_v42, %v356_v62 }
 0x473   :  { %v365_v11 = vsel %vm362_vm14, %v364_v10, %v360_v9 }
 0x474   :  { %v366_v6 = vmul.f32 %v365_v11, %v4797_v60  ;;  %v255_v60 = vld [vmem:[%s5966_s5 + $0x30] sm:$0xff] }
 0x475   :  { %842 = vmatpush.msrb.mxu2 %v255_v60 }
 0x476   :  { %3944 = vmatmul.msk.f32.gmra.mxu0 %vm257_vm8, %v493_v4 }
 0x47e   :  { %3945 = vmatmul.msk.f32.vlgmr.msrb.gmra.mxu0 %vm257_vm8, %v366_v6 }
 0x488   :  { %v609_v12 = vpop.xlane.xlu0 %608 }
 0x489   :  { %4289 = vrcp.f32 %v609_v12  ;;  %vm653_vm2 = vweird.f32 %v609_v12  ;;  %v659_v34 = vand.u32 2147483648, %v609_v12  ;;  %v657_v36 = vand.u32 2147483647, %v609_v12 }
 0x48b   :  { %v660_v44 = vor.u32 1.1754944e-38, %v659_v34  ;;  %vm658_vm6 = vcmp.eq.f32.partialorder %v657_v36, 8.507059e+37  ;;  %v902_v34 = vld [vmem:[%s5968_s7 + $0x40] sm:$0xff]  ;;  %v900_v36 = vld [vmem:[%s5968_s7 + $0x30] sm:$0xff] }
 0x48f   :  { %v4290_v16 = vpop.eup %4289 }
 0x490   :  { %v649_v18 = vmul.f32 %v4290_v16, %v609_v12  ;;  %vm654_vm15 = vweird.f32 %v4290_v16 }
 0x491   :  { %vm655_vm3 = vmor %vm653_vm2, %vm654_vm15 }
 0x492   :  { %v650_v22 = vsub.f32 1.0, %v649_v18 }
 0x494   :  { %v651_v25 = vmul.f32 %v4290_v16, %v650_v22 }
 0x496   :  { %v652_v29 = vadd.f32 %v4290_v16, %v651_v25 }
 0x498   :  { %v656_v42 = vsel %vm655_vm3, %v4290_v16, %v652_v29  ;;  %v909_v29 = vld [vmem:[%s5968_s7 + $0x78] sm:$0xff] }
 0x499   :  { %v661_v47 = vsel %vm658_vm6, %v660_v44, %v656_v42  ;;  %963 = vmatpush.msra.mxu1 %v909_v29  ;;  %v896_v42 = vld [vmem:[%s5968_s7 + $0x10] sm:$0xff]  ;;  %v894_v44 = vld [vmem:[%s5968_s7] sm:$0xff] }
 0x49a   :  { %v910_v29 = vld [vmem:[%s5969_s8] sm:$0xff] }
 0x4ca   :  { %v758_v15 = vpop.xlane.xlu1 %757 }
 0x4cb   :  { %4291 = vrcp.f32 %v758_v15  ;;  %v802_v35 = vand.u32 2147483648, %v758_v15  ;;  %vm796_vm4 = vweird.f32 %v758_v15  ;;  %v800_v39 = vand.u32 2147483647, %v758_v15 }
 0x4cd   :  { %v803_v45 = vor.u32 1.1754944e-38, %v802_v35  ;;  %vm801_vm7 = vcmp.eq.f32.partialorder %v800_v39, 8.507059e+37  ;;  %v903_v35 = vld [vmem:[%s5968_s7 + $0x48] sm:$0xff]  ;;  %v901_v39 = vld [vmem:[%s5968_s7 + $0x38] sm:$0xff] }
 0x4d1   :  { %v4292_v17 = vpop.eup %4291 }
 0x4d2   :  { %v761_v19 = vpop.xlane.xlu2 %760  ;;  %v612_v20 = vpop.xlane.xlu1 %611  ;;  %v792_v21 = vmul.f32 %v4292_v17, %v758_v15  ;;  %vm797_vm1 = vweird.f32 %v4292_v17 }
 0x4d3   :  { %4293 = vrcp.f32 %v761_v19  ;;  %vm798_vm5 = vmor %vm796_vm4, %vm797_vm1  ;;  %v674_v55 = vand.u32 2147483648, %v612_v20  ;;  %vm811_vm13 = vweird.f32 %v761_v19  ;;  %v817_v57 = vand.u32 2147483648, %v761_v19 }
 0x4d4   :  { %4295 = vrcp.f32 %v612_v20  ;;  %v793_v7 = vsub.f32 1.0, %v792_v21  ;;  %vm668_vm14 = vweird.f32 %v612_v20  ;;  %v672_v58 = vand.u32 2147483647, %v612_v20 }
 0x4d5   :  { %v815_v62 = vand.u32 2147483647, %v761_v19  ;;  %v675_v4 = vor.u32 1.1754944e-38, %v674_v55  ;;  %v818_v5 = vor.u32 1.1754944e-38, %v817_v57 }
 0x4d6   :  { %v794_v26 = vmul.f32 %v4292_v17, %v793_v7  ;;  %vm673_vm2 = vcmp.eq.f32.partialorder %v672_v58, 8.507059e+37 }
 0x4d7   :  { %vm816_vm3 = vcmp.eq.f32.partialorder %v815_v62, 8.507059e+37 }
 0x4d8   :  { %v795_v33 = vadd.f32 %v4292_v17, %v794_v26 }
 0x4d9   :  { %v4294_v24 = vpop.eup %4293 }
 0x4da   :  { %v4296_v8 = vpop.eup %4295  ;;  %v807_v27 = vmul.f32 %v4294_v24, %v761_v19  ;;  %v799_v43 = vsel %vm798_vm5, %v4292_v17, %v795_v33  ;;  %vm812_vm12 = vweird.f32 %v4294_v24  ;;  %v905_v33 = vld [vmem:[%s5968_s7 + $0x58] sm:$0xff] }
 0x4db   :  { %v664_v28 = vmul.f32 %v4296_v8, %v612_v20  ;;  %v804_v50 = vsel %vm801_vm7, %v803_v45, %v799_v43  ;;  %vm669_vm11 = vweird.f32 %v4296_v8  ;;  %vm813_vm15 = vmor %vm811_vm13, %vm812_vm12  ;;  %v897_v43 = vld [vmem:[%s5968_s7 + $0x18] sm:$0xff]  ;;  %v895_v45 = vld [vmem:[%s5968_s7 + $0x8] sm:$0xff] }
 0x4dc   :  { %v808_v30 = vsub.f32 1.0, %v807_v27  ;;  %vm670_vm1 = vmor %vm668_vm14, %vm669_vm11 }
 0x4dd   :  { %v665_v31 = vsub.f32 1.0, %v664_v28 }
 0x4de   :  { %v809_v40 = vmul.f32 %v4294_v24, %v808_v30  ;;  %v907_v30 = vld [vmem:[%s5968_s7 + $0x68] sm:$0xff] }
 0x4df   :  { %v666_v41 = vmul.f32 %v4296_v8, %v665_v31  ;;  %964 = vmatpush.msra.mxu1 %v907_v30  ;;  %v904_v31 = vld [vmem:[%s5968_s7 + $0x50] sm:$0xff] }
 0x4e0   :  { %v810_v54 = vadd.f32 %v4294_v24, %v809_v40  ;;  %v898_v40 = vld [vmem:[%s5968_s7 + $0x20] sm:$0xff] }
 0x4e1   :  { %v667_v53 = vadd.f32 %v4296_v8, %v666_v41  ;;  %965 = vmatpush.msra.mxu1 %v905_v33  ;;  %v899_v41 = vld [vmem:[%s5968_s7 + $0x28] sm:$0xff] }
 0x4e2   :  { %v814_v3 = vsel %vm813_vm15, %v4294_v24, %v810_v54 }
 0x4e3   :  { %v671_v63 = vsel %vm670_vm1, %v4296_v8, %v667_v53  ;;  %v819_v6 = vsel %vm816_vm3, %v818_v5, %v814_v3  ;;  %966 = vmatpush.msra.mxu1 %v903_v35 }
 0x4e4   :  { %v676_v10 = vsel %vm673_vm2, %v675_v4, %v671_v63  ;;  %v4250_v4 = vld [vmem:[%s5967_s6] ss:$0 sm:$0xff] }
 0x4e5   :  { %967 = vmatpush.msra.mxu1 %v901_v39 }
 0x4e6   :  { %v642_v46 = vpop.f32.mrf.mxu2  ;;  %v785_v49 = vpop.f32.mrf.mxu3 }
 0x4e7   :  { %v662_v51 = vmul.f32 %v661_v47, %v642_v46  ;;  %v805_v52 = vmul.f32 %v804_v50, %v785_v49  ;;  %968 = vmatpush.msra.mxu1 %v899_v41 }
 0x4e9   :  { %3953 = vmatmul.msk.f32.vlgmr.msra.gmra.mxu0 %vm257_vm8, %v662_v51  ;;  %3961 = vmatmul.msk.f32.vlgmr.msrb.gmra.mxu2 %vm257_vm8, %v805_v52 }
 0x4ea   :  { %969 = vmatpush.msra.mxu1 %v897_v43 }
 0x4eb   :  { %v517_v13 = vpop.f32.mrf.mxu0 }
 0x4ec   :  { %970 = vmatpush.msra.mxu1 %v895_v45 }
 0x4ee   :  { %v645_v9 = vpop.f32.mrf.mxu2  ;;  %v788_v11 = vpop.f32.mrf.mxu3 }
 0x4ef   :  { %v677_v12 = vmul.f32 %v676_v10, %v645_v9  ;;  %v820_v48 = vmul.f32 %v819_v6, %v788_v11 }
 0x4f1   :  { %3954 = vmatmul.msk.f32.gmra.mxu0 %vm257_vm8, %v677_v12  ;;  %3962 = vmatmul.msk.f32.gmra.mxu2 %vm257_vm8, %v820_v48 }
 0x4f3   :  { %v520_v14 = vpop.f32.mrf.mxu0 }
 0x4f4   :  { %v550_v22 = vadd.f32 %v4814_v37, %v520_v14  ;;  %v908_v37 = vld [vmem:[%s5968_s7 + $0x70] sm:$0xff] }
 0x4f5   :  { %940 = vmatpush.msrb.mxu0 %v908_v37  ;;  %v911_v37 = vld [vmem:[%s5969_s8 + $0x8] sm:$0xff] }
 0x4fb   :  { %v546_v60 = vpop.f32.mrf.mxu0 }
 0x4fc   :  { %v547_v16 = vadd.f32 %v546_v60, %v517_v13 }
 0x566   :  { %v701_v15 = vpop.f32.mrf.mxu0 }
 0x567   :  { %v707_v17 = vadd.f32 %v701_v15, %v547_v16  ;;  %v925_v15 = vld [vmem:[%s5969_s8 + $0x78] sm:$0xff]  ;;  %v924_v16 = vld [vmem:[%s5969_s8 + $0x70] sm:$0xff] }
 0x568   :  { %1020 = vmatpush.msra.mxu3 %v925_v15 }
 0x56a   :  { %1021 = vmatpush.msra.mxu3 %v924_v16 }
 0x56c   :  { %v844_v18 = vpop.f32.mrf.mxu2 }
 0x56d   :  { %v850_v19 = vadd.f32 %v844_v18, %v707_v17  ;;  %v923_v17 = vld [vmem:[%s5969_s8 + $0x68] sm:$0xff]  ;;  %v922_v18 = vld [vmem:[%s5969_s8 + $0x60] sm:$0xff] }
 0x56e   :  { %v704_v21 = vpop.f32.mrf.mxu0  ;;  %1022 = vmatpush.msra.mxu3 %v923_v17 }
 0x56f   :  { %v4875_v20 = vadd.f32 %v850_v19, %v4633_v0  ;;  %v708_v24 = vadd.f32 %v704_v21, %v550_v22  ;;  %v921_v19 = vld [vmem:[%s5969_s8 + $0x58] sm:$0xff]  ;;  %v920_v21 = vld [vmem:[%s5969_s8 + $0x50] sm:$0xff]  ;;  %v919_v22 = vld [vmem:[%s5969_s8 + $0x48] sm:$0xff] }
 0x570   :  { %1023 = vmatpush.msra.mxu3 %v922_v18  ;;  %v3985_v18 = vld [vmem:[%s5965_s4 + $0xf8] sm:$0xff] }
 0x571   :  { %v855_v7 = vmul.f32 %v4875_v20, %v4875_v20 }
 0x572   :  { %1024 = vmatpush.msra.mxu3 %v921_v19  ;;  %v3983_v19 = vld [vmem:[%s5965_s4 + $0xe8] sm:$0xff] }
 0x573   :  { %v857_v8 = vsel %vm94_vm0, %v855_v7, 0.0  ;;  %v918_v7 = vld [vmem:[%s5969_s8 + $0x40] sm:$0xff] }
 0x574   :  { %858 = vadd.xlane.f32.xlu2 %v857_v8  ;;  %v847_v25 = vpop.f32.mrf.mxu2  ;;  %1025 = vmatpush.msra.mxu3 %v920_v21  ;;  %v916_v8 = vld [vmem:[%s5969_s8 + $0x30] sm:$0xff] }
 0x575   :  { %v851_v26 = vadd.f32 %v847_v25, %v708_v24  ;;  %v917_v24 = vld [vmem:[%s5969_s8 + $0x38] sm:$0xff]  ;;  %v915_v25 = vld [vmem:[%s5969_s8 + $0x28] sm:$0xff]  ;;  %v3980_v21 = vld [vmem:[%s5965_s4 + $0xd0] sm:$0xff] }
 0x576   :  { %1026 = vmatpush.msra.mxu3 %v919_v22  ;;  %v3981_v22 = vld [vmem:[%s5965_s4 + $0xd8] sm:$0xff] }
 0x577   :  { %v4882_v27 = vadd.f32 %v851_v26, %v4640_v2  ;;  %v906_v2 = vld [vmem:[%s5968_s7 + $0x60] sm:$0xff] }
 0x578   :  { %941 = vmatpush.msrb.mxu0 %v906_v2  ;;  %1027 = vmatpush.msra.mxu3 %v918_v7  ;;  %v914_v26 = vld [vmem:[%s5969_s8 + $0x20] sm:$0xff] }
 0x579   :  { %v856_v28 = vmul.f32 %v4882_v27, %v4882_v27  ;;  %v3978_v7 = vld [vmem:[%s5965_s4 + $0xc0] sm:$0xff] }
 0x57a   :  { %942 = vmatpush.msrb.mxu0 %v904_v31  ;;  %1028 = vmatpush.msra.mxu3 %v917_v24  ;;  %v3979_v24 = vld [vmem:[%s5965_s4 + $0xc8] sm:$0xff] }
 0x57b   :  { %v860_v0 = vsel %vm94_vm0, %v856_v28, 0.0  ;;  %v913_v28 = vld [vmem:[%s5969_s8 + $0x18] sm:$0xff] }
 0x57c   :  { %861 = vadd.xlane.f32.xlu1 %v860_v0  ;;  %943 = vmatpush.msrb.mxu0 %v902_v34  ;;  %v912_v0 = vld [vmem:[%s5969_s8 + $0x10] sm:$0xff] }
 0x57d   :  { %1029 = vmatpush.msra.mxu3 %v916_v8  ;;  %v3976_v8 = vld [vmem:[%s5965_s4 + $0xb0] sm:$0xff] }
 0x57e   :  { %944 = vmatpush.msrb.mxu0 %v900_v36 }
 0x57f   :  { %1030 = vmatpush.msra.mxu3 %v915_v25  ;;  %v3977_v25 = vld [vmem:[%s5965_s4 + $0xb8] sm:$0xff] }
 0x580   :  { %945 = vmatpush.msrb.mxu0 %v898_v40 }
 0x581   :  { %1031 = vmatpush.msra.mxu3 %v914_v26  ;;  %v3974_v26 = vld [vmem:[%s5965_s4 + $0xa0] sm:$0xff] }
 0x582   :  { %946 = vmatpush.msrb.mxu0 %v896_v42 }
 0x583   :  { %1032 = vmatpush.msra.mxu3 %v913_v28  ;;  %v3975_v28 = vld [vmem:[%s5965_s4 + $0xa8] sm:$0xff] }
 0x584   :  { %947 = vmatpush.msrb.mxu0 %v894_v44 }
 0x585   :  { %1033 = vmatpush.msra.mxu3 %v912_v0  ;;  %v3972_v0 = vld [vmem:[%s5965_s4 + $0x90] sm:$0xff] }
 0x586   :  { %1138 = vmatpush.msra.mxu0 %v3985_v18 }
 0x587   :  { %1034 = vmatpush.msra.mxu3 %v911_v37  ;;  %v3973_v37 = vld [vmem:[%s5965_s4 + $0x98] sm:$0xff] }
 0x588   :  { %1139 = vmatpush.msra.mxu0 %v3983_v19 }
 0x589   :  { %1035 = vmatpush.msra.mxu3 %v910_v29  ;;  %v3970_v29 = vld [vmem:[%s5965_s4 + $0x80] sm:$0xff] }
 0x58a   :  { %1140 = vmatpush.msra.mxu0 %v3981_v22 }
 0x58c   :  { %1141 = vmatpush.msra.mxu0 %v3979_v24 }
 0x58e   :  { %1142 = vmatpush.msra.mxu0 %v3977_v25 }
 0x590   :  { %1143 = vmatpush.msra.mxu0 %v3975_v28 }
 0x592   :  { %1144 = vmatpush.msra.mxu0 %v3973_v37 }
 0x5e7   :  { %v859_v46 = vpop.xlane.xlu2 %858 }
 0x5e8   :  { %v863_v47 = vmul.f32 %v859_v46, %v4679_v23 }
 0x5ea   :  { %v865_v49 = vadd.f32 1e-06, %v863_v47 }
 0x5ec   :  { %4297 = vrsqrt.f32 %v865_v49  ;;  %vm873_vm5 = vweird.f32 %v865_v49 }
 0x5ef   :  { %v862_v50 = vpop.xlane.xlu1 %861 }
 0x5f0   :  { %v864_v51 = vmul.f32 %v862_v50, %v4679_v23 }
 0x5f2   :  { %v4298_v52 = vpop.eup %4297  ;;  %v866_v53 = vadd.f32 1e-06, %v864_v51 }
 0x5f3   :  { %v868_v54 = vmul.f32 %v4298_v52, %v865_v49  ;;  %vm874_vm4 = vweird.f32 %v4298_v52 }
 0x5f4   :  { %4299 = vrsqrt.f32 %v866_v53  ;;  %vm875_vm6 = vmor %vm873_vm5, %vm874_vm4  ;;  %vm883_vm11 = vweird.f32 %v866_v53 }
 0x5f5   :  { %v869_v55 = vmul.f32 %v4298_v52, %v868_v54 }
 0x5f7   :  { %v870_v57 = vmul.f32 0.5, %v869_v55 }
 0x5f9   :  { %v871_v58 = vsub.f32 1.5, %v870_v57 }
 0x5fa   :  { %v4300_v62 = vpop.eup %4299 }
 0x5fb   :  { %v872_v63 = vmul.f32 %v4298_v52, %v871_v58  ;;  %v878_v3 = vmul.f32 %v4300_v62, %v866_v53  ;;  %vm884_vm7 = vweird.f32 %v4300_v62 }
 0x5fc   :  { %vm885_vm12 = vmor %vm883_vm11, %vm884_vm7 }
 0x5fd   :  { %v876_v5 = vsel %vm875_vm6, %v4298_v52, %v872_v63  ;;  %v879_v9 = vmul.f32 %v4300_v62, %v878_v3 }
 0x5fe   :  { %v887_v10 = vmul.f32 %v876_v5, %v4875_v20 }
 0x5ff   :  { %v880_v11 = vmul.f32 0.5, %v879_v9 }
 0x600   :  { %v892_v6 = vmul.f32 %v4250_v4, %v887_v10 }
 0x601   :  { %v881_v12 = vsub.f32 1.5, %v880_v11 }
 0x602   :  { %3963 = vmatmul.msk.f32.vlgmr.msrb.gmra.mxu0 %vm94_vm0, %v892_v6  ;;  %3965 = vmatmul.msk.f32.vlgmr.msra.gmra.mxu1 %vm94_vm0, %v892_v6 }
 0x603   :  { %v882_v48 = vmul.f32 %v4300_v62, %v881_v12 }
 0x605   :  { %v886_v13 = vsel %vm885_vm12, %v4300_v62, %v882_v48 }
 0x606   :  { %v888_v14 = vmul.f32 %v886_v13, %v4882_v27 }
 0x608   :  { %v893_v60 = vmul.f32 %v4250_v4, %v888_v14 }
 0x60a   :  { %3964 = vmatmul.msk.f32.gmra.mxu0 %vm94_vm0, %v893_v60  ;;  %3966 = vmatmul.msk.f32.gmra.mxu1 %vm94_vm0, %v893_v60 }
 0x67f   :  { %v949_v2 = vpop.f32.mrf.mxu0  ;;  %v972_v53 = vpop.f32.mrf.mxu1 }
 0x680   :  { %v3967_v30 = vmul.f32 -1.442695, %v949_v2 }
 0x682   :  { %4301 = vpow2.f32 %v3967_v30 }
 0x687   :  { %v952_v31 = vpop.f32.mrf.mxu0  ;;  %v975_v11 = vpop.f32.mrf.mxu1 }
 0x688   :  { %v4302_v33 = vpop.eup %4301  ;;  %v3968_v34 = vmul.f32 -1.442695, %v952_v31 }
 0x689   :  { %v984_v35 = vadd.f32 1.0, %v4302_v33 }
 0x68a   :  { %4303 = vpow2.f32 %v3968_v34 }
 0x68b   :  { %4305 = vrcp.f32 %v984_v35  ;;  %v997_v43 = vand.u32 2147483648, %v984_v35  ;;  %v995_v45 = vand.u32 2147483647, %v984_v35  ;;  %vm991_vm14 = vweird.f32 %v984_v35 }
 0x68d   :  { %v998_v49 = vor.u32 1.1754944e-38, %v997_v43  ;;  %vm996_vm1 = vcmp.eq.f32.partialorder %v995_v45, 8.507059e+37 }
 0x690   :  { %v4304_v36 = vpop.eup %4303 }
 0x691   :  { %v4306_v39 = vpop.eup %4305  ;;  %v985_v40 = vadd.f32 1.0, %v4304_v36 }
 0x692   :  { %v987_v41 = vmul.f32 %v4306_v39, %v984_v35  ;;  %vm992_vm13 = vweird.f32 %v4306_v39 }
 0x693   :  { %4307 = vrcp.f32 %v985_v40  ;;  %vm993_vm15 = vmor %vm991_vm14, %vm992_vm13  ;;  %v1012_v57 = vand.u32 2147483648, %v985_v40  ;;  %v1010_v63 = vand.u32 2147483647, %v985_v40  ;;  %vm1006_vm3 = vweird.f32 %v985_v40 }
 0x694   :  { %v988_v42 = vsub.f32 1.0, %v987_v41 }
 0x695   :  { %v1013_v4 = vor.u32 1.1754944e-38, %v1012_v57  ;;  %vm1011_vm5 = vcmp.eq.f32.partialorder %v1010_v63, 8.507059e+37 }
 0x696   :  { %v989_v44 = vmul.f32 %v4306_v39, %v988_v42 }
 0x698   :  { %v990_v46 = vadd.f32 %v4306_v39, %v989_v44 }
 0x699   :  { %v4308_v47 = vpop.eup %4307 }
 0x69a   :  { %v994_v50 = vsel %vm993_vm15, %v4306_v39, %v990_v46  ;;  %v1002_v51 = vmul.f32 %v4308_v47, %v985_v40  ;;  %vm1007_vm2 = vweird.f32 %v4308_v47 }
 0x69b   :  { %v999_v52 = vsel %vm996_vm1, %v998_v49, %v994_v50  ;;  %vm1008_vm4 = vmor %vm1006_vm3, %vm1007_vm2 }
 0x69c   :  { %v1016_v54 = vmul.f32 %v999_v52, %v949_v2  ;;  %v1003_v55 = vsub.f32 1.0, %v1002_v51  ;;  %v3971_v2 = vld [vmem:[%s5965_s4 + $0x88] sm:$0xff] }
 0x69d   :  { %1145 = vmatpush.msra.mxu0 %v3971_v2 }
 0x69e   :  { %v1018_v58 = vmul.f32 %v1016_v54, %v972_v53  ;;  %v1004_v62 = vmul.f32 %v4308_v47, %v1003_v55 }
 0x6a0   :  { %1036 = vmatmul.f32.vlgmr.msra.gmra.mxu3 %v1018_v58  ;;  %v1005_v3 = vadd.f32 %v4308_v47, %v1004_v62 }
 0x6a2   :  { %v1009_v5 = vsel %vm1008_vm4, %v4308_v47, %v1005_v3  ;;  %v4251_v47 = vld [vmem:[%s5964_s3 + $0x1] ss:$0 sm:$0xff] }
 0x6a3   :  { %v1014_v9 = vsel %vm1011_vm5, %v1013_v4, %v1009_v5 }
 0x6a4   :  { %v1017_v10 = vmul.f32 %v1014_v9, %v952_v31 }
 0x6a6   :  { %v1019_v6 = vmul.f32 %v1017_v10, %v975_v11 }
 0x6a8   :  { %1039 = vmatmul.f32.gmra.mxu3 %v1019_v6 }
 0x723   :  { %v1037_v12 = vpop.f32.mrf.mxu3 }
 0x724   :  { %v4995_v48 = vadd.f32 %v1037_v12, %v4875_v20  ;;  %v3984_v20 = vld [vmem:[%s5965_s4 + $0xf0] sm:$0xff] }
 0x725   :  { %1115 = vmatpush.msra.mxu2 %v3984_v20 }
 0x726   :  { %v1045_v13 = vmul.f32 %v4995_v48, %v4995_v48 }
 0x728   :  { %v1047_v14 = vsel %vm94_vm0, %v1045_v13, 0.0  ;;  %v4457_v13 = vld [vmem:[%s5994_s0 + $0x8] sm:$0xff] }
 0x729   :  { %1048 = vadd.xlane.f32.xlu2 %v1047_v14 }
 0x72b   :  { %v1040_v60 = vpop.f32.mrf.mxu3 }
 0x72c   :  { %v5001_v15 = vadd.f32 %v1040_v60, %v4882_v27  ;;  %v3982_v27 = vld [vmem:[%s5965_s4 + $0xe0] sm:$0xff]  ;;  %s6003_s4 = smov 8  }
 0x72d   :  { %1116 = vmatpush.msra.mxu2 %v3982_v27 }
 0x72e   :  { %v1046_v16 = vmul.f32 %v5001_v15, %v5001_v15 }
 0x72f   :  { %1117 = vmatpush.msra.mxu2 %v3980_v21 }
 0x730   :  { %v1050_v17 = vsel %vm94_vm0, %v1046_v16, 0.0 }
 0x731   :  { %1051 = vadd.xlane.f32.xlu1 %v1050_v17  ;;  %1118 = vmatpush.msra.mxu2 %v3978_v7  ;;  %v4458_v17 = vld [vmem:[%s5994_s0] sm:$0xff] }
 0x733   :  { %1119 = vmatpush.msra.mxu2 %v3976_v8 }
 0x735   :  { %1120 = vmatpush.msra.mxu2 %v3974_v26 }
 0x737   :  { %1121 = vmatpush.msra.mxu2 %v3972_v0 }
 0x739   :  { %1122 = vmatpush.msra.mxu2 %v3970_v29 }
 0x79c   :  { %v1049_v30 = vpop.xlane.xlu2 %1048 }
 0x79d   :  { %v1053_v31 = vmul.f32 %v1049_v30, %v4679_v23 }
 0x79f   :  { %v1055_v33 = vadd.f32 1e-06, %v1053_v31 }
 0x7a1   :  { %4309 = vrsqrt.f32 %v1055_v33  ;;  %vm1063_vm7 = vweird.f32 %v1055_v33 }
 0x7a4   :  { %v1052_v34 = vpop.xlane.xlu1 %1051 }
 0x7a5   :  { %v1054_v35 = vmul.f32 %v1052_v34, %v4679_v23 }
 0x7a7   :  { %v4310_v36 = vpop.eup %4309  ;;  %v1056_v39 = vadd.f32 1e-06, %v1054_v35 }
 0x7a8   :  { %v1058_v40 = vmul.f32 %v4310_v36, %v1055_v33  ;;  %vm1064_vm6 = vweird.f32 %v4310_v36 }
 0x7a9   :  { %4311 = vrsqrt.f32 %v1056_v39  ;;  %vm1065_vm11 = vmor %vm1063_vm7, %vm1064_vm6  ;;  %vm1073_vm13 = vweird.f32 %v1056_v39 }
 0x7aa   :  { %v1059_v41 = vmul.f32 %v4310_v36, %v1058_v40 }
 0x7ac   :  { %v1060_v42 = vmul.f32 0.5, %v1059_v41 }
 0x7ae   :  { %v1061_v43 = vsub.f32 1.5, %v1060_v42 }
 0x7af   :  { %v4312_v44 = vpop.eup %4311 }
 0x7b0   :  { %v1062_v45 = vmul.f32 %v4310_v36, %v1061_v43  ;;  %v1068_v46 = vmul.f32 %v4312_v44, %v1056_v39  ;;  %vm1074_vm12 = vweird.f32 %v4312_v44  ;;  %v3990_v39 = vld [vmem:[%s5966_s5 + $0x40] sm:$0xff] }
 0x7b1   :  { %vm1075_vm14 = vmor %vm1073_vm13, %vm1074_vm12 }
 0x7b2   :  { %v1066_v49 = vsel %vm1065_vm11, %v4310_v36, %v1062_v45  ;;  %v1069_v50 = vmul.f32 %v4312_v44, %v1068_v46  ;;  %v3991_v36 = vld [vmem:[%s5966_s5 + $0x48] sm:$0xff] }
 0x7b3   :  { %v1077_v51 = vmul.f32 %v1066_v49, %v4995_v48 }
 0x7b4   :  { %v1070_v52 = vmul.f32 0.5, %v1069_v50 }
 0x7b5   :  { %v1082_v53 = vmul.f32 %v4251_v47, %v1077_v51 }
 0x7b6   :  { %v1071_v54 = vsub.f32 1.5, %v1070_v52 }
 0x7b7   :  { %3986 = vmatmul.msk.f32.vlgmr.msra.gmra.mxu2 %vm94_vm0, %v1082_v53  ;;  %3988 = vmatmul.msk.f32.vlgmr.msra.gmra.mxu0 %vm94_vm0, %v1082_v53 }
 0x7b8   :  { %v1072_v55 = vmul.f32 %v4312_v44, %v1071_v54 }
 0x7ba   :  { %v1076_v57 = vsel %vm1075_vm14, %v4312_v44, %v1072_v55 }
 0x7bb   :  { %v1078_v58 = vmul.f32 %v1076_v57, %v5001_v15 }
 0x7bd   :  { %v1083_v62 = vmul.f32 %v4251_v47, %v1078_v58 }
 0x7bf   :  { %3987 = vmatmul.msk.f32.gmra.mxu2 %vm94_vm0, %v1083_v62  ;;  %3989 = vmatmul.msk.f32.gmra.mxu0 %vm94_vm0, %v1083_v62 }
 0x834   :  { %v1147_v63 = vpop.f32.mrf.mxu0 }
 0x835   :  { %v1169_v3 = vmul.f32 %v1147_v63, %v4723_v61  ;;  %v1167_v20 = vmul.f32 %v4458_v17, %v1147_v63 }
 0x837   :  { %1173 = vrot.lane.b32.xlu1 %v1169_v3, %s4523_s2 }
 0x83a   :  { %v1124_v4 = vpop.f32.mrf.mxu2 }
 0x83b   :  { %v1155_v5 = vmul.f32 %v1124_v4, %v4717_v56  ;;  %v1153_v19 = vmul.f32 %v4458_v17, %v1124_v4 }
 0x83c   :  { %v1150_v9 = vpop.f32.mrf.mxu0 }
 0x83d   :  { %1159 = vrot.lane.b32.xlu0 %v1155_v5, %s4522_s21  ;;  %v1170_v10 = vmul.f32 %v1150_v9, %v4721_v59  ;;  %v5071_v6 = vpack.i.bf16 %v1147_v63, %v1150_v9  ;;  %v1168_v14 = vmul.f32 %v4457_v13, %v1150_v9 }
 0x83f   :  { %1175 = vrot.lane.b32.xlu2 %v1170_v10, %s4523_s2 }
 0x842   :  { %v1127_v11 = vpop.f32.mrf.mxu2 }
 0x843   :  { %v1156_v12 = vmul.f32 %v1127_v11, %v4727_v1  ;;  %v1154_v24 = vmul.f32 %v4457_v13, %v1127_v11 }
 0x845   :  { %4220 = vrot.lane.b32.xlu0 %v5071_v6, %s4522_s21 }
 0x847   :  { %1161 = vrot.lane.b32.xlu2 %v1156_v12, %s4522_s21 }
 0x899   :  { %v1176_v60 = vpop.permute.xlu2 %1175 }
 0x89a   :  { %v1180_v16 = vadd.f32 %v1176_v60, %v1168_v14 }
 0x89c   :  { %1490 = vrot.lane.b32.xlu0 %v1180_v16, %s4524_s13  ;;  %3998 = vmatpush.xpose.msk.msrb.mxu1 %vm257_vm8, %v1180_v16 }
 0x89d   :  { %4004 = vmatpush.xpose.msk.msrb.mxu0 %vm257_vm8, %v1180_v16 }
 0x8a1   :  { %v1162_v7 = vpop.permute.xlu2 %1161 }
 0x8a2   :  { %v1166_v25 = vadd.f32 %v1162_v7, %v1154_v24 }
 0x8a9   :  { %v1174_v18 = vpop.permute.xlu1 %1173 }
 0x8aa   :  { %v1179_v27 = vadd.f32 %v1174_v18, %v1167_v20 }
 0x8ac   :  { %3999 = vmatpush.xpose.msk.msrb.mxu1 %vm257_vm8, %v1179_v27  ;;  %4005 = vmatpush.xpose.msk.msrb.mxu0 %vm257_vm8, %v1179_v27 }
 0x8af   :  { %v1160_v21 = vpop.permute.xlu0 %1159 }
 0x8b0   :  { %v1165_v22 = vadd.f32 %v1160_v21, %v1153_v19 }
 0x8b2   :  { %4000 = vmatmul.msk.f32.vlgmr.msrb.gmra.mxu1 %vm257_vm8, %v1165_v22 }
 0x8b7   :  { %v4221_v8 = vpop.permute.xlu0 %4220 }
 0x8b8   :  { %v4222_v26 = vunpack.i.l.bf16 %v4221_v8  ;;  %v4223_v28 = vunpack.i.h.bf16 %v4221_v8 }
 0x8ba   :  { %4001 = vmatmul.msk.f32.gmra.mxu1 %vm257_vm8, %v1166_v25  ;;  %1275 = vmatpush.msrb.mxu2 %v4222_v26 }
 0x8bb   :  { %1387 = vmatpush.msra.mxu1 %v4222_v26 }
 0x8bc   :  { %1276 = vmatpush.msrb.mxu2 %v4223_v28 }
 0x8bd   :  { %1388 = vmatpush.msra.mxu1 %v4223_v28 }
 0x8be   :  { %1475 = vmatpush.msra.mxu2 %v3991_v36 }
 0x8c0   :  { %1476 = vmatpush.msra.mxu2 %v3990_v39 }
 0x90e   :  { %v1491_v0 = vpop.permute.xlu0 %1490 }
 0x90f   :  { %4014 = vmatpush.xpose.msk.msra.mxu0 %vm257_vm8, %v1491_v0 }
 0x92f   :  { %v1219_v37 = vpop.f32.mrf.mxu1 }
 0x930   :  { %v1225_v29 = vmul.f32 0.25, %v1219_v37 }
 0x932   :  { %v1227_v2 = vsel %vm4763_vm9, %v1225_v29, -3.4028235e+38 }
 0x933   :  { %v1229_v30 = vsel %vm257_vm8, %v1227_v2, -inf }
 0x934   :  { %1230 = vmax.xlane.f32.xlu1 %v1229_v30 }
 0x937   :  { %v1222_v31 = vpop.f32.mrf.mxu1 }
 0x938   :  { %v1226_v33 = vmul.f32 0.25, %v1222_v31 }
 0x93a   :  { %v1228_v34 = vsel %vm4770_vm10, %v1226_v33, -3.4028235e+38 }
 0x93b   :  { %v1232_v35 = vsel %vm257_vm8, %v1228_v34, -inf }
 0x93c   :  { %1233 = vmax.xlane.f32.xlu2 %v1232_v35 }
 0x94d   :  { %1316 = vrot.lane.b32.xlu1 %v1166_v25, %s4524_s13 }
 0x954   :  { %1314 = vrot.lane.b32.xlu2 %v1165_v22, %s4524_s13 }
 0x955   :  { %1484 = vrot.lane.b32.xlu1 %v1165_v22, %s4523_s2 }
 0x95c   :  { %1488 = vrot.lane.b32.xlu2 %v1179_v27, %s4524_s13 }
 0x964   :  { %1641 = vrot.lane.b32.xlu2 %v1165_v22, %s4525_s23 }
 0x9a7   :  { %v1231_v40 = vpop.xlane.xlu1 %1230 }
 0x9a8   :  { %v1235_v41 = vsub.f32 %v1227_v2, %v1231_v40 }
 0x9aa   :  { %v1237_v42 = vmul.f32 1.442695, %v1235_v41 }
 0x9ac   :  { %4313 = vpow2.f32 %v1237_v42 }
 0x9af   :  { %v1234_v43 = vpop.xlane.xlu2 %1233 }
 0x9b0   :  { %v1236_v44 = vsub.f32 %v1228_v34, %v1234_v43 }
 0x9b2   :  { %v4314_v45 = vpop.eup %4313  ;;  %v1239_v46 = vmul.f32 1.442695, %v1236_v44 }
 0x9b3   :  { %4002 = vmatmul.msk.f32.vlgmr.msrb.gmra.mxu2 %vm257_vm8, %v4314_v45  ;;  %v1241_v47 = vsel %vm257_vm8, %v4314_v45, 0.0 }
 0x9b4   :  { %4315 = vpow2.f32 %v1239_v46  ;;  %4022 = vmatpush.xpose.msk.msrb.mxu2 %vm257_vm8, %v1491_v0  ;;  %1242 = vadd.xlane.f32.xlu0 %v1241_v47 }
 0x9b7   :  { %v1315_v49 = vpop.permute.xlu2 %1314 }
 0x9b8   :  { %4006 = vmatmul.msk.f32.vlgmr.msrb.gmra.mxu0 %vm257_vm8, %v1315_v49 }
 0x9ba   :  { %v4316_v50 = vpop.eup %4315 }
 0x9bb   :  { %4003 = vmatmul.msk.f32.gmra.mxu2 %vm257_vm8, %v4316_v50  ;;  %v1244_v51 = vsel %vm257_vm8, %v4316_v50, 0.0 }
 0x9bc   :  { %1245 = vadd.xlane.f32.xlu1 %v1244_v51 }
 0x9bf   :  { %v1317_v52 = vpop.permute.xlu1 %1316  ;;  %v1489_v53 = vpop.permute.xlu2 %1488 }
 0x9c0   :  { %4007 = vmatmul.msk.f32.gmra.mxu0 %vm257_vm8, %v1317_v52  ;;  %4023 = vmatpush.xpose.msk.msrb.mxu2 %vm257_vm8, %v1489_v53 }
 0x9c1   :  { %4015 = vmatpush.xpose.msk.msra.mxu0 %vm257_vm8, %v1489_v53 }
 0x9c7   :  { %v1485_v54 = vpop.permute.xlu1 %1484  ;;  %v1642_v39 = vpop.permute.xlu2 %1641 }
 0x9c8   :  { %1486 = vrot.lane.b32.xlu0 %v1166_v25, %s4523_s2  ;;  %4016 = vmatmul.msk.f32.vlgmr.msra.gmra.mxu0 %vm257_vm8, %v1485_v54 }
 0x9d5   :  { %1643 = vrot.lane.b32.xlu1 %v1166_v25, %s4525_s23 }
 0xa27   :  { %v1243_v55 = vpop.xlane.xlu0 %1242 }
 0xa28   :  { %4317 = vrcp.f32 %v1243_v55  ;;  %v1295_v3 = vand.u32 2147483648, %v1243_v55  ;;  %v1293_v5 = vand.u32 2147483647, %v1243_v55  ;;  %vm1289_vm1 = vweird.f32 %v1243_v55 }
 0xa2a   :  { %v1296_v14 = vor.u32 1.1754944e-38, %v1295_v3  ;;  %vm1294_vm3 = vcmp.eq.f32.partialorder %v1293_v5, 8.507059e+37 }
 0xa2e   :  { %v4318_v57 = vpop.eup %4317 }
 0xa2f   :  { %v1285_v58 = vmul.f32 %v4318_v57, %v1243_v55  ;;  %v1246_v62 = vpop.xlane.xlu1 %1245  ;;  %vm1290_vm15 = vweird.f32 %v4318_v57 }
 0xa30   :  { %4319 = vrcp.f32 %v1246_v62  ;;  %vm1291_vm2 = vmor %vm1289_vm1, %vm1290_vm15  ;;  %v1310_v22 = vand.u32 2147483648, %v1246_v62  ;;  %v1308_v24 = vand.u32 2147483647, %v1246_v62  ;;  %vm1304_vm5 = vweird.f32 %v1246_v62 }
 0xa31   :  { %v1286_v63 = vsub.f32 1.0, %v1285_v58 }
 0xa32   :  { %v1311_v28 = vor.u32 1.1754944e-38, %v1310_v22  ;;  %vm1309_vm7 = vcmp.eq.f32.partialorder %v1308_v24, 8.507059e+37  ;;  %v3992_v24 = vld [vmem:[%s5966_s5 + $0x50] sm:$0xff] }
 0xa33   :  { %v1287_v4 = vmul.f32 %v4318_v57, %v1286_v63 }
 0xa35   :  { %v1339_v9 = vpop.f32.mrf.mxu0  ;;  %v1288_v10 = vadd.f32 %v4318_v57, %v1287_v4 }
 0xa36   :  { %v4320_v11 = vpop.eup %4319  ;;  %v1345_v12 = vmul.f32 0.25, %v1339_v9  ;;  %v1278_v13 = vpop.f32.mrf.mxu2 }
 0xa37   :  { %v1300_v60 = vmul.f32 %v4320_v11, %v1246_v62  ;;  %v1292_v16 = vsel %vm1291_vm2, %v4318_v57, %v1288_v10  ;;  %vm1305_vm4 = vweird.f32 %v4320_v11 }
 0xa38   :  { %v1297_v17 = vsel %vm1294_vm3, %v1296_v14, %v1292_v16  ;;  %v1347_v20 = vsel %vm4763_vm9, %v1345_v12, -3.4028235e+38  ;;  %vm1306_vm6 = vmor %vm1304_vm5, %vm1305_vm4 }
 0xa39   :  { %v1301_v18 = vsub.f32 1.0, %v1300_v60  ;;  %v1298_v27 = vmul.f32 %v1297_v17, %v1278_v13  ;;  %v1349_v19 = vsel %vm257_vm8, %v1347_v20, -inf }
 0xa3a   :  { %v1487_v21 = vpop.permute.xlu0 %1486  ;;  %1350 = vmax.xlane.f32.xlu2 %v1349_v19 }
 0xa3b   :  { %4012 = vmatmul.msk.f32.vlgmr.msra.gmra.mxu2 %vm257_vm8, %v1298_v27  ;;  %4017 = vmatmul.msk.f32.gmra.mxu0 %vm257_vm8, %v1487_v21  ;;  %v1302_v7 = vmul.f32 %v4320_v11, %v1301_v18 }
 0xa3d   :  { %v1342_v8 = vpop.f32.mrf.mxu0  ;;  %v1303_v25 = vadd.f32 %v4320_v11, %v1302_v7  ;;  %v3993_v7 = vld [vmem:[%s5966_s5 + $0x58] sm:$0xff] }
 0xa3e   :  { %v1346_v26 = vmul.f32 0.25, %v1342_v8  ;;  %v1281_v37 = vpop.f32.mrf.mxu2  ;;  %1446 = vmatpush.msrb.mxu3 %v3993_v7 }
 0xa3f   :  { %v1307_v0 = vsel %vm1306_vm6, %v4320_v11, %v1303_v25 }
 0xa40   :  { %v1312_v29 = vsel %vm1309_vm7, %v1311_v28, %v1307_v0  ;;  %v1348_v2 = vsel %vm4770_vm10, %v1346_v26, -3.4028235e+38  ;;  %1447 = vmatpush.msrb.mxu3 %v3992_v24  ;;  %v3995_v28 = vld [vmem:[%s5966_s5 + $0x68] sm:$0xff]  ;;  %v3994_v0 = vld [vmem:[%s5966_s5 + $0x60] sm:$0xff] }
 0xa41   :  { %v1313_v30 = vmul.f32 %v1312_v29, %v1281_v37  ;;  %v1352_v31 = vsel %vm257_vm8, %v1348_v2, -inf }
 0xa42   :  { %1353 = vmax.xlane.f32.xlu0 %v1352_v31  ;;  %1630 = vmatpush.msra.mxu3 %v3995_v28  ;;  %v3996_v28 = vld [vmem:[%s5966_s5 + $0x70] sm:$0xff] }
 0xa43   :  { %4013 = vmatmul.msk.f32.gmra.mxu2 %vm257_vm8, %v1313_v30 }
 0xa44   :  { %1631 = vmatpush.msra.mxu3 %v3994_v0 }
 0xa45   :  { %v1517_v33 = vpop.f32.mrf.mxu0 }
 0xa46   :  { %v1523_v34 = vmul.f32 0.25, %v1517_v33 }
 0xa47   :  { %v1644_v40 = vpop.permute.xlu1 %1643 }
 0xa48   :  { %v1525_v35 = vsel %vm4763_vm9, %v1523_v34, -3.4028235e+38 }
 0xa49   :  { %v1527_v36 = vsel %vm257_vm8, %v1525_v35, -inf }
 0xa4a   :  { %1528 = vmax.xlane.f32.xlu1 %v1527_v36 }
 0xa4b   :  { %4024 = vmatmul.msk.f32.vlgmr.msrb.gmra.mxu2 %vm257_vm8, %v1642_v39 }
 0xa53   :  { %4025 = vmatmul.msk.f32.gmra.mxu2 %vm257_vm8, %v1644_v40 }
 0xa63   :  { %4225 = vrot.lane.b32.xlu1 %v5071_v6, %s5999_s27 }
 0xaad   :  { %v1351_v41 = vpop.xlane.xlu2 %1350 }
 0xaae   :  { %v1355_v42 = vsub.f32 %v1347_v20, %v1351_v41 }
 0xab0   :  { %v1357_v43 = vmul.f32 1.442695, %v1355_v42 }
 0xab2   :  { %4321 = vpow2.f32 %v1357_v43 }
 0xab5   :  { %v1354_v44 = vpop.xlane.xlu0 %1353 }
 0xab6   :  { %v1356_v45 = vsub.f32 %v1348_v2, %v1354_v44 }
 0xab8   :  { %v4322_v46 = vpop.eup %4321  ;;  %v1359_v47 = vmul.f32 1.442695, %v1356_v45  ;;  %v1520_v49 = vpop.f32.mrf.mxu0 }
 0xab9   :  { %v1524_v50 = vmul.f32 0.25, %v1520_v49  ;;  %4008 = vmatmul.msk.f32.vlgmr.msra.gmra.mxu1 %vm257_vm8, %v4322_v46  ;;  %v1361_v16 = vsel %vm257_vm8, %v4322_v46, 0.0 }
 0xaba   :  { %4323 = vpow2.f32 %v1359_v47 }
 0xabb   :  { %v1526_v51 = vsel %vm4770_vm10, %v1524_v50, -3.4028235e+38 }
 0xabc   :  { %v1530_v52 = vsel %vm257_vm8, %v1526_v51, -inf }
 0xabd   :  { %1531 = vmax.xlane.f32.xlu2 %v1530_v52  ;;  %v1529_v55 = vpop.xlane.xlu1 %1528 }
 0xabe   :  { %v5140_v6 = vpop.f32.mrf.mxu2  ;;  %v1533_v57 = vsub.f32 %v1525_v35, %v1529_v55 }
 0xac0   :  { %v4324_v53 = vpop.eup %4323  ;;  %v1535_v63 = vmul.f32 1.442695, %v1533_v57 }
 0xac1   :  { %4009 = vmatmul.msk.f32.gmra.mxu1 %vm257_vm8, %v4324_v53  ;;  %v1364_v17 = vsel %vm257_vm8, %v4324_v53, 0.0 }
 0xac2   :  { %4325 = vpow2.f32 %v1535_v63 }
 0xac6   :  { %v5143_v54 = vpop.f32.mrf.mxu2 }
 0xac8   :  { %v4326_v14 = vpop.eup %4325 }
 0xac9   :  { %v1539_v20 = vsel %vm257_vm8, %v4326_v14, 0.0 }
 0xace   :  { %v1666_v58 = vpop.f32.mrf.mxu2 }
 0xacf   :  { %v1672_v62 = vmul.f32 0.25, %v1666_v58 }
 0xad1   :  { %v1674_v3 = vsel %vm4763_vm9, %v1672_v62, -3.4028235e+38 }
 0xad2   :  { %v1676_v4 = vsel %vm257_vm8, %v1674_v3, -inf }
 0xad3   :  { %1677 = vmax.xlane.f32.xlu0 %v1676_v4 }
 0xad5   :  { %v4226_v5 = vpop.permute.xlu1 %4225 }
 0xad6   :  { %v4227_v9 = vunpack.i.l.bf16 %v4226_v5  ;;  %v1669_v10 = vpop.f32.mrf.mxu2  ;;  %v4228_v12 = vunpack.i.h.bf16 %v4226_v5 }
 0xad7   :  { %v1673_v11 = vmul.f32 0.25, %v1669_v10 }
 0xad8   :  { %1571 = vmatpush.msrb.mxu1 %v4227_v9  ;;  %1714 = vmatpush.msrb.mxu0 %v4227_v9 }
 0xad9   :  { %v1675_v13 = vsel %vm4770_vm10, %v1673_v11, -3.4028235e+38 }
 0xada   :  { %1572 = vmatpush.msrb.mxu1 %v4228_v12  ;;  %1715 = vmatpush.msrb.mxu0 %v4228_v12  ;;  %v1679_v60 = vsel %vm257_vm8, %v1675_v13, -inf }
 0xadb   :  { %1680 = vmax.xlane.f32.xlu2 %v1679_v60  ;;  %4018 = vmatmul.msk.f32.vlgmr.msrb.gmra.mxu1 %vm257_vm8, %v4326_v14 }
 0xadc   :  { %1362 = vadd.xlane.f32.xlu0 %v1361_v16 }
 0xae3   :  { %1365 = vadd.xlane.f32.xlu2 %v1364_v17 }
 0xae4   :  { %1540 = vadd.xlane.f32.xlu0 %v1539_v20 }
 0xb30   :  { %v1532_v18 = vpop.xlane.xlu2 %1531 }
 0xb31   :  { %v1534_v27 = vsub.f32 %v1526_v51, %v1532_v18 }
 0xb33   :  { %v1537_v19 = vmul.f32 1.442695, %v1534_v27 }
 0xb35   :  { %4327 = vpow2.f32 %v1537_v19 }
 0xb36   :  { %v1390_v47 = vpop.f32.mrf.mxu1 }
 0xb3b   :  { %v4328_v21 = vpop.eup %4327 }
 0xb3c   :  { %4019 = vmatmul.msk.f32.gmra.mxu1 %vm257_vm8, %v4328_v21  ;;  %v1542_v22 = vsel %vm257_vm8, %v4328_v21, 0.0 }
 0xb3d   :  { %1543 = vadd.xlane.f32.xlu2 %v1542_v22 }
 0xb46   :  { %v1678_v8 = vpop.xlane.xlu0 %1677 }
 0xb47   :  { %v1682_v25 = vsub.f32 %v1674_v3, %v1678_v8 }
 0xb49   :  { %v1684_v26 = vmul.f32 1.442695, %v1682_v25  ;;  %v3997_v25 = vld [vmem:[%s5966_s5 + $0x78] sm:$0xff] }
 0xb4a   :  { %1773 = vmatpush.msra.mxu1 %v3997_v25 }
 0xb4b   :  { %4329 = vpow2.f32 %v1684_v26 }
 0xb4c   :  { %1774 = vmatpush.msra.mxu1 %v3996_v28  ;;  %v4044_v28 = vld [vmem:[%s5968_s7 + $0xe8] sm:$0xff] }
 0xb4e   :  { %v1681_v37 = vpop.xlane.xlu2 %1680 }
 0xb4f   :  { %v1363_v29 = vpop.xlane.xlu0 %1362  ;;  %v1683_v2 = vsub.f32 %v1675_v13, %v1681_v37  ;;  %v1393_v13 = vpop.f32.mrf.mxu1 }
 0xb50   :  { %4331 = vrcp.f32 %v1363_v29  ;;  %v1407_v42 = vand.u32 2147483648, %v1363_v29  ;;  %v1405_v45 = vand.u32 2147483647, %v1363_v29  ;;  %vm1401_vm12 = vweird.f32 %v1363_v29 }
 0xb51   :  { %v4330_v30 = vpop.eup %4329  ;;  %v1686_v31 = vmul.f32 1.442695, %v1683_v2 }
 0xb52   :  { %4026 = vmatmul.msk.f32.vlgmr.msrb.gmra.mxu0 %vm257_vm8, %v4330_v30  ;;  %v1688_v33 = vsel %vm257_vm8, %v4330_v30, 0.0  ;;  %v1408_v51 = vor.u32 1.1754944e-38, %v1407_v42  ;;  %vm1406_vm14 = vcmp.eq.f32.partialorder %v1405_v45, 8.507059e+37 }
 0xb53   :  { %4333 = vpow2.f32 %v1686_v31  ;;  %1689 = vadd.xlane.f32.xlu0 %v1688_v33 }
 0xb56   :  { %v4332_v34 = vpop.eup %4331  ;;  %v1366_v35 = vpop.xlane.xlu2 %1365 }
 0xb57   :  { %v1397_v36 = vmul.f32 %v4332_v34, %v1363_v29  ;;  %v1541_v39 = vpop.xlane.xlu0 %1540  ;;  %4335 = vrcp.f32 %v1366_v35  ;;  %vm1402_vm11 = vweird.f32 %v4332_v34  ;;  %v1422_v63 = vand.u32 2147483648, %v1366_v35 }
 0xb58   :  { %4337 = vrcp.f32 %v1541_v39  ;;  %vm1403_vm13 = vmor %vm1401_vm12, %vm1402_vm11  ;;  %v1420_v5 = vand.u32 2147483647, %v1366_v35  ;;  %vm1416_vm1 = vweird.f32 %v1366_v35  ;;  %v1591_v16 = vand.u32 2147483648, %v1541_v39  ;;  %v1574_v21 = vpop.f32.mrf.mxu1 }
 0xb59   :  { %v4334_v40 = vpop.eup %4333  ;;  %v1398_v41 = vsub.f32 1.0, %v1397_v36  ;;  %v1423_v11 = vor.u32 1.1754944e-38, %v1422_v63  ;;  %vm1585_vm5 = vweird.f32 %v1541_v39  ;;  %v1589_v20 = vand.u32 2147483647, %v1541_v39 }
 0xb5a   :  { %4027 = vmatmul.msk.f32.gmra.mxu0 %vm257_vm8, %v4334_v40  ;;  %v1691_v43 = vsel %vm257_vm8, %v4334_v40, 0.0  ;;  %vm1421_vm3 = vcmp.eq.f32.partialorder %v1420_v5, 8.507059e+37  ;;  %v1592_v27 = vor.u32 1.1754944e-38, %v1591_v16 }
 0xb5b   :  { %v1399_v44 = vmul.f32 %v4332_v34, %v1398_v41  ;;  %1692 = vadd.xlane.f32.xlu1 %v1691_v43  ;;  %vm1590_vm7 = vcmp.eq.f32.partialorder %v1589_v20, 8.507059e+37 }
 0xb5d   :  { %v4336_v46 = vpop.eup %4335  ;;  %v1400_v49 = vadd.f32 %v4332_v34, %v1399_v44 }
 0xb5e   :  { %v4338_v50 = vpop.eup %4337  ;;  %v1412_v52 = vmul.f32 %v4336_v46, %v1366_v35  ;;  %vm1417_vm15 = vweird.f32 %v4336_v46 }
 0xb5f   :  { %v1404_v53 = vsel %vm1403_vm13, %v4332_v34, %v1400_v49  ;;  %v1581_v55 = vmul.f32 %v4338_v50, %v1541_v39  ;;  %vm1418_vm2 = vmor %vm1416_vm1, %vm1417_vm15  ;;  %vm1586_vm4 = vweird.f32 %v4338_v50 }
 0xb60   :  { %v1409_v57 = vsel %vm1406_vm14, %v1408_v51, %v1404_v53  ;;  %v1413_v58 = vsub.f32 1.0, %v1412_v52  ;;  %vm1587_vm6 = vmor %vm1585_vm5, %vm1586_vm4 }
 0xb61   :  { %v1582_v62 = vsub.f32 1.0, %v1581_v55  ;;  %v1410_v3 = vmul.f32 %v1409_v57, %v1390_v47 }
 0xb62   :  { %v1414_v4 = vmul.f32 %v4336_v46, %v1413_v58 }
 0xb63   :  { %v1583_v9 = vmul.f32 %v4338_v50, %v1582_v62  ;;  %4010 = vmatmul.msk.f32.vlgmr.msrb.gmra.mxu3 %vm257_vm8, %v1410_v3 }
 0xb64   :  { %v1415_v10 = vadd.f32 %v4336_v46, %v1414_v4 }
 0xb65   :  { %v1584_v14 = vadd.f32 %v4338_v50, %v1583_v9 }
 0xb66   :  { %v1419_v12 = vsel %vm1418_vm2, %v4336_v46, %v1415_v10 }
 0xb67   :  { %v1424_v60 = vsel %vm1421_vm3, %v1423_v11, %v1419_v12  ;;  %v1588_v18 = vsel %vm1587_vm6, %v4338_v50, %v1584_v14 }
 0xb68   :  { %v1425_v17 = vmul.f32 %v1424_v60, %v1393_v13  ;;  %v1593_v19 = vsel %vm1590_vm7, %v1592_v27, %v1588_v18 }
 0xb69   :  { %v1594_v22 = vmul.f32 %v1593_v19, %v1574_v21 }
 0xb6b   :  { %4011 = vmatmul.msk.f32.gmra.mxu3 %vm257_vm8, %v1425_v17 }
 0xb73   :  { %4020 = vmatmul.msk.f32.vlgmr.msra.gmra.mxu3 %vm257_vm8, %v1594_v22 }
 0xbb0   :  { %v1544_v7 = vpop.xlane.xlu2 %1543 }
 0xbb1   :  { %4339 = vrcp.f32 %v1544_v7  ;;  %v1606_v0 = vand.u32 2147483648, %v1544_v7  ;;  %v1604_v29 = vand.u32 2147483647, %v1544_v7  ;;  %vm1600_vm12 = vweird.f32 %v1544_v7 }
 0xbb3   :  { %v1607_v30 = vor.u32 1.1754944e-38, %v1606_v0  ;;  %vm1605_vm14 = vcmp.eq.f32.partialorder %v1604_v29, 8.507059e+37  ;;  %v4041_v0 = vld [vmem:[%s5968_s7 + $0xd0] sm:$0xff]  ;;  %v4039_v29 = vld [vmem:[%s5968_s7 + $0xc0] sm:$0xff] }
 0xbb7   :  { %v4340_v24 = vpop.eup %4339 }
 0xbb8   :  { %v1596_v8 = vmul.f32 %v4340_v24, %v1544_v7  ;;  %vm1601_vm11 = vweird.f32 %v4340_v24 }
 0xbb9   :  { %vm1602_vm13 = vmor %vm1600_vm12, %vm1601_vm11  ;;  %v1577_v33 = vpop.f32.mrf.mxu1 }
 0xbba   :  { %v1597_v26 = vsub.f32 1.0, %v1596_v8 }
 0xbbc   :  { %v1598_v37 = vmul.f32 %v4340_v24, %v1597_v26  ;;  %v4046_v26 = vld [vmem:[%s5968_s7 + $0xf8] sm:$0xff] }
 0xbbd   :  { %1898 = vmatpush.msra.mxu2 %v4046_v26 }
 0xbbe   :  { %v1599_v2 = vadd.f32 %v4340_v24, %v1598_v37  ;;  %v4042_v37 = vld [vmem:[%s5968_s7 + $0xd8] sm:$0xff] }
 0xbbf   :  { %1899 = vmatpush.msra.mxu2 %v4044_v28  ;;  %v4047_v28 = vld [vmem:[%s5969_s8 + $0x80] sm:$0xff] }
 0xbc0   :  { %v1603_v31 = vsel %vm1602_vm13, %v4340_v24, %v1599_v2  ;;  %v4040_v2 = vld [vmem:[%s5968_s7 + $0xc8] sm:$0xff] }
 0xbc1   :  { %v1608_v34 = vsel %vm1605_vm14, %v1607_v30, %v1603_v31  ;;  %1900 = vmatpush.msra.mxu2 %v4042_v37  ;;  %v4037_v30 = vld [vmem:[%s5968_s7 + $0xb0] sm:$0xff]  ;;  %v4038_v31 = vld [vmem:[%s5968_s7 + $0xb8] sm:$0xff] }
 0xbc2   :  { %v1609_v35 = vmul.f32 %v1608_v34, %v1577_v33  ;;  %v4035_v33 = vld [vmem:[%s5968_s7 + $0xa0] sm:$0xff]  ;;  %v4036_v34 = vld [vmem:[%s5968_s7 + $0xa8] sm:$0xff] }
 0xbc3   :  { %1901 = vmatpush.msra.mxu2 %v4040_v2 }
 0xbc4   :  { %4021 = vmatmul.msk.f32.gmra.mxu3 %vm257_vm8, %v1609_v35  ;;  %v4033_v35 = vld [vmem:[%s5968_s7 + $0x90] sm:$0xff] }
 0xbc5   :  { %1902 = vmatpush.msra.mxu2 %v4038_v31 }
 0xbc6   :  { %v1690_v36 = vpop.xlane.xlu0 %1689 }
 0xbc7   :  { %4341 = vrcp.f32 %v1690_v36  ;;  %v1734_v43 = vand.u32 2147483648, %v1690_v36  ;;  %v1732_v45 = vand.u32 2147483647, %v1690_v36  ;;  %vm1728_vm1 = vweird.f32 %v1690_v36  ;;  %1903 = vmatpush.msra.mxu2 %v4036_v34 }
 0xbc9   :  { %v1735_v50 = vor.u32 1.1754944e-38, %v1734_v43  ;;  %vm1733_vm3 = vcmp.eq.f32.partialorder %v1732_v45, 8.507059e+37 }
 0xbcd   :  { %v4342_v39 = vpop.eup %4341 }
 0xbce   :  { %v1724_v40 = vmul.f32 %v4342_v39, %v1690_v36  ;;  %v1693_v41 = vpop.xlane.xlu1 %1692  ;;  %vm1729_vm15 = vweird.f32 %v4342_v39  ;;  %v4034_v36 = vld [vmem:[%s5968_s7 + $0x98] sm:$0xff] }
 0xbcf   :  { %4343 = vrcp.f32 %v1693_v41  ;;  %v1717_v49 = vpop.f32.mrf.mxu0  ;;  %vm1730_vm2 = vmor %vm1728_vm1, %vm1729_vm15  ;;  %v1749_v58 = vand.u32 2147483648, %v1693_v41  ;;  %v1747_v63 = vand.u32 2147483647, %v1693_v41  ;;  %vm1743_vm5 = vweird.f32 %v1693_v41  ;;  %1904 = vmatpush.msra.mxu2 %v4034_v36 }
 0xbd0   :  { %v1725_v42 = vsub.f32 1.0, %v1724_v40  ;;  %v4032_v40 = vld [vmem:[%s5968_s7 + $0x88] sm:$0xff] }
 0xbd1   :  { %v1750_v4 = vor.u32 1.1754944e-38, %v1749_v58  ;;  %vm1748_vm7 = vcmp.eq.f32.partialorder %v1747_v63, 8.507059e+37  ;;  %1905 = vmatpush.msra.mxu2 %v4032_v40  ;;  %v4252_v58 = vld [vmem:[%s5967_s6 + $0x1] ss:$0 sm:$0xff] }
 0xbd2   :  { %v1726_v44 = vmul.f32 %v4342_v39, %v1725_v42 }
 0xbd4   :  { %v1727_v46 = vadd.f32 %v4342_v39, %v1726_v44 }
 0xbd5   :  { %v4344_v47 = vpop.eup %4343 }
 0xbd6   :  { %v1739_v51 = vmul.f32 %v4344_v47, %v1693_v41  ;;  %v1731_v52 = vsel %vm1730_vm2, %v4342_v39, %v1727_v46  ;;  %vm1744_vm4 = vweird.f32 %v4344_v47  ;;  %v4031_v39 = vld [vmem:[%s5968_s7 + $0x80] sm:$0xff] }
 0xbd7   :  { %v1736_v53 = vsel %vm1733_vm3, %v1735_v50, %v1731_v52  ;;  %vm1745_vm6 = vmor %vm1743_vm5, %vm1744_vm4  ;;  %v1720_v9 = vpop.f32.mrf.mxu0 }
 0xbd8   :  { %v1740_v55 = vsub.f32 1.0, %v1739_v51  ;;  %v1737_v57 = vmul.f32 %v1736_v53, %v1717_v49 }
 0xbda   :  { %v1741_v62 = vmul.f32 %v4344_v47, %v1740_v55  ;;  %4028 = vmatmul.msk.f32.vlgmr.msra.gmra.mxu1 %vm257_vm8, %v1737_v57 }
 0xbdc   :  { %v1742_v3 = vadd.f32 %v4344_v47, %v1741_v62 }
 0xbde   :  { %v1746_v5 = vsel %vm1745_vm6, %v4344_v47, %v1742_v3 }
 0xbdf   :  { %v1751_v10 = vsel %vm1748_vm7, %v1750_v4, %v1746_v5 }
 0xbe0   :  { %v1752_v11 = vmul.f32 %v1751_v10, %v1720_v9 }
 0xbe2   :  { %4029 = vmatmul.msk.f32.gmra.mxu1 %vm257_vm8, %v1752_v11 }
 0xbe6   :  { %v1449_v12 = vpop.f32.mrf.mxu3 }
 0xbe7   :  { %v1479_v60 = vadd.f32 %v5140_v6, %v1449_v12 }
 0xbee   :  { %v1452_v13 = vpop.f32.mrf.mxu3 }
 0xbef   :  { %v1482_v19 = vadd.f32 %v5143_v54, %v1452_v13  ;;  %v4045_v54 = vld [vmem:[%s5968_s7 + $0xf0] sm:$0xff] }
 0xbf0   :  { %1875 = vmatpush.msrb.mxu3 %v4045_v54  ;;  %v4048_v54 = vld [vmem:[%s5969_s8 + $0x88] sm:$0xff] }
 0xbf6   :  { %v1633_v14 = vpop.f32.mrf.mxu3 }
 0xbf7   :  { %v1639_v16 = vadd.f32 %v1633_v14, %v1479_v60  ;;  %v4062_v14 = vld [vmem:[%s5969_s8 + $0xf8] sm:$0xff]  ;;  %v4061_v60 = vld [vmem:[%s5969_s8 + $0xf0] sm:$0xff] }
 0xbf8   :  { %1955 = vmatpush.msra.mxu0 %v4062_v14 }
 0xbfa   :  { %1956 = vmatpush.msra.mxu0 %v4061_v60 }
 0xc47   :  { %v1636_v27 = vpop.f32.mrf.mxu3 }
 0xc48   :  { %v1640_v22 = vadd.f32 %v1636_v27, %v1482_v19  ;;  %v4057_v27 = vld [vmem:[%s5969_s8 + $0xd0] sm:$0xff]  ;;  %v4056_v19 = vld [vmem:[%s5969_s8 + $0xc8] sm:$0xff] }
 0xc57   :  { %v1776_v17 = vpop.f32.mrf.mxu1 }
 0xc58   :  { %v1782_v20 = vadd.f32 %v1776_v17, %v1639_v16  ;;  %v4060_v16 = vld [vmem:[%s5969_s8 + $0xe8] sm:$0xff]  ;;  %v4059_v17 = vld [vmem:[%s5969_s8 + $0xe0] sm:$0xff] }
 0xc59   :  { %1957 = vmatpush.msra.mxu0 %v4060_v16 }
 0xc5a   :  { %v5187_v18 = vadd.f32 %v1782_v20, %v4995_v48  ;;  %v4058_v20 = vld [vmem:[%s5969_s8 + $0xd8] sm:$0xff] }
 0xc5b   :  { %1958 = vmatpush.msra.mxu0 %v4059_v17  ;;  %v2033_v17 = vld [vmem:[%s5971_s10 + $0x78] sm:$0xff] }
 0xc5c   :  { %v1788_v21 = vmul.f32 %v5187_v18, %v5187_v18 }
 0xc5d   :  { %1959 = vmatpush.msra.mxu0 %v4058_v20  ;;  %v2113_v20 = vld [vmem:[%s5973_s12 + $0x38] sm:$0xff] }
 0xc5e   :  { %v1790_v7 = vsel %vm94_vm0, %v1788_v21, 0.0  ;;  %v4055_v21 = vld [vmem:[%s5969_s8 + $0xc0] sm:$0xff]  ;;  %2128 = vmatpush.msrb.mxu2 %v2113_v20 }
 0xc5f   :  { %v1779_v24 = vpop.f32.mrf.mxu1  ;;  %1791 = vadd.xlane.f32.xlu2 %v1790_v7  ;;  %1960 = vmatpush.msra.mxu0 %v4057_v27  ;;  %v4053_v7 = vld [vmem:[%s5969_s8 + $0xb0] sm:$0xff]  ;;  %v2031_v27 = vld [vmem:[%s5971_s10 + $0x68] sm:$0xff] }
 0xc60   :  { %v1783_v8 = vadd.f32 %v1779_v24, %v1640_v22  ;;  %v4054_v22 = vld [vmem:[%s5969_s8 + $0xb8] sm:$0xff]  ;;  %v4052_v24 = vld [vmem:[%s5969_s8 + $0xa8] sm:$0xff] }
 0xc61   :  { %1961 = vmatpush.msra.mxu0 %v4056_v19  ;;  %v2112_v19 = vld [vmem:[%s5973_s12 + $0x30] sm:$0xff] }
 0xc62   :  { %v5194_v6 = vadd.f32 %v1783_v8, %v5001_v15  ;;  %v4043_v15 = vld [vmem:[%s5968_s7 + $0xe0] sm:$0xff]  ;;  %2129 = vmatpush.msrb.mxu2 %v2112_v19 }
 0xc63   :  { %1876 = vmatpush.msrb.mxu3 %v4043_v15  ;;  %1962 = vmatpush.msra.mxu0 %v4055_v21  ;;  %v4051_v8 = vld [vmem:[%s5969_s8 + $0xa0] sm:$0xff]  ;;  %v2028_v21 = vld [vmem:[%s5971_s10 + $0x50] sm:$0xff] }
 0xc64   :  { %v1789_v25 = vmul.f32 %v5194_v6, %v5194_v6 }
 0xc65   :  { %1877 = vmatpush.msrb.mxu3 %v4041_v0  ;;  %1963 = vmatpush.msra.mxu0 %v4054_v22  ;;  %v2029_v22 = vld [vmem:[%s5971_s10 + $0x58] sm:$0xff] }
 0xc66   :  { %v1793_v48 = vsel %vm94_vm0, %v1789_v25, 0.0  ;;  %v4050_v25 = vld [vmem:[%s5969_s8 + $0x98] sm:$0xff] }
 0xc67   :  { %1794 = vadd.xlane.f32.xlu0 %v1793_v48  ;;  %1878 = vmatpush.msrb.mxu3 %v4039_v29  ;;  %v4049_v48 = vld [vmem:[%s5969_s8 + $0x90] sm:$0xff] }
 0xc68   :  { %1964 = vmatpush.msra.mxu0 %v4053_v7  ;;  %v2111_v7 = vld [vmem:[%s5973_s12 + $0x28] sm:$0xff] }
 0xc69   :  { %1879 = vmatpush.msrb.mxu3 %v4037_v30  ;;  %2130 = vmatpush.msrb.mxu2 %v2111_v7 }
 0xc6a   :  { %1965 = vmatpush.msra.mxu0 %v4052_v24  ;;  %v2026_v24 = vld [vmem:[%s5971_s10 + $0x40] sm:$0xff] }
 0xc6b   :  { %1880 = vmatpush.msrb.mxu3 %v4035_v33 }
 0xc6c   :  { %1966 = vmatpush.msra.mxu0 %v4051_v8  ;;  %v2027_v8 = vld [vmem:[%s5971_s10 + $0x48] sm:$0xff] }
 0xc6d   :  { %1881 = vmatpush.msrb.mxu3 %v4033_v35 }
 0xc6e   :  { %1967 = vmatpush.msra.mxu0 %v4050_v25  ;;  %v2110_v25 = vld [vmem:[%s5973_s12 + $0x20] sm:$0xff] }
 0xc6f   :  { %1882 = vmatpush.msrb.mxu3 %v4031_v39  ;;  %2131 = vmatpush.msrb.mxu2 %v2110_v25 }
 0xc70   :  { %1968 = vmatpush.msra.mxu0 %v4049_v48  ;;  %v2024_v48 = vld [vmem:[%s5971_s10 + $0x30] sm:$0xff] }
 0xc71   :  { %2071 = vmatpush.msra.mxu3 %v2033_v17 }
 0xc72   :  { %1969 = vmatpush.msra.mxu0 %v4048_v54  ;;  %v2025_v54 = vld [vmem:[%s5971_s10 + $0x38] sm:$0xff] }
 0xc73   :  { %2072 = vmatpush.msra.mxu3 %v2031_v27 }
 0xc74   :  { %1970 = vmatpush.msra.mxu0 %v4047_v28  ;;  %v2023_v28 = vld [vmem:[%s5971_s10 + $0x28] sm:$0xff] }
 0xc75   :  { %2073 = vmatpush.msra.mxu3 %v2029_v22 }
 0xc77   :  { %2074 = vmatpush.msra.mxu3 %v2027_v8 }
 0xc79   :  { %2075 = vmatpush.msra.mxu3 %v2025_v54 }
 0xc7b   :  { %2076 = vmatpush.msra.mxu3 %v2023_v28 }
 0xcd2   :  { %v1792_v41 = vpop.xlane.xlu2 %1791 }
 0xcd3   :  { %v1796_v42 = vmul.f32 %v1792_v41, %v4679_v23 }
 0xcd5   :  { %v1798_v43 = vadd.f32 1e-06, %v1796_v42 }
 0xcd7   :  { %4345 = vrsqrt.f32 %v1798_v43  ;;  %vm1806_vm12 = vweird.f32 %v1798_v43 }
 0xcda   :  { %v1795_v44 = vpop.xlane.xlu0 %1794 }
 0xcdb   :  { %v1797_v45 = vmul.f32 %v1795_v44, %v4679_v23 }
 0xcdd   :  { %v4346_v46 = vpop.eup %4345  ;;  %v1799_v47 = vadd.f32 1e-06, %v1797_v45 }
 0xcde   :  { %v1801_v49 = vmul.f32 %v4346_v46, %v1798_v43  ;;  %vm1807_vm11 = vweird.f32 %v4346_v46 }
 0xcdf   :  { %4347 = vrsqrt.f32 %v1799_v47  ;;  %vm1808_vm13 = vmor %vm1806_vm12, %vm1807_vm11  ;;  %vm1816_vm15 = vweird.f32 %v1799_v47 }
 0xce0   :  { %v1802_v50 = vmul.f32 %v4346_v46, %v1801_v49 }
 0xce2   :  { %v1803_v51 = vmul.f32 0.5, %v1802_v50 }
 0xce4   :  { %v1804_v52 = vsub.f32 1.5, %v1803_v51 }
 0xce5   :  { %v4348_v53 = vpop.eup %4347 }
 0xce6   :  { %v1805_v55 = vmul.f32 %v4346_v46, %v1804_v52  ;;  %v1811_v57 = vmul.f32 %v4348_v53, %v1799_v47  ;;  %vm1817_vm14 = vweird.f32 %v4348_v53 }
 0xce7   :  { %vm1818_vm1 = vmor %vm1816_vm15, %vm1817_vm14 }
 0xce8   :  { %v1809_v62 = vsel %vm1808_vm13, %v4346_v46, %v1805_v55  ;;  %v1812_v63 = vmul.f32 %v4348_v53, %v1811_v57 }
 0xce9   :  { %v1820_v3 = vmul.f32 %v1809_v62, %v5187_v18 }
 0xcea   :  { %v1813_v4 = vmul.f32 0.5, %v1812_v63 }
 0xceb   :  { %v1825_v5 = vmul.f32 %v4252_v58, %v1820_v3 }
 0xcec   :  { %v1814_v9 = vsub.f32 1.5, %v1813_v4 }
 0xced   :  { %4063 = vmatmul.msk.f32.vlgmr.msrb.gmra.mxu3 %vm94_vm0, %v1825_v5  ;;  %4065 = vmatmul.msk.f32.vlgmr.msra.gmra.mxu2 %vm94_vm0, %v1825_v5 }
 0xcee   :  { %v1815_v10 = vmul.f32 %v4348_v53, %v1814_v9 }
 0xcf0   :  { %v1819_v11 = vsel %vm1818_vm1, %v4348_v53, %v1815_v10 }
 0xcf1   :  { %v1821_v12 = vmul.f32 %v1819_v11, %v5194_v6 }
 0xcf3   :  { %v1826_v13 = vmul.f32 %v4252_v58, %v1821_v12 }
 0xcf5   :  { %4064 = vmatmul.msk.f32.gmra.mxu3 %vm94_vm0, %v1826_v13  ;;  %4066 = vmatmul.msk.f32.gmra.mxu2 %vm94_vm0, %v1826_v13 }
 0xd70   :  { %v1884_v26 = vpop.f32.mrf.mxu3  ;;  %v1907_v47 = vpop.f32.mrf.mxu2 }
 0xd71   :  { %v4067_v15 = vmul.f32 -1.442695, %v1884_v26 }
 0xd73   :  { %4349 = vpow2.f32 %v4067_v15  ;;  %v2022_v15 = vld [vmem:[%s5971_s10 + $0x20] sm:$0xff] }
 0xd78   :  { %v1887_v0 = vpop.f32.mrf.mxu3  ;;  %v1910_v4 = vpop.f32.mrf.mxu2 }
 0xd79   :  { %v4350_v37 = vpop.eup %4349  ;;  %v4068_v29 = vmul.f32 -1.442695, %v1887_v0 }
 0xd7a   :  { %v1919_v2 = vadd.f32 1.0, %v4350_v37  ;;  %v2020_v37 = vld [vmem:[%s5971_s10 + $0x10] sm:$0xff] }
 0xd7b   :  { %4351 = vpow2.f32 %v4068_v29  ;;  %v2021_v29 = vld [vmem:[%s5971_s10 + $0x18] sm:$0xff] }
 0xd7c   :  { %4353 = vrcp.f32 %v1919_v2  ;;  %v1932_v36 = vand.u32 2147483648, %v1919_v2  ;;  %v1930_v40 = vand.u32 2147483647, %v1919_v2  ;;  %vm1926_vm3 = vweird.f32 %v1919_v2  ;;  %2077 = vmatpush.msra.mxu3 %v2021_v29 }
 0xd7e   :  { %v1933_v43 = vor.u32 1.1754944e-38, %v1932_v36  ;;  %vm1931_vm5 = vcmp.eq.f32.partialorder %v1930_v40, 8.507059e+37 }
 0xd81   :  { %v4352_v30 = vpop.eup %4351 }
 0xd82   :  { %v4354_v31 = vpop.eup %4353  ;;  %v1920_v33 = vadd.f32 1.0, %v4352_v30  ;;  %v2018_v30 = vld [vmem:[%s5971_s10] sm:$0xff] }
 0xd83   :  { %v1922_v34 = vmul.f32 %v4354_v31, %v1919_v2  ;;  %vm1927_vm2 = vweird.f32 %v4354_v31  ;;  %v2107_v2 = vld [vmem:[%s5973_s12 + $0x8] sm:$0xff] }
 0xd84   :  { %4355 = vrcp.f32 %v1920_v33  ;;  %vm1928_vm4 = vmor %vm1926_vm3, %vm1927_vm2  ;;  %v1947_v51 = vand.u32 2147483648, %v1920_v33  ;;  %v1945_v55 = vand.u32 2147483647, %v1920_v33  ;;  %vm1941_vm7 = vweird.f32 %v1920_v33 }
 0xd85   :  { %v1923_v35 = vsub.f32 1.0, %v1922_v34 }
 0xd86   :  { %v1948_v58 = vor.u32 1.1754944e-38, %v1947_v51  ;;  %vm1946_vm12 = vcmp.eq.f32.partialorder %v1945_v55, 8.507059e+37  ;;  %v4253_v51 = vld [vmem:[%s5970_s9] ss:$0 sm:$0xff] }
 0xd87   :  { %v1924_v39 = vmul.f32 %v4354_v31, %v1923_v35 }
 0xd89   :  { %v1925_v41 = vadd.f32 %v4354_v31, %v1924_v39 }
 0xd8a   :  { %v4356_v42 = vpop.eup %4355 }
 0xd8b   :  { %v1929_v44 = vsel %vm1928_vm4, %v4354_v31, %v1925_v41  ;;  %v1937_v45 = vmul.f32 %v4356_v42, %v1920_v33  ;;  %vm1942_vm6 = vweird.f32 %v4356_v42  ;;  %v2019_v31 = vld [vmem:[%s5971_s10 + $0x8] sm:$0xff]  ;;  %v2106_v33 = vld [vmem:[%s5973_s12] sm:$0xff] }
 0xd8c   :  { %v1934_v46 = vsel %vm1931_vm5, %v1933_v43, %v1929_v44  ;;  %vm1943_vm11 = vmor %vm1941_vm7, %vm1942_vm6  ;;  %2078 = vmatpush.msra.mxu3 %v2019_v31 }
 0xd8d   :  { %v1951_v49 = vmul.f32 %v1934_v46, %v1884_v26  ;;  %v1938_v50 = vsub.f32 1.0, %v1937_v45  ;;  %v2109_v26 = vld [vmem:[%s5973_s12 + $0x18] sm:$0xff] }
 0xd8e   :  { %2132 = vmatpush.msrb.mxu2 %v2109_v26 }
 0xd8f   :  { %v1953_v52 = vmul.f32 %v1951_v49, %v1907_v47  ;;  %v1939_v53 = vmul.f32 %v4356_v42, %v1938_v50 }
 0xd91   :  { %v1940_v57 = vadd.f32 %v4356_v42, %v1939_v53  ;;  %1971 = vmatmul.f32.vlgmr.msra.gmra.mxu0 %v1953_v52  ;;  %v4254_v52 = vld [vmem:[%s5972_s11] ss:$0 sm:$0xff] }
 0xd93   :  { %v1944_v62 = vsel %vm1943_vm11, %v4356_v42, %v1940_v57 }
 0xd94   :  { %v1949_v63 = vsel %vm1946_vm12, %v1948_v58, %v1944_v62 }
 0xd95   :  { %v1952_v3 = vmul.f32 %v1949_v63, %v1887_v0  ;;  %v2108_v0 = vld [vmem:[%s5973_s12 + $0x10] sm:$0xff] }
 0xd96   :  { %2133 = vmatpush.msrb.mxu2 %v2108_v0 }
 0xd97   :  { %v1954_v5 = vmul.f32 %v1952_v3, %v1910_v4 }
 0xd98   :  { %2134 = vmatpush.msrb.mxu2 %v2107_v2 }
 0xd99   :  { %1974 = vmatmul.f32.gmra.mxu0 %v1954_v5 }
 0xd9a   :  { %2135 = vmatpush.msrb.mxu2 %v2106_v33 }
 0xe0e   :  { %v1972_v9 = vpop.f32.mrf.mxu0 }
 0xe0f   :  { %v5307_v10 = vadd.f32 %v1972_v9, %v5187_v18  ;;  %v2032_v18 = vld [vmem:[%s5971_s10 + $0x70] sm:$0xff] }
 0xe10   :  { %2048 = vmatpush.msrb.mxu1 %v2032_v18 }
 0xe11   :  { %v1979_v11 = vmul.f32 %v5307_v10, %v5307_v10 }
 0xe13   :  { %v1981_v12 = vsel %vm94_vm0, %v1979_v11, 0.0 }
 0xe14   :  { %1982 = vadd.xlane.f32.xlu2 %v1981_v12 }
 0xe16   :  { %v1975_v13 = vpop.f32.mrf.mxu0 }
 0xe17   :  { %v5313_v14 = vadd.f32 %v1975_v13, %v5194_v6  ;;  %v2030_v6 = vld [vmem:[%s5971_s10 + $0x60] sm:$0xff]  ;;  %s6004_s10 = smov 128  }
 0xe18   :  { %2049 = vmatpush.msrb.mxu1 %v2030_v6 }
 0xe19   :  { %v1980_v60 = vmul.f32 %v5313_v14, %v5313_v14 }
 0xe1a   :  { %2050 = vmatpush.msrb.mxu1 %v2028_v21 }
 0xe1b   :  { %v1984_v16 = vsel %vm94_vm0, %v1980_v60, 0.0 }
 0xe1c   :  { %1985 = vadd.xlane.f32.xlu0 %v1984_v16  ;;  %2051 = vmatpush.msrb.mxu1 %v2026_v24  ;;  %v4460_v24 = vld [vmem:[%s5994_s0] sm:$0xff] }
 0xe1e   :  { %2052 = vmatpush.msrb.mxu1 %v2024_v48 }
 0xe20   :  { %2053 = vmatpush.msrb.mxu1 %v2022_v15 }
 0xe22   :  { %2054 = vmatpush.msrb.mxu1 %v2020_v37 }
 0xe24   :  { %2055 = vmatpush.msrb.mxu1 %v2018_v30 }
 0xe87   :  { %v1983_v34 = vpop.xlane.xlu2 %1982 }
 0xe88   :  { %v1987_v35 = vmul.f32 %v1983_v34, %v4679_v23 }
 0xe8a   :  { %v1989_v36 = vadd.f32 1e-06, %v1987_v35 }
 0xe8c   :  { %4357 = vrsqrt.f32 %v1989_v36  ;;  %vm1997_vm14 = vweird.f32 %v1989_v36 }
 0xe8f   :  { %v1986_v39 = vpop.xlane.xlu0 %1985 }
 0xe90   :  { %v1988_v40 = vmul.f32 %v1986_v39, %v4679_v23 }
 0xe92   :  { %v4358_v41 = vpop.eup %4357  ;;  %v1990_v42 = vadd.f32 1e-06, %v1988_v40 }
 0xe93   :  { %v1992_v43 = vmul.f32 %v4358_v41, %v1989_v36  ;;  %vm1998_vm13 = vweird.f32 %v4358_v41 }
 0xe94   :  { %4359 = vrsqrt.f32 %v1990_v42  ;;  %vm1999_vm15 = vmor %vm1997_vm14, %vm1998_vm13  ;;  %vm2007_vm2 = vweird.f32 %v1990_v42 }
 0xe95   :  { %v1993_v44 = vmul.f32 %v4358_v41, %v1992_v43 }
 0xe97   :  { %v1994_v45 = vmul.f32 0.5, %v1993_v44 }
 0xe99   :  { %v1995_v46 = vsub.f32 1.5, %v1994_v45 }
 0xe9a   :  { %v4360_v47 = vpop.eup %4359 }
 0xe9b   :  { %v1996_v49 = vmul.f32 %v4358_v41, %v1995_v46  ;;  %v2002_v50 = vmul.f32 %v4360_v47, %v1990_v42  ;;  %vm2008_vm1 = vweird.f32 %v4360_v47  ;;  %v2157_v42 = vld [vmem:[#allocation2] sm:$0xff] }
 0xe9c   :  { %vm2009_vm3 = vmor %vm2007_vm2, %vm2008_vm1 }
 0xe9d   :  { %v2000_v53 = vsel %vm1999_vm15, %v4358_v41, %v1996_v49  ;;  %v2003_v55 = vmul.f32 %v4360_v47, %v2002_v50  ;;  %v2158_v41 = vld [vmem:[#allocation2 + $0x8] sm:$0xff] }
 0xe9e   :  { %v2011_v57 = vmul.f32 %v2000_v53, %v5307_v10 }
 0xe9f   :  { %v2004_v58 = vmul.f32 0.5, %v2003_v55 }
 0xea0   :  { %v2016_v62 = vmul.f32 %v4253_v51, %v2011_v57  ;;  %v2104_v63 = vmul.f32 %v4254_v52, %v2011_v57 }
 0xea1   :  { %v2005_v3 = vsub.f32 1.5, %v2004_v58 }
 0xea2   :  { %4069 = vmatmul.msk.f32.vlgmr.msrb.gmra.mxu1 %vm94_vm0, %v2016_v62  ;;  %4071 = vmatmul.msk.f32.vlgmr.msra.gmra.mxu3 %vm94_vm0, %v2016_v62 }
 0xea3   :  { %v2006_v4 = vmul.f32 %v4360_v47, %v2005_v3  ;;  %4073 = vmatmul.msk.f32.vlgmr.msrb.gmra.mxu2 %vm94_vm0, %v2104_v63 }
 0xea5   :  { %v2010_v5 = vsel %vm2009_vm3, %v4360_v47, %v2006_v4 }
 0xea6   :  { %v2012_v9 = vmul.f32 %v2010_v5, %v5313_v14 }
 0xea8   :  { %v2017_v11 = vmul.f32 %v4253_v51, %v2012_v9  ;;  %v2105_v12 = vmul.f32 %v4254_v52, %v2012_v9 }
 0xeaa   :  { %4070 = vmatmul.msk.f32.gmra.mxu1 %vm94_vm0, %v2017_v11  ;;  %4072 = vmatmul.msk.f32.gmra.mxu3 %vm94_vm0, %v2017_v11 }
 0xeab   :  { %4074 = vmatmul.msk.f32.gmra.mxu2 %vm94_vm0, %v2105_v12 }
 0xf1f   :  { %v5406_v13 = vpop.f32.mrf.mxu1 }
 0xf20   :  { %v2088_v60 = vmul.f32 %v5406_v13, %v4723_v61  ;;  %v2086_v8 = vmul.f32 %v4460_v24, %v5406_v13 }
 0xf22   :  { %2092 = vrot.lane.b32.xlu0 %v2088_v60, %s4523_s2 }
 0xf25   :  { %v5464_v63 = vpop.f32.mrf.mxu3 }
 0xf26   :  { %v2137_v16 = vpop.f32.mrf.mxu2 }
 0xf27   :  { %v5411_v18 = vpop.f32.mrf.mxu1  ;;  %v2145_v17 = vmul.f32 %v2137_v16, %v4717_v56  ;;  %v2143_v28 = vmul.f32 %v4460_v24, %v2137_v16 }
 0xf28   :  { %v2089_v20 = vmul.f32 %v5411_v18, %v4721_v59  ;;  %v5422_v61 = vpack.i.bf16 %v5406_v13, %v5411_v18  ;;  %v4459_v59 = vld [vmem:[%s5994_s0 + $0x8] sm:$0xff] }
 0xf29   :  { %v2087_v19 = vmul.f32 %v4459_v59, %v5411_v18 }
 0xf2a   :  { %2149 = vrot.lane.b32.xlu0 %v2145_v17, %s4522_s21  ;;  %2094 = vrot.lane.b32.xlu2 %v2089_v20, %s4523_s2 }
 0xf2d   :  { %v5466_v5 = vpop.f32.mrf.mxu3 }
 0xf2e   :  { %v2140_v6 = vpop.f32.mrf.mxu2 }
 0xf2f   :  { %v2146_v27 = vmul.f32 %v2140_v6, %v4727_v1  ;;  %v2144_v29 = vmul.f32 %v4459_v59, %v2140_v6 }
 0xf32   :  { %2151 = vrot.lane.b32.xlu2 %v2146_v27, %s4522_s21 }
 0xf3a   :  { %4230 = vrot.lane.b32.xlu2 %v5422_v61, %s4522_s21 }
 0xf84   :  { %v2095_v21 = vpop.permute.xlu2 %2094 }
 0xf85   :  { %v2099_v22 = vadd.f32 %v2095_v21, %v2087_v19 }
 0xf87   :  { %4075 = vmatpush.xpose.msk.msra.mxu1 %vm257_vm8, %v2099_v22  ;;  %4081 = vmatpush.xpose.msk.msra.mxu2 %vm257_vm8, %v2099_v22 }
 0xf8c   :  { %v2152_v7 = vpop.permute.xlu2 %2151 }
 0xf8d   :  { %v2156_v2 = vadd.f32 %v2152_v7, %v2144_v29 }
 0xf94   :  { %v4231_v25 = vpop.permute.xlu2 %4230  ;;  %v2093_v48 = vpop.permute.xlu0 %2092 }
 0xf95   :  { %v4232_v54 = vunpack.i.l.bf16 %v4231_v25  ;;  %v2098_v26 = vadd.f32 %v2093_v48, %v2086_v8  ;;  %v4233_v15 = vunpack.i.h.bf16 %v4231_v25 }
 0xf97   :  { %4076 = vmatpush.xpose.msk.msra.mxu1 %vm257_vm8, %v2098_v26  ;;  %2250 = vmatpush.msrb.mxu3 %v4232_v54 }
 0xf98   :  { %4082 = vmatpush.xpose.msk.msra.mxu2 %vm257_vm8, %v2098_v26  ;;  %2362 = vmatpush.msrb.mxu0 %v4232_v54 }
 0xf99   :  { %2251 = vmatpush.msrb.mxu3 %v4233_v15 }
 0xf9a   :  { %2363 = vmatpush.msrb.mxu0 %v4233_v15 }
 0xf9b   :  { %2450 = vmatpush.msra.mxu3 %v2158_v41 }
 0xf9c   :  { %v2150_v0 = vpop.permute.xlu0 %2149 }
 0xf9d   :  { %v2155_v37 = vadd.f32 %v2150_v0, %v2143_v28  ;;  %2451 = vmatpush.msra.mxu3 %v2157_v42 }
 0xf9f   :  { %4077 = vmatmul.msk.f32.vlgmr.msra.gmra.mxu1 %vm257_vm8, %v2155_v37 }
 0xfa7   :  { %4078 = vmatmul.msk.f32.gmra.mxu1 %vm257_vm8, %v2156_v2 }
0x101c   :  { %v2194_v30 = vpop.f32.mrf.mxu1 }
0x101d   :  { %v2200_v31 = vmul.f32 0.25, %v2194_v30 }
0x101f   :  { %v2202_v33 = vsel %vm4763_vm9, %v2200_v31, -3.4028235e+38 }
0x1020   :  { %v2204_v34 = vsel %vm257_vm8, %v2202_v33, -inf }
0x1021   :  { %2205 = vmax.xlane.f32.xlu1 %v2204_v34 }
0x1024   :  { %v2197_v35 = vpop.f32.mrf.mxu1 }
0x1025   :  { %v2201_v36 = vmul.f32 0.25, %v2197_v35 }
0x1027   :  { %v2203_v39 = vsel %vm4770_vm10, %v2201_v36, -3.4028235e+38 }
0x1028   :  { %v2207_v40 = vsel %vm257_vm8, %v2203_v39, -inf }
0x1029   :  { %2208 = vmax.xlane.f32.xlu0 %v2207_v40 }
0x103a   :  { %2289 = vrot.lane.b32.xlu1 %v2155_v37, %s4524_s13 }
0x103d   :  { %2291 = vrot.lane.b32.xlu0 %v2156_v2, %s4524_s13 }
0x1042   :  { %2465 = vrot.lane.b32.xlu1 %v2099_v22, %s4524_s13 }
0x1045   :  { %2461 = vrot.lane.b32.xlu0 %v2156_v2, %s4523_s2 }
0x104a   :  { %2463 = vrot.lane.b32.xlu1 %v2098_v26, %s4524_s13 }
0x1094   :  { %v2206_v43 = vpop.xlane.xlu1 %2205 }
0x1095   :  { %v2210_v44 = vsub.f32 %v2202_v33, %v2206_v43 }
0x1097   :  { %v2212_v45 = vmul.f32 1.442695, %v2210_v44 }
0x1099   :  { %4361 = vpow2.f32 %v2212_v45 }
0x109c   :  { %v2209_v46 = vpop.xlane.xlu0 %2208 }
0x109d   :  { %v2211_v47 = vsub.f32 %v2203_v39, %v2209_v46 }
0x109f   :  { %v4362_v49 = vpop.eup %4361  ;;  %v2214_v50 = vmul.f32 1.442695, %v2211_v47 }
0x10a0   :  { %4079 = vmatmul.msk.f32.vlgmr.msrb.gmra.mxu3 %vm257_vm8, %v4362_v49  ;;  %v2216_v51 = vsel %vm257_vm8, %v4362_v49, 0.0 }
0x10a1   :  { %4363 = vpow2.f32 %v2214_v50  ;;  %2217 = vadd.xlane.f32.xlu1 %v2216_v51 }
0x10a7   :  { %v4364_v52 = vpop.eup %4363 }
0x10a8   :  { %4080 = vmatmul.msk.f32.gmra.mxu3 %vm257_vm8, %v4364_v52  ;;  %v2219_v53 = vsel %vm257_vm8, %v4364_v52, 0.0 }
0x10a9   :  { %2220 = vadd.xlane.f32.xlu2 %v2219_v53 }
0x10ac   :  { %v2290_v55 = vpop.permute.xlu1 %2289 }
0x10ad   :  { %4083 = vmatmul.msk.f32.vlgmr.msra.gmra.mxu2 %vm257_vm8, %v2290_v55 }
0x10af   :  { %v2292_v57 = vpop.permute.xlu0 %2291 }
0x10b4   :  { %v2466_v58 = vpop.permute.xlu1 %2465 }
0x10b5   :  { %4084 = vmatmul.msk.f32.gmra.mxu2 %vm257_vm8, %v2292_v57  ;;  %4099 = vmatpush.xpose.msk.msrb.mxu3 %vm257_vm8, %v2466_v58 }
0x10b6   :  { %4091 = vmatpush.xpose.msk.msrb.mxu2 %vm257_vm8, %v2466_v58 }
0x10b7   :  { %v2462_v33 = vpop.permute.xlu0 %2461 }
0x10ba   :  { %2459 = vrot.lane.b32.xlu1 %v2155_v37, %s4523_s2 }
0x10bc   :  { %v2464_v62 = vpop.permute.xlu1 %2463 }
0x10bd   :  { %4092 = vmatpush.xpose.msk.msrb.mxu2 %vm257_vm8, %v2464_v62  ;;  %4100 = vmatpush.xpose.msk.msrb.mxu3 %vm257_vm8, %v2464_v62 }
0x10c1   :  { %2616 = vrot.lane.b32.xlu2 %v2155_v37, %s4525_s23 }
0x10c2   :  { %2618 = vrot.lane.b32.xlu1 %v2156_v2, %s4525_s23 }
0x1114   :  { %v2218_v3 = vpop.xlane.xlu1 %2217 }
0x1115   :  { %4365 = vrcp.f32 %v2218_v3  ;;  %v2270_v60 = vand.u32 2147483648, %v2218_v3  ;;  %v2268_v17 = vand.u32 2147483647, %v2218_v3  ;;  %vm2264_vm5 = vweird.f32 %v2218_v3 }
0x1117   :  { %v2271_v59 = vor.u32 1.1754944e-38, %v2270_v60  ;;  %vm2269_vm7 = vcmp.eq.f32.partialorder %v2268_v17, 8.507059e+37 }
0x111b   :  { %v4366_v4 = vpop.eup %4365 }
0x111c   :  { %v2260_v9 = vmul.f32 %v4366_v4, %v2218_v3  ;;  %v2221_v11 = vpop.xlane.xlu2 %2220  ;;  %vm2265_vm4 = vweird.f32 %v4366_v4 }
0x111d   :  { %4367 = vrcp.f32 %v2221_v11  ;;  %vm2266_vm6 = vmor %vm2264_vm5, %vm2265_vm4  ;;  %v2285_v8 = vand.u32 2147483648, %v2221_v11  ;;  %v2283_v48 = vand.u32 2147483647, %v2221_v11  ;;  %vm2279_vm12 = vweird.f32 %v2221_v11 }
0x111e   :  { %v2261_v12 = vsub.f32 1.0, %v2260_v9 }
0x111f   :  { %v2286_v26 = vor.u32 1.1754944e-38, %v2285_v8  ;;  %vm2284_vm14 = vcmp.eq.f32.partialorder %v2283_v48, 8.507059e+37 }
0x1120   :  { %v2262_v16 = vmul.f32 %v4366_v4, %v2261_v12 }
0x1122   :  { %v2263_v20 = vadd.f32 %v4366_v4, %v2262_v16 }
0x1123   :  { %v4368_v6 = vpop.eup %4367  ;;  %v2253_v27 = vpop.f32.mrf.mxu3 }
0x1124   :  { %v2275_v19 = vmul.f32 %v4368_v6, %v2221_v11  ;;  %v2267_v21 = vsel %vm2266_vm6, %v4366_v4, %v2263_v20  ;;  %vm2280_vm11 = vweird.f32 %v4368_v6  ;;  %v2617_v35 = vpop.permute.xlu2 %2616 }
0x1125   :  { %v2272_v22 = vsel %vm2269_vm7, %v2271_v59, %v2267_v21  ;;  %vm2281_vm13 = vmor %vm2279_vm12, %vm2280_vm11 }
0x1126   :  { %v2276_v7 = vsub.f32 1.0, %v2275_v19  ;;  %v2273_v24 = vmul.f32 %v2272_v22, %v2253_v27 }
0x1128   :  { %4089 = vmatmul.msk.f32.vlgmr.msra.gmra.mxu3 %vm257_vm8, %v2273_v24  ;;  %v2277_v25 = vmul.f32 %v4368_v6, %v2276_v7 }
0x112a   :  { %v2278_v54 = vadd.f32 %v4368_v6, %v2277_v25 }
0x112b   :  { %v2256_v0 = vpop.f32.mrf.mxu3 }
0x112c   :  { %v2282_v15 = vsel %vm2281_vm13, %v4368_v6, %v2278_v54  ;;  %v2460_v28 = vpop.permute.xlu1 %2459 }
0x112d   :  { %v2287_v37 = vsel %vm2284_vm14, %v2286_v26, %v2282_v15  ;;  %4093 = vmatmul.msk.f32.vlgmr.msrb.gmra.mxu2 %vm257_vm8, %v2460_v28 }
0x112e   :  { %v2288_v29 = vmul.f32 %v2287_v37, %v2256_v0  ;;  %v2160_v0 = vld [vmem:[#allocation2 + $0x18] sm:$0xff]  ;;  %v2159_v37 = vld [vmem:[#allocation2 + $0x10] sm:$0xff] }
0x112f   :  { %2421 = vmatpush.msrb.mxu1 %v2160_v0 }
0x1130   :  { %v2314_v2 = vpop.f32.mrf.mxu2  ;;  %4090 = vmatmul.msk.f32.gmra.mxu3 %vm257_vm8, %v2288_v29 }
0x1131   :  { %v2320_v30 = vmul.f32 0.25, %v2314_v2  ;;  %2422 = vmatpush.msrb.mxu1 %v2159_v37  ;;  %v2808_v37 = vld [vmem:[%s5976_s15 + $0x38] sm:$0xff] }
0x1133   :  { %v2322_v31 = vsel %vm4763_vm9, %v2320_v30, -3.4028235e+38 }
0x1134   :  { %v2324_v34 = vsel %vm257_vm8, %v2322_v31, -inf  ;;  %v2619_v42 = vpop.permute.xlu1 %2618 }
0x1135   :  { %2325 = vmax.xlane.f32.xlu1 %v2324_v34  ;;  %4094 = vmatmul.msk.f32.gmra.mxu2 %vm257_vm8, %v2462_v33 }
0x1138   :  { %v2317_v36 = vpop.f32.mrf.mxu2  ;;  %4101 = vmatmul.msk.f32.vlgmr.msrb.gmra.mxu3 %vm257_vm8, %v2617_v35 }
0x1139   :  { %v2321_v39 = vmul.f32 0.25, %v2317_v36 }
0x113b   :  { %v2323_v40 = vsel %vm4770_vm10, %v2321_v39, -3.4028235e+38 }
0x113c   :  { %v2327_v41 = vsel %vm257_vm8, %v2323_v40, -inf }
0x113d   :  { %2328 = vmax.xlane.f32.xlu0 %v2327_v41 }
0x1140   :  { %4102 = vmatmul.msk.f32.gmra.mxu3 %vm257_vm8, %v2619_v42 }
0x11a8   :  { %v2326_v43 = vpop.xlane.xlu1 %2325 }
0x11a9   :  { %v2330_v44 = vsub.f32 %v2322_v31, %v2326_v43 }
0x11ab   :  { %v2332_v45 = vmul.f32 1.442695, %v2330_v44  ;;  %v5480_v46 = vpop.f32.mrf.mxu3 }
0x11ad   :  { %4369 = vpow2.f32 %v2332_v45 }
0x11b0   :  { %v2492_v47 = vpop.f32.mrf.mxu2  ;;  %v2329_v49 = vpop.xlane.xlu0 %2328 }
0x11b1   :  { %v2498_v50 = vmul.f32 0.25, %v2492_v47  ;;  %v2331_v51 = vsub.f32 %v2323_v40, %v2329_v49 }
0x11b3   :  { %v4370_v52 = vpop.eup %4369  ;;  %v2334_v53 = vmul.f32 1.442695, %v2331_v51  ;;  %v5482_v55 = vpop.f32.mrf.mxu3  ;;  %v2500_v57 = vsel %vm4763_vm9, %v2498_v50, -3.4028235e+38 }
0x11b4   :  { %4085 = vmatmul.msk.f32.vlgmr.msrb.gmra.mxu0 %vm257_vm8, %v4370_v52  ;;  %v2502_v58 = vsel %vm257_vm8, %v2500_v57, -inf  ;;  %v2336_v21 = vsel %vm257_vm8, %v4370_v52, 0.0 }
0x11b5   :  { %4371 = vpow2.f32 %v2334_v53  ;;  %2503 = vmax.xlane.f32.xlu1 %v2502_v58 }
0x11b8   :  { %v2495_v62 = vpop.f32.mrf.mxu2 }
0x11b9   :  { %v2499_v3 = vmul.f32 0.25, %v2495_v62 }
0x11bb   :  { %v4372_v4 = vpop.eup %4371  ;;  %v2641_v9 = vpop.f32.mrf.mxu3  ;;  %v2501_v11 = vsel %vm4770_vm10, %v2499_v3, -3.4028235e+38 }
0x11bc   :  { %v2647_v12 = vmul.f32 0.25, %v2641_v9  ;;  %4086 = vmatmul.msk.f32.gmra.mxu0 %vm257_vm8, %v4372_v4  ;;  %v2505_v60 = vsel %vm257_vm8, %v2501_v11, -inf  ;;  %v2339_v27 = vsel %vm257_vm8, %v4372_v4, 0.0 }
0x11bd   :  { %2506 = vmax.xlane.f32.xlu1 %v2505_v60 }
0x11be   :  { %v2649_v16 = vsel %vm4763_vm9, %v2647_v12, -3.4028235e+38 }
0x11bf   :  { %v2651_v17 = vsel %vm257_vm8, %v2649_v16, -inf }
0x11c0   :  { %2652 = vmax.xlane.f32.xlu2 %v2651_v17 }
0x11c3   :  { %v2644_v20 = vpop.f32.mrf.mxu3 }
0x11c4   :  { %v2648_v6 = vmul.f32 0.25, %v2644_v20 }
0x11c5   :  { %2340 = vadd.xlane.f32.xlu1 %v2339_v27 }
0x11c6   :  { %v2650_v59 = vsel %vm4770_vm10, %v2648_v6, -3.4028235e+38 }
0x11c7   :  { %v2654_v19 = vsel %vm257_vm8, %v2650_v59, -inf }
0x11c8   :  { %2655 = vmax.xlane.f32.xlu0 %v2654_v19 }
0x11d0   :  { %2337 = vadd.xlane.f32.xlu0 %v2336_v21 }
0x11d8   :  { %4235 = vrot.lane.b32.xlu2 %v5422_v61, %s5999_s27 }
0x1228   :  { %v2504_v22 = vpop.xlane.xlu1 %2503 }
0x1229   :  { %v2508_v7 = vsub.f32 %v2500_v57, %v2504_v22  ;;  %v4461_v22 = vld [vmem:[%s5993_s29] sm:$0xff] }
0x122b   :  { %v2510_v24 = vmul.f32 1.442695, %v2508_v7  ;;  %v2937_v7 = vmul.f32 %v4461_v22, %v5464_v63 }
0x122d   :  { %4373 = vpow2.f32 %v2510_v24  ;;  %v5519_v24 = vpack.i.bf16 %v5464_v63, %v5466_v5  ;;  %v2812_v63 = vld [vmem:[%s5976_s15 + $0x58] sm:$0xff] }
0x1230   :  { %v2507_v8 = vpop.xlane.xlu1 %2506 }
0x1231   :  { %v2509_v25 = vsub.f32 %v2501_v11, %v2507_v8  ;;  %v2365_v4 = vpop.f32.mrf.mxu0  ;;  %v2162_v8 = vld [vmem:[#allocation2 + $0x28] sm:$0xff] }
0x1232   :  { %2605 = vmatpush.msra.mxu1 %v2162_v8 }
0x1233   :  { %v4374_v48 = vpop.eup %4373  ;;  %v2512_v54 = vmul.f32 1.442695, %v2509_v25  ;;  %v2653_v26 = vpop.xlane.xlu2 %2652  ;;  %v2816_v25 = vld [vmem:[%s5976_s15 + $0x78] sm:$0xff] }
0x1234   :  { %v2657_v15 = vsub.f32 %v2649_v16, %v2653_v26  ;;  %v2514_v28 = vsel %vm257_vm8, %v4374_v48, 0.0  ;;  %2870 = vmatpush.msra.mxu3 %v2816_v25  ;;  %v2164_v26 = vld [vmem:[#allocation2 + $0x38] sm:$0xff] }
0x1235   :  { %4375 = vpow2.f32 %v2512_v54  ;;  %2515 = vadd.xlane.f32.xlu0 %v2514_v28  ;;  %v2814_v54 = vld [vmem:[%s5976_s15 + $0x68] sm:$0xff]  ;;  %v2163_v28 = vld [vmem:[#allocation2 + $0x30] sm:$0xff] }
0x1236   :  { %v2659_v29 = vmul.f32 1.442695, %v2657_v15  ;;  %2871 = vmatpush.msra.mxu3 %v2814_v54  ;;  %v2810_v15 = vld [vmem:[%s5976_s15 + $0x48] sm:$0xff] }
0x1238   :  { %4377 = vpow2.f32 %v2659_v29  ;;  %v2341_v61 = vpop.xlane.xlu1 %2340  ;;  %2872 = vmatpush.msra.mxu3 %v2812_v63  ;;  %v2806_v29 = vld [vmem:[%s5976_s15 + $0x28] sm:$0xff] }
0x1239   :  { %4379 = vrcp.f32 %v2341_v61  ;;  %v2397_v60 = vand.u32 2147483648, %v2341_v61  ;;  %vm2391_vm5 = vweird.f32 %v2341_v61  ;;  %v2395_v17 = vand.u32 2147483647, %v2341_v61  ;;  %v2368_v19 = vpop.f32.mrf.mxu0 }
0x123a   :  { %2873 = vmatpush.msra.mxu3 %v2810_v15 }
0x123b   :  { %v4376_v2 = vpop.eup %4375  ;;  %v4236_v30 = vpop.permute.xlu2 %4235  ;;  %v2398_v27 = vor.u32 1.1754944e-38, %v2397_v60  ;;  %vm2396_vm7 = vcmp.eq.f32.partialorder %v2395_v17, 8.507059e+37 }
0x123c   :  { %v2656_v31 = vpop.xlane.xlu0 %2655  ;;  %v4237_v33 = vunpack.i.l.bf16 %v4236_v30  ;;  %v2517_v35 = vsel %vm257_vm8, %v4376_v2, 0.0  ;;  %v4238_v39 = vunpack.i.h.bf16 %v4236_v30  ;;  %2874 = vmatpush.msra.mxu3 %v2808_v37 }
0x123d   :  { %v2658_v34 = vsub.f32 %v2650_v59, %v2656_v31  ;;  %2518 = vadd.xlane.f32.xlu0 %v2517_v35 }
0x123e   :  { %v4378_v36 = vpop.eup %4377  ;;  %2546 = vmatpush.msra.mxu0 %v4237_v33  ;;  %2689 = vmatpush.msra.mxu2 %v4237_v33 }
0x123f   :  { %v2661_v40 = vmul.f32 1.442695, %v2658_v34  ;;  %v2663_v41 = vsel %vm257_vm8, %v4378_v36, 0.0  ;;  %v4380_v43 = vpop.eup %4379  ;;  %2875 = vmatpush.msra.mxu3 %v2806_v29 }
0x1240   :  { %2547 = vmatpush.msra.mxu0 %v4238_v39  ;;  %2690 = vmatpush.msra.mxu2 %v4238_v39  ;;  %v2387_v45 = vmul.f32 %v4380_v43, %v2341_v61  ;;  %vm2392_vm3 = vweird.f32 %v4380_v43  ;;  %v2804_v61 = vld [vmem:[%s5976_s15 + $0x18] sm:$0xff] }
0x1241   :  { %4381 = vpow2.f32 %v2661_v40  ;;  %2664 = vadd.xlane.f32.xlu1 %v2663_v41  ;;  %4095 = vmatmul.msk.f32.vlgmr.msra.gmra.mxu0 %vm257_vm8, %v4374_v48  ;;  %vm2393_vm6 = vmor %vm2391_vm5, %vm2392_vm3  ;;  %v2161_v48 = vld [vmem:[#allocation2 + $0x20] sm:$0xff] }
0x1242   :  { %4103 = vmatmul.msk.f32.vlgmr.msra.gmra.mxu2 %vm257_vm8, %v4378_v36  ;;  %v2388_v50 = vsub.f32 1.0, %v2387_v45  ;;  %2606 = vmatpush.msra.mxu1 %v2161_v48 }
0x1243   :  { %2748 = vmatpush.msrb.mxu0 %v2164_v26  ;;  %2876 = vmatpush.msra.mxu3 %v2804_v61 }
0x1244   :  { %v2338_v42 = vpop.xlane.xlu0 %2337  ;;  %v2389_v57 = vmul.f32 %v4380_v43, %v2388_v50 }
0x1245   :  { %4383 = vrcp.f32 %v2338_v42  ;;  %v2382_v53 = vand.u32 2147483648, %v2338_v42  ;;  %v2380_v62 = vand.u32 2147483647, %v2338_v42  ;;  %vm2376_vm1 = vweird.f32 %v2338_v42  ;;  %2749 = vmatpush.msrb.mxu0 %v2163_v28 }
0x1246   :  { %v2390_v11 = vadd.f32 %v4380_v43, %v2389_v57 }
0x1247   :  { %v4382_v44 = vpop.eup %4381  ;;  %v2383_v9 = vor.u32 1.1754944e-38, %v2382_v53  ;;  %vm2381_vm4 = vcmp.eq.f32.partialorder %v2380_v62, 8.507059e+37 }
0x1248   :  { %v2666_v47 = vsel %vm257_vm8, %v4382_v44, 0.0  ;;  %v2394_v6 = vsel %vm2393_vm6, %v4380_v43, %v2390_v11 }
0x1249   :  { %2667 = vadd.xlane.f32.xlu2 %v2666_v47  ;;  %4096 = vmatmul.msk.f32.gmra.mxu0 %vm257_vm8, %v4376_v2  ;;  %v2399_v59 = vsel %vm2396_vm7, %v2398_v27, %v2394_v6  ;;  %v2802_v2 = vld [vmem:[%s5976_s15 + $0x8] sm:$0xff] }
0x124a   :  { %4104 = vmatmul.msk.f32.gmra.mxu2 %vm257_vm8, %v4382_v44  ;;  %v2400_v21 = vmul.f32 %v2399_v59, %v2368_v19  ;;  %2877 = vmatpush.msra.mxu3 %v2802_v2 }
0x124b   :  { %v4384_v49 = vpop.eup %4383 }
0x124c   :  { %v2372_v51 = vmul.f32 %v4384_v49, %v2338_v42  ;;  %vm2377_vm15 = vweird.f32 %v4384_v49 }
0x124d   :  { %vm2378_vm2 = vmor %vm2376_vm1, %vm2377_vm15 }
0x124e   :  { %v2373_v52 = vsub.f32 1.0, %v2372_v51 }
0x1250   :  { %v2374_v58 = vmul.f32 %v4384_v49, %v2373_v52 }
0x1252   :  { %v2375_v3 = vadd.f32 %v4384_v49, %v2374_v58 }
0x1254   :  { %v2379_v12 = vsel %vm2378_vm2, %v4384_v49, %v2375_v3 }
0x1255   :  { %v2384_v16 = vsel %vm2381_vm4, %v2383_v9, %v2379_v12 }
0x1256   :  { %v2385_v20 = vmul.f32 %v2384_v16, %v2365_v4 }
0x1258   :  { %4087 = vmatmul.msk.f32.vlgmr.msrb.gmra.mxu1 %vm257_vm8, %v2385_v20 }
0x1260   :  { %4088 = vmatmul.msk.f32.gmra.mxu1 %vm257_vm8, %v2400_v21 }
0x1261   :  { %2941 = vrot.lane.b32.xlu2 %v2937_v7, %s4523_s2 }
0x1269   :  { %4240 = vrot.lane.b32.xlu2 %v5519_v24, %s4523_s2 }
0x12a8   :  { %v2516_v0 = vpop.xlane.xlu0 %2515 }
0x12a9   :  { %4385 = vrcp.f32 %v2516_v0  ;;  %v2566_v42 = vand.u32 2147483648, %v2516_v0  ;;  %vm2560_vm12 = vweird.f32 %v2516_v0  ;;  %v2564_v43 = vand.u32 2147483647, %v2516_v0 }
0x12ab   :  { %v2567_v51 = vor.u32 1.1754944e-38, %v2566_v42  ;;  %vm2565_vm14 = vcmp.eq.f32.partialorder %v2564_v43, 8.507059e+37 }
0x12af   :  { %v4386_v30 = vpop.eup %4385 }
0x12b0   :  { %v2556_v31 = vmul.f32 %v4386_v30, %v2516_v0  ;;  %v2519_v33 = vpop.xlane.xlu0 %2518  ;;  %vm2561_vm11 = vweird.f32 %v4386_v30 }
0x12b1   :  { %4387 = vrcp.f32 %v2519_v33  ;;  %vm2562_vm13 = vmor %vm2560_vm12, %vm2561_vm11  ;;  %v2581_v12 = vand.u32 2147483648, %v2519_v33  ;;  %vm2575_vm2 = vweird.f32 %v2519_v33  ;;  %v2579_v60 = vand.u32 2147483647, %v2519_v33 }
0x12b2   :  { %v2557_v34 = vsub.f32 1.0, %v2556_v31 }
0x12b3   :  { %v2582_v22 = vor.u32 1.1754944e-38, %v2581_v12  ;;  %vm2580_vm7 = vcmp.eq.f32.partialorder %v2579_v60, 8.507059e+37  ;;  %v2801_v12 = vld [vmem:[%s5976_s15] sm:$0xff] }
0x12b4   :  { %v2665_v35 = vpop.xlane.xlu1 %2664  ;;  %v2558_v36 = vmul.f32 %v4386_v30, %v2557_v34 }
0x12b5   :  { %4389 = vrcp.f32 %v2665_v35  ;;  %v2709_v3 = vand.u32 2147483648, %v2665_v35  ;;  %v2707_v11 = vand.u32 2147483647, %v2665_v35  ;;  %vm2703_vm3 = vweird.f32 %v2665_v35 }
0x12b6   :  { %v2559_v40 = vadd.f32 %v4386_v30, %v2558_v36 }
0x12b7   :  { %v4388_v39 = vpop.eup %4387  ;;  %v2710_v59 = vor.u32 1.1754944e-38, %v2709_v3  ;;  %vm2708_vm6 = vcmp.eq.f32.partialorder %v2707_v11, 8.507059e+37  ;;  %v2809_v3 = vld [vmem:[%s5976_s15 + $0x40] sm:$0xff]  ;;  %v2803_v11 = vld [vmem:[%s5976_s15 + $0x10] sm:$0xff] }
0x12b8   :  { %v2571_v41 = vmul.f32 %v4388_v39, %v2519_v33  ;;  %v2563_v49 = vsel %vm2562_vm13, %v4386_v30, %v2559_v40  ;;  %vm2576_vm15 = vweird.f32 %v4388_v39 }
0x12b9   :  { %v2568_v58 = vsel %vm2565_vm14, %v2567_v51, %v2563_v49  ;;  %vm5548_vm4 = vmor %vm2575_vm2, %vm2576_vm15 }
0x12ba   :  { %v2572_v44 = vsub.f32 1.0, %v2571_v41 }
0x12bb   :  { %v4390_v45 = vpop.eup %4389 }
0x12bc   :  { %v2668_v47 = vpop.xlane.xlu2 %2667  ;;  %v2699_v50 = vmul.f32 %v4390_v45, %v2665_v35  ;;  %v2573_v52 = vmul.f32 %v4388_v39, %v2572_v44  ;;  %vm2704_vm1 = vweird.f32 %v4390_v45 }
0x12bd   :  { %4391 = vrcp.f32 %v2668_v47  ;;  %vm2705_vm5 = vmor %vm2703_vm3, %vm2704_vm1  ;;  %v2724_v26 = vand.u32 2147483648, %v2668_v47  ;;  %v2722_v0 = vand.u32 2147483647, %v2668_v47  ;;  %vm2718_vm12 = vweird.f32 %v2668_v47 }
0x12be   :  { %v2700_v53 = vsub.f32 1.0, %v2699_v50  ;;  %v2549_v57 = vpop.f32.mrf.mxu0  ;;  %v2574_v4 = vadd.f32 %v4388_v39, %v2573_v52 }
0x12bf   :  { %v2569_v62 = vmul.f32 %v2568_v58, %v2549_v57  ;;  %v2725_v29 = vor.u32 1.1754944e-38, %v2724_v26  ;;  %vm2723_vm14 = vcmp.eq.f32.partialorder %v2722_v0, 8.507059e+37 }
0x12c0   :  { %v2701_v9 = vmul.f32 %v4390_v45, %v2700_v53  ;;  %v2578_v19 = vsel %vm5548_vm4, %v4388_v39, %v2574_v4  ;;  %v2807_v4 = vld [vmem:[%s5976_s15 + $0x30] sm:$0xff] }
0x12c1   :  { %4097 = vmatmul.msk.f32.vlgmr.msra.gmra.mxu1 %vm257_vm8, %v2569_v62  ;;  %v2583_v63 = vsel %vm2580_vm7, %v2582_v22, %v2578_v19  ;;  %v2813_v62 = vld [vmem:[%s5976_s15 + $0x60] sm:$0xff] }
0x12c2   :  { %v2702_v17 = vadd.f32 %v4390_v45, %v2701_v9  ;;  %v2805_v9 = vld [vmem:[%s5976_s15 + $0x20] sm:$0xff] }
0x12c3   :  { %v4392_v16 = vpop.eup %4391 }
0x12c4   :  { %v2714_v6 = vmul.f32 %v4392_v16, %v2668_v47  ;;  %v5552_v27 = vpop.permute.xlu2 %2941  ;;  %v2706_v21 = vsel %vm2705_vm5, %v4390_v45, %v2702_v17  ;;  %vm2719_vm11 = vweird.f32 %v4392_v16 }
0x12c5   :  { %v2692_v8 = vpop.f32.mrf.mxu2  ;;  %v2711_v25 = vsel %vm2708_vm6, %v2710_v59, %v2706_v21  ;;  %vm2720_vm13 = vmor %vm2718_vm12, %vm2719_vm11 }
0x12c6   :  { %v2715_v7 = vsub.f32 1.0, %v2714_v6  ;;  %v2712_v48 = vmul.f32 %v2711_v25, %v2692_v8  ;;  %v2552_v54 = vpop.f32.mrf.mxu0 }
0x12c7   :  { %v2584_v15 = vmul.f32 %v2583_v63, %v2552_v54  ;;  %v4255_v63 = vld [vmem:[%s5975_s14] ss:$0 sm:$0xff] }
0x12c8   :  { %v2716_v28 = vmul.f32 %v4392_v16, %v2715_v7  ;;  %4105 = vmatmul.msk.f32.vlgmr.msrb.gmra.mxu0 %vm257_vm8, %v2712_v48 }
0x12c9   :  { %4098 = vmatmul.msk.f32.gmra.mxu1 %vm257_vm8, %v2584_v15 }
0x12ca   :  { %v2717_v37 = vadd.f32 %v4392_v16, %v2716_v28 }
0x12cc   :  { %v5558_v61 = vpop.permute.xlu2 %4240  ;;  %v2721_v2 = vsel %vm2720_vm13, %v4392_v16, %v2717_v37 }
0x12cd   :  { %v4242_v30 = vunpack.i.l.bf16 %v5558_v61  ;;  %v2726_v31 = vsel %vm2723_vm14, %v2725_v29, %v2721_v2  ;;  %v2695_v33 = vpop.f32.mrf.mxu2  ;;  %v4243_v34 = vunpack.i.h.bf16 %v5558_v61 }
0x12ce   :  { %v2727_v35 = vmul.f32 %v2726_v31, %v2695_v33 }
0x12cf   :  { %3163 = vmatpush.msrb.mxu3 %v4242_v30 }
0x12d0   :  { %4106 = vmatmul.msk.f32.gmra.mxu0 %vm257_vm8, %v2727_v35 }
0x12d1   :  { %3164 = vmatpush.msrb.mxu3 %v4243_v34 }
0x12d5   :  { %v2424_v36 = vpop.f32.mrf.mxu1 }
0x12d6   :  { %v2454_v41 = vadd.f32 %v5480_v46, %v2424_v36  ;;  %v2832_v36 = vld [vmem:[%s5977_s16 + $0x78] sm:$0xff] }
0x12d7   :  { %2949 = vmatpush.msrb.mxu2 %v2832_v36 }
0x12dd   :  { %v2427_v39 = vpop.f32.mrf.mxu1 }
0x12de   :  { %v2457_v49 = vadd.f32 %v5482_v55, %v2427_v39  ;;  %v2815_v55 = vld [vmem:[%s5976_s15 + $0x70] sm:$0xff] }
0x12df   :  { %2847 = vmatpush.msrb.mxu1 %v2815_v55  ;;  %v2831_v39 = vld [vmem:[%s5977_s16 + $0x70] sm:$0xff]  ;;  %v2817_v55 = vld [vmem:[%s5977_s16] sm:$0xff] }
0x12e0   :  { %2950 = vmatpush.msrb.mxu2 %v2831_v39 }
0x12e1   :  { %2848 = vmatpush.msrb.mxu1 %v2813_v62 }
0x133e   :  { %v2608_v40 = vpop.f32.mrf.mxu1 }
0x133f   :  { %v2614_v42 = vadd.f32 %v2608_v40, %v2454_v41  ;;  %v2830_v40 = vld [vmem:[%s5977_s16 + $0x68] sm:$0xff]  ;;  %v2829_v41 = vld [vmem:[%s5977_s16 + $0x60] sm:$0xff] }
0x1340   :  { %2951 = vmatpush.msrb.mxu2 %v2830_v40 }
0x1342   :  { %2952 = vmatpush.msrb.mxu2 %v2829_v41 }
0x1345   :  { %v2751_v43 = vpop.f32.mrf.mxu0 }
0x1346   :  { %v2757_v44 = vadd.f32 %v2751_v43, %v2614_v42  ;;  %v2611_v47 = vpop.f32.mrf.mxu1  ;;  %v2828_v42 = vld [vmem:[%s5977_s16 + $0x58] sm:$0xff]  ;;  %v2827_v43 = vld [vmem:[%s5977_s16 + $0x50] sm:$0xff] }
0x1347   :  { %v2615_v51 = vadd.f32 %v2611_v47, %v2457_v49  ;;  %2953 = vmatpush.msrb.mxu2 %v2828_v42  ;;  %v2825_v47 = vld [vmem:[%s5977_s16 + $0x40] sm:$0xff]  ;;  %v2824_v49 = vld [vmem:[%s5977_s16 + $0x38] sm:$0xff] }
0x1348   :  { %v5569_v45 = vadd.f32 %v2757_v44, %v5307_v10  ;;  %v2826_v44 = vld [vmem:[%s5977_s16 + $0x48] sm:$0xff] }
0x1349   :  { %2954 = vmatpush.msrb.mxu2 %v2827_v43 }
0x134a   :  { %v2762_v50 = vmul.f32 %v5569_v45, %v5569_v45 }
0x134b   :  { %2955 = vmatpush.msrb.mxu2 %v2826_v44 }
0x134c   :  { %v2764_v52 = vsel %vm94_vm0, %v2762_v50, 0.0  ;;  %v2823_v50 = vld [vmem:[%s5977_s16 + $0x30] sm:$0xff] }
0x134d   :  { %v2754_v53 = vpop.f32.mrf.mxu0  ;;  %2765 = vadd.xlane.f32.xlu1 %v2764_v52  ;;  %2956 = vmatpush.msrb.mxu2 %v2825_v47  ;;  %v2821_v52 = vld [vmem:[%s5977_s16 + $0x20] sm:$0xff] }
0x134e   :  { %v2758_v57 = vadd.f32 %v2754_v53, %v2615_v51  ;;  %v2822_v51 = vld [vmem:[%s5977_s16 + $0x28] sm:$0xff]  ;;  %v2820_v53 = vld [vmem:[%s5977_s16 + $0x18] sm:$0xff] }
0x134f   :  { %2957 = vmatpush.msrb.mxu2 %v2824_v49 }
0x1350   :  { %v5576_v46 = vadd.f32 %v2758_v57, %v5313_v14  ;;  %v2811_v14 = vld [vmem:[%s5976_s15 + $0x50] sm:$0xff] }
0x1351   :  { %2849 = vmatpush.msrb.mxu1 %v2811_v14  ;;  %2958 = vmatpush.msrb.mxu2 %v2823_v50  ;;  %v2819_v57 = vld [vmem:[%s5977_s16 + $0x10] sm:$0xff]  ;;  %v4463_v50 = vld [vmem:[%s5993_s29 + $0x8] sm:$0xff] }
0x1352   :  { %v2763_v58 = vmul.f32 %v5576_v46, %v5576_v46 }
0x1353   :  { %2850 = vmatpush.msrb.mxu1 %v2809_v3  ;;  %2959 = vmatpush.msrb.mxu2 %v2822_v51  ;;  %v5691_v51 = vld [vmem:[%s5994_s0] sm:$0xff] }
0x1354   :  { %v2767_v10 = vsel %vm94_vm0, %v2763_v58, 0.0  ;;  %v2818_v58 = vld [vmem:[%s5977_s16 + $0x8] sm:$0xff] }
0x1355   :  { %2768 = vadd.xlane.f32.xlu0 %v2767_v10  ;;  %2851 = vmatpush.msrb.mxu1 %v2807_v4 }
0x1356   :  { %2960 = vmatpush.msrb.mxu2 %v2821_v52  ;;  %v4121_v52 = vld [vmem:[%s5973_s12 + $0x78] sm:$0xff] }
0x1357   :  { %2852 = vmatpush.msrb.mxu1 %v2805_v9  ;;  %3036 = vmatpush.msra.mxu0 %v4121_v52 }
0x1358   :  { %2961 = vmatpush.msrb.mxu2 %v2820_v53  ;;  %v4120_v53 = vld [vmem:[%s5973_s12 + $0x70] sm:$0xff] }
0x1359   :  { %2853 = vmatpush.msrb.mxu1 %v2803_v11  ;;  %3037 = vmatpush.msra.mxu0 %v4120_v53 }
0x135a   :  { %2962 = vmatpush.msrb.mxu2 %v2819_v57  ;;  %v4118_v57 = vld [vmem:[%s5973_s12 + $0x60] sm:$0xff] }
0x135b   :  { %2854 = vmatpush.msrb.mxu1 %v2801_v12 }
0x135c   :  { %2963 = vmatpush.msrb.mxu2 %v2818_v58  ;;  %v4117_v58 = vld [vmem:[%s5973_s12 + $0x58] sm:$0xff] }
0x135e   :  { %2964 = vmatpush.msrb.mxu2 %v2817_v55  ;;  %v4115_v55 = vld [vmem:[%s5973_s12 + $0x48] sm:$0xff] }
0x13c0   :  { %v2766_v60 = vpop.xlane.xlu1 %2765 }
0x13c1   :  { %v2770_v16 = vmul.f32 %v2766_v60, %v4679_v23 }
0x13c3   :  { %v2772_v17 = vadd.f32 1e-06, %v2770_v16 }
0x13c5   :  { %4393 = vrsqrt.f32 %v2772_v17  ;;  %vm2780_vm1 = vweird.f32 %v2772_v17 }
0x13c8   :  { %v2769_v20 = vpop.xlane.xlu0 %2768 }
0x13c9   :  { %v2771_v6 = vmul.f32 %v2769_v20, %v4679_v23 }
0x13cb   :  { %v4394_v59 = vpop.eup %4393  ;;  %v2773_v19 = vadd.f32 1e-06, %v2771_v6 }
0x13cc   :  { %v2775_v21 = vmul.f32 %v4394_v59, %v2772_v17  ;;  %vm2781_vm15 = vweird.f32 %v4394_v59 }
0x13cd   :  { %4395 = vrsqrt.f32 %v2773_v19  ;;  %vm2782_vm2 = vmor %vm2780_vm1, %vm2781_vm15  ;;  %vm2790_vm4 = vweird.f32 %v2773_v19 }
0x13ce   :  { %v2776_v22 = vmul.f32 %v4394_v59, %v2775_v21 }
0x13d0   :  { %v2777_v7 = vmul.f32 0.5, %v2776_v22 }
0x13d2   :  { %v2778_v8 = vsub.f32 1.5, %v2777_v7 }
0x13d3   :  { %v4396_v25 = vpop.eup %4395 }
0x13d4   :  { %v2779_v48 = vmul.f32 %v4394_v59, %v2778_v8  ;;  %v2785_v54 = vmul.f32 %v4396_v25, %v2773_v19  ;;  %vm2791_vm3 = vweird.f32 %v4396_v25 }
0x13d5   :  { %vm2792_vm5 = vmor %vm2790_vm4, %vm2791_vm3 }
0x13d6   :  { %v2783_v26 = vsel %vm2782_vm2, %v4394_v59, %v2779_v48  ;;  %v2786_v15 = vmul.f32 %v4396_v25, %v2785_v54 }
0x13d7   :  { %v2794_v28 = vmul.f32 %v2783_v26, %v5569_v45 }
0x13d8   :  { %v2787_v0 = vmul.f32 0.5, %v2786_v15 }
0x13d9   :  { %v2799_v37 = vmul.f32 %v4255_v63, %v2794_v28 }
0x13da   :  { %v2788_v29 = vsub.f32 1.5, %v2787_v0 }
0x13db   :  { %4107 = vmatmul.msk.f32.vlgmr.msrb.gmra.mxu1 %vm94_vm0, %v2799_v37  ;;  %4109 = vmatmul.msk.f32.vlgmr.msra.gmra.mxu3 %vm94_vm0, %v2799_v37 }
0x13dc   :  { %v2789_v2 = vmul.f32 %v4396_v25, %v2788_v29 }
0x13de   :  { %v2793_v31 = vsel %vm2792_vm5, %v4396_v25, %v2789_v2 }
0x13df   :  { %v2795_v33 = vmul.f32 %v2793_v31, %v5576_v46 }
0x13e1   :  { %v2800_v35 = vmul.f32 %v4255_v63, %v2795_v33 }
0x13e3   :  { %4108 = vmatmul.msk.f32.gmra.mxu1 %vm94_vm0, %v2800_v35  ;;  %4110 = vmatmul.msk.f32.gmra.mxu3 %vm94_vm0, %v2800_v35 }
0x1458   :  { %v2856_v10 = vpop.f32.mrf.mxu1 }
0x1459   :  { %v4111_v62 = vmul.f32 -1.442695, %v2856_v10 }
0x145b   :  { %4397 = vpow2.f32 %v4111_v62  ;;  %v4114_v62 = vld [vmem:[%s5973_s12 + $0x40] sm:$0xff] }
0x145e   :  { %v2879_v48 = vpop.f32.mrf.mxu3 }
0x1460   :  { %v2859_v14 = vpop.f32.mrf.mxu1 }
0x1461   :  { %v4398_v3 = vpop.eup %4397  ;;  %v4112_v4 = vmul.f32 -1.442695, %v2859_v14 }
0x1462   :  { %v2891_v9 = vadd.f32 1.0, %v4398_v3 }
0x1463   :  { %4399 = vpow2.f32 %v4112_v4 }
0x1464   :  { %4401 = vrcp.f32 %v2891_v9  ;;  %v2904_v20 = vand.u32 2147483648, %v2891_v9  ;;  %v2902_v59 = vand.u32 2147483647, %v2891_v9  ;;  %vm2898_vm7 = vweird.f32 %v2891_v9 }
0x1466   :  { %v2905_v22 = vor.u32 1.1754944e-38, %v2904_v20  ;;  %vm2903_vm12 = vcmp.eq.f32.partialorder %v2902_v59, 8.507059e+37  ;;  %v2882_v35 = vpop.f32.mrf.mxu3 }
0x1469   :  { %v4400_v11 = vpop.eup %4399 }
0x146a   :  { %v4402_v12 = vpop.eup %4401  ;;  %v2892_v60 = vadd.f32 1.0, %v4400_v11 }
0x146b   :  { %v2894_v16 = vmul.f32 %v4402_v12, %v2891_v9  ;;  %vm2899_vm6 = vweird.f32 %v4402_v12 }
0x146c   :  { %4403 = vrcp.f32 %v2892_v60  ;;  %vm2900_vm11 = vmor %vm2898_vm7, %vm2899_vm6  ;;  %v2919_v26 = vand.u32 2147483648, %v2892_v60  ;;  %v2917_v0 = vand.u32 2147483647, %v2892_v60  ;;  %vm2913_vm14 = vweird.f32 %v2892_v60 }
0x146d   :  { %v2895_v17 = vsub.f32 1.0, %v2894_v16 }
0x146e   :  { %v2920_v29 = vor.u32 1.1754944e-38, %v2919_v26  ;;  %vm2918_vm1 = vcmp.eq.f32.partialorder %v2917_v0, 8.507059e+37 }
0x146f   :  { %v2896_v6 = vmul.f32 %v4402_v12, %v2895_v17 }
0x1471   :  { %v2897_v19 = vadd.f32 %v4402_v12, %v2896_v6 }
0x1472   :  { %v4404_v21 = vpop.eup %4403 }
0x1473   :  { %v2901_v7 = vsel %vm2900_vm11, %v4402_v12, %v2897_v19  ;;  %v2909_v8 = vmul.f32 %v4404_v21, %v2892_v60  ;;  %vm2914_vm13 = vweird.f32 %v4404_v21 }
0x1474   :  { %v2906_v25 = vsel %vm2903_vm12, %v2905_v22, %v2901_v7  ;;  %vm2915_vm15 = vmor %vm2913_vm14, %vm2914_vm13  ;;  %v4256_v22 = vld [vmem:[%s5972_s11 + $0x1] ss:$0 sm:$0xff]  ;;  %s6002_s11 = smov 32  }
0x1475   :  { %v2923_v54 = vmul.f32 %v2906_v25, %v2856_v10  ;;  %v2910_v63 = vsub.f32 1.0, %v2909_v8  ;;  %v4116_v10 = vld [vmem:[%s5973_s12 + $0x50] sm:$0xff] }
0x1477   :  { %v2925_v15 = vmul.f32 %v2923_v54, %v2879_v48  ;;  %v2911_v28 = vmul.f32 %v4404_v21, %v2910_v63 }
0x1479   :  { %v2912_v37 = vadd.f32 %v4404_v21, %v2911_v28  ;;  %2965 = vmatmul.f32.vlgmr.msrb.gmra.mxu2 %v2925_v15 }
0x147b   :  { %v2916_v2 = vsel %vm2915_vm15, %v4404_v21, %v2912_v37 }
0x147c   :  { %v2921_v31 = vsel %vm2918_vm1, %v2920_v29, %v2916_v2 }
0x147d   :  { %v2924_v33 = vmul.f32 %v2921_v31, %v2859_v14 }
0x147f   :  { %v2926_v36 = vmul.f32 %v2924_v33, %v2882_v35 }
0x1481   :  { %2968 = vmatmul.f32.gmra.mxu2 %v2926_v36 }
0x14fc   :  { %v2966_v39 = vpop.f32.mrf.mxu2 }
0x14fd   :  { %v5665_v40 = vadd.f32 %v2966_v39, %v5569_v45  ;;  %v5679_v45 = vld [vmem:[%s5994_s0 + $0x8] sm:$0xff]  ;;  %s3912_s0 = sshll.u32 %s4528_s28, 4  ;;  %s3913_s0 = int_to_ptr.vmem [resolvable:$true] %s3912_s0 }
0x14ff   :  { %v2974_v41 = vmul.f32 %v5665_v40, %v5665_v40 }
0x1501   :  { %v2976_v42 = vsel %vm94_vm0, %v2974_v41, 0.0 }
0x1502   :  { %2977 = vadd.xlane.f32.xlu1 %v2976_v42 }
0x1504   :  { %v2969_v43 = vpop.f32.mrf.mxu2 }
0x1505   :  { %v5671_v44 = vadd.f32 %v2969_v43, %v5576_v46  ;;  %v2938_v46 = vmul.f32 %v4463_v50, %v5466_v5  ;;  %v4119_v5 = vld [vmem:[%s5973_s12 + $0x68] sm:$0xff] }
0x1506   :  { %3038 = vmatpush.msra.mxu0 %v4119_v5 }
0x1507   :  { %v2975_v47 = vmul.f32 %v5671_v44, %v5671_v44 }
0x1508   :  { %3039 = vmatpush.msra.mxu0 %v4118_v57 }
0x1509   :  { %v2979_v49 = vsel %vm94_vm0, %v2975_v47, 0.0 }
0x150a   :  { %2980 = vadd.xlane.f32.xlu0 %v2979_v49  ;;  %3040 = vmatpush.msra.mxu0 %v4117_v58 }
0x150c   :  { %3041 = vmatpush.msra.mxu0 %v4116_v10 }
0x150e   :  { %3042 = vmatpush.msra.mxu0 %v4115_v55 }
0x1510   :  { %3043 = vmatpush.msra.mxu0 %v4114_v62 }
0x151b   :  { %2931 = vrot.lane.b32.xlu1 %v5679_v45, %s4523_s2 }
0x151e   :  { %2943 = vrot.lane.b32.xlu0 %v2938_v46, %s4523_s2 }
0x1526   :  { %2929 = vrot.lane.b32.xlu0 %v5691_v51, %s4523_s2 }
0x1575   :  { %v2978_v14 = vpop.xlane.xlu1 %2977 }
0x1576   :  { %v2982_v3 = vmul.f32 %v2978_v14, %v4679_v23 }
0x1578   :  { %v2984_v4 = vadd.f32 1e-06, %v2982_v3 }
0x157a   :  { %4405 = vrsqrt.f32 %v2984_v4  ;;  %vm2992_vm3 = vweird.f32 %v2984_v4 }
0x157d   :  { %v2981_v9 = vpop.xlane.xlu0 %2980 }
0x157e   :  { %v2983_v11 = vmul.f32 %v2981_v9, %v4679_v23 }
0x1580   :  { %v4406_v12 = vpop.eup %4405  ;;  %v2985_v60 = vadd.f32 1e-06, %v2983_v11 }
0x1581   :  { %v2987_v16 = vmul.f32 %v4406_v12, %v2984_v4  ;;  %vm2993_vm2 = vweird.f32 %v4406_v12 }
0x1582   :  { %4407 = vrsqrt.f32 %v2985_v60  ;;  %vm2994_vm4 = vmor %vm2992_vm3, %vm2993_vm2  ;;  %vm3002_vm6 = vweird.f32 %v2985_v60 }
0x1583   :  { %v2988_v17 = vmul.f32 %v4406_v12, %v2987_v16  ;;  %v3066_v16 = vld [vmem:[#allocation2 + $0x40] sm:$0xff] }
0x1585   :  { %v2989_v20 = vmul.f32 0.5, %v2988_v17 }
0x1587   :  { %v2990_v6 = vsub.f32 1.5, %v2989_v20 }
0x1588   :  { %v4408_v59 = vpop.eup %4407 }
0x1589   :  { %v2991_v19 = vmul.f32 %v4406_v12, %v2990_v6  ;;  %v2997_v21 = vmul.f32 %v4408_v59, %v2985_v60  ;;  %vm3003_vm5 = vweird.f32 %v4408_v59  ;;  %v3067_v60 = vld [vmem:[#allocation2 + $0x48] sm:$0xff] }
0x158a   :  { %vm3004_vm7 = vmor %vm3002_vm6, %vm3003_vm5  ;;  %3363 = vmatpush.msra.mxu2 %v3067_v60 }
0x158b   :  { %v2995_v7 = vsel %vm2994_vm4, %v4406_v12, %v2991_v19  ;;  %v2998_v8 = vmul.f32 %v4408_v59, %v2997_v21 }
0x158c   :  { %v3006_v25 = vmul.f32 %v2995_v7, %v5665_v40  ;;  %3364 = vmatpush.msra.mxu2 %v3066_v16 }
0x158d   :  { %v2999_v48 = vmul.f32 0.5, %v2998_v8  ;;  %v2932_v54 = vpop.permute.xlu1 %2931 }
0x158e   :  { %v3011_v63 = vmul.f32 %v4256_v22, %v3006_v25  ;;  %v2936_v26 = vmul.f32 %v2932_v54, %v5411_v18 }
0x158f   :  { %v3000_v15 = vsub.f32 1.5, %v2999_v48 }
0x1590   :  { %4122 = vmatmul.msk.f32.vlgmr.msra.gmra.mxu0 %vm94_vm0, %v3011_v63  ;;  %v2944_v28 = vpop.permute.xlu0 %2943 }
0x1591   :  { %v3001_v0 = vmul.f32 %v4408_v59, %v3000_v15  ;;  %v5727_v37 = vadd.f32 %v2944_v28, %v2936_v26 }
0x1593   :  { %v3005_v29 = vsel %vm3004_vm7, %v4408_v59, %v3001_v0  ;;  %3078 = vrot.lane.b32.xlu1 %v5727_v37, %s6002_s11 }
0x1594   :  { %v3007_v2 = vmul.f32 %v3005_v29, %v5671_v44 }
0x1596   :  { %v3012_v31 = vmul.f32 %v4256_v22, %v3007_v2 }
0x1598   :  { %4123 = vmatmul.msk.f32.gmra.mxu0 %vm94_vm0, %v3012_v31  ;;  %v2930_v18 = vpop.permute.xlu0 %2929 }
0x1599   :  { %v2935_v33 = vmul.f32 %v2930_v18, %v5406_v13 }
0x159b   :  { %v2947_v35 = vadd.f32 %v5552_v27, %v2935_v33 }
0x159d   :  { %3076 = vrot.lane.b32.xlu0 %v2947_v35, %s6002_s11 }
0x1605   :  { %v3079_v36 = vpop.permute.xlu1 %3078 }
0x1606   :  { %4124 = vmatpush.xpose.msk.msra.mxu1 %vm257_vm8, %v3079_v36  ;;  %4130 = vmatpush.xpose.msk.msrb.mxu0 %vm257_vm8, %v3079_v36 }
0x160d   :  { %v3045_v39 = vpop.f32.mrf.mxu0 }
0x160e   :  { %v3053_v41 = vmul.f32 %v3045_v39, %v4717_v56  ;;  %v3051_v56 = vmul.f32 %v5691_v51, %v3045_v39 }
0x160f   :  { %v3077_v42 = vpop.permute.xlu0 %3076 }
0x1610   :  { %3057 = vrot.lane.b32.xlu1 %v3053_v41, %s4522_s21  ;;  %4125 = vmatpush.xpose.msk.msra.mxu1 %vm257_vm8, %v3077_v42 }
0x1611   :  { %4131 = vmatpush.xpose.msk.msrb.mxu0 %vm257_vm8, %v3077_v42 }
0x1614   :  { %3275 = vmatpush.msrb.mxu1 %v4242_v30 }
0x1615   :  { %v3048_v13 = vpop.f32.mrf.mxu0 }
0x1616   :  { %3276 = vmatpush.msrb.mxu1 %v4243_v34  ;;  %v3054_v27 = vmul.f32 %v3048_v13, %v4727_v1  ;;  %v3052_v49 = vmul.f32 %v5679_v45, %v3048_v13 }
0x1618   :  { %3059 = vrot.lane.b32.xlu0 %v3054_v27, %s4522_s21  ;;  %s4527_s21 = smov 16  }
0x1682   :  { %v3058_v43 = vpop.permute.xlu1 %3057 }
0x1683   :  { %v3063_v47 = vadd.f32 %v3058_v43, %v3051_v56 }
0x1685   :  { %4126 = vmatmul.msk.f32.vlgmr.msra.gmra.mxu1 %vm257_vm8, %v3063_v47 }
0x168a   :  { %v3060_v50 = vpop.permute.xlu0 %3059 }
0x168b   :  { %v3064_v46 = vadd.f32 %v3060_v50, %v3052_v49 }
0x168d   :  { %4127 = vmatmul.msk.f32.gmra.mxu1 %vm257_vm8, %v3064_v46 }
0x1702   :  { %v3107_v30 = vpop.f32.mrf.mxu1 }
0x1703   :  { %v3113_v61 = vmul.f32 0.25, %v3107_v30 }
0x1705   :  { %v3115_v34 = vsel %vm4763_vm9, %v3113_v61, -3.4028235e+38 }
0x1706   :  { %v3117_v1 = vsel %vm257_vm8, %v3115_v34, -inf }
0x1707   :  { %3118 = vmax.xlane.f32.xlu1 %v3117_v1 }
0x170a   :  { %v3110_v52 = vpop.f32.mrf.mxu1 }
0x170b   :  { %v3114_v51 = vmul.f32 0.25, %v3110_v52 }
0x170d   :  { %v3116_v53 = vsel %vm4770_vm10, %v3114_v51, -3.4028235e+38 }
0x170e   :  { %v3120_v5 = vsel %vm257_vm8, %v3116_v53, -inf }
0x170f   :  { %3121 = vmax.xlane.f32.xlu0 %v3120_v5 }
0x1720   :  { %3204 = vrot.lane.b32.xlu1 %v3064_v46, %s4524_s13 }
0x1723   :  { %3202 = vrot.lane.b32.xlu0 %v3063_v47, %s4524_s13 }
0x172b   :  { %3376 = vrot.lane.b32.xlu0 %v2947_v35, %s4527_s21 }
0x1733   :  { %3372 = vrot.lane.b32.xlu0 %v3063_v47, %s4523_s2 }
0x173b   :  { %3531 = vrot.lane.b32.xlu0 %v3064_v46, %s4525_s23 }
0x177a   :  { %v3119_v45 = vpop.xlane.xlu1 %3118 }
0x177b   :  { %v3123_v57 = vsub.f32 %v3115_v34, %v3119_v45 }
0x177d   :  { %v3125_v58 = vmul.f32 1.442695, %v3123_v57 }
0x177f   :  { %4409 = vpow2.f32 %v3125_v58 }
0x1782   :  { %v3122_v10 = vpop.xlane.xlu0 %3121 }
0x1783   :  { %v3124_v55 = vsub.f32 %v3116_v53, %v3122_v10 }
0x1785   :  { %v4410_v62 = vpop.eup %4409  ;;  %v3127_v14 = vmul.f32 1.442695, %v3124_v55 }
0x1786   :  { %4128 = vmatmul.msk.f32.vlgmr.msrb.gmra.mxu3 %vm257_vm8, %v4410_v62  ;;  %v3129_v3 = vsel %vm257_vm8, %v4410_v62, 0.0 }
0x1787   :  { %4411 = vpow2.f32 %v3127_v14  ;;  %3130 = vadd.xlane.f32.xlu2 %v3129_v3 }
0x178d   :  { %v4412_v4 = vpop.eup %4411 }
0x178e   :  { %4129 = vmatmul.msk.f32.gmra.mxu3 %vm257_vm8, %v4412_v4  ;;  %v3132_v9 = vsel %vm257_vm8, %v4412_v4, 0.0 }
0x178f   :  { %3133 = vadd.xlane.f32.xlu1 %v3132_v9 }
0x1792   :  { %v3205_v12 = vpop.permute.xlu1 %3204 }
0x1795   :  { %v3203_v11 = vpop.permute.xlu0 %3202 }
0x1796   :  { %4132 = vmatmul.msk.f32.vlgmr.msrb.gmra.mxu0 %vm257_vm8, %v3203_v11 }
0x179d   :  { %v3377_v20 = vpop.permute.xlu0 %3376 }
0x179e   :  { %4133 = vmatmul.msk.f32.gmra.mxu0 %vm257_vm8, %v3205_v12 }
0x179f   :  { %3378 = vrot.lane.b32.xlu2 %v5727_v37, %s4527_s21 }
0x17a5   :  { %v3373_v63 = vpop.permute.xlu0 %3372 }
0x17a7   :  { %3374 = vrot.lane.b32.xlu2 %v3064_v46, %s4523_s2 }
0x17a8   :  { %3529 = vrot.lane.b32.xlu1 %v3063_v47, %s4525_s23 }
0x17ad   :  { %v3532_v1 = vpop.permute.xlu0 %3531 }
0x17fa   :  { %v3131_v17 = vpop.xlane.xlu2 %3130 }
0x17fb   :  { %4413 = vrcp.f32 %v3131_v17  ;;  %v3183_v7 = vand.u32 2147483648, %v3131_v17  ;;  %v3181_v25 = vand.u32 2147483647, %v3131_v17  ;;  %vm3177_vm12 = vweird.f32 %v3131_v17 }
0x17fd   :  { %v3184_v15 = vor.u32 1.1754944e-38, %v3183_v7  ;;  %vm3182_vm14 = vcmp.eq.f32.partialorder %v3181_v25, 8.507059e+37 }
0x1801   :  { %v4414_v6 = vpop.eup %4413 }
0x1802   :  { %v3173_v59 = vmul.f32 %v4414_v6, %v3131_v17  ;;  %v3379_v19 = vpop.permute.xlu2 %3378  ;;  %v3134_v21 = vpop.xlane.xlu1 %3133  ;;  %vm3178_vm11 = vweird.f32 %v4414_v6 }
0x1803   :  { %4415 = vrcp.f32 %v3134_v21  ;;  %4140 = vmatpush.xpose.msk.msra.mxu0 %vm257_vm8, %v3379_v19  ;;  %4148 = vmatpush.xpose.msk.msrb.mxu2 %vm257_vm8, %v3379_v19  ;;  %vm3179_vm13 = vmor %vm3177_vm12, %vm3178_vm11  ;;  %v3198_v31 = vand.u32 2147483648, %v3134_v21  ;;  %v3196_v33 = vand.u32 2147483647, %v3134_v21  ;;  %vm3192_vm1 = vweird.f32 %v3134_v21 }
0x1804   :  { %v3174_v22 = vsub.f32 1.0, %v3173_v59 }
0x1805   :  { %v3199_v39 = vor.u32 1.1754944e-38, %v3198_v31  ;;  %vm3197_vm3 = vcmp.eq.f32.partialorder %v3196_v33, 8.507059e+37  ;;  %v3068_v31 = vld [vmem:[#allocation2 + $0x50] sm:$0xff] }
0x1806   :  { %v3175_v8 = vmul.f32 %v4414_v6, %v3174_v22 }
0x1807   :  { %4141 = vmatpush.xpose.msk.msra.mxu0 %vm257_vm8, %v3377_v20  ;;  %4149 = vmatpush.xpose.msk.msrb.mxu2 %vm257_vm8, %v3377_v20 }
0x1808   :  { %v3176_v48 = vadd.f32 %v4414_v6, %v3175_v8 }
0x1809   :  { %v4416_v54 = vpop.eup %4415  ;;  %v3166_v26 = vpop.f32.mrf.mxu3 }
0x180a   :  { %v3188_v28 = vmul.f32 %v4416_v54, %v3134_v21  ;;  %v3180_v0 = vsel %vm3179_vm13, %v4414_v6, %v3176_v48  ;;  %4142 = vmatmul.msk.f32.vlgmr.msra.gmra.mxu0 %vm257_vm8, %v3373_v63  ;;  %vm3193_vm15 = vweird.f32 %v4416_v54  ;;  %v3375_v36 = vpop.permute.xlu2 %3374 }
0x180b   :  { %v3185_v37 = vsel %vm3182_vm14, %v3184_v15, %v3180_v0  ;;  %vm3194_vm2 = vmor %vm3192_vm1, %vm3193_vm15 }
0x180c   :  { %v3189_v29 = vsub.f32 1.0, %v3188_v28  ;;  %v3186_v2 = vmul.f32 %v3185_v37, %v3166_v26  ;;  %v3069_v37 = vld [vmem:[#allocation2 + $0x58] sm:$0xff] }
0x180d   :  { %3334 = vmatpush.msra.mxu3 %v3069_v37 }
0x180e   :  { %4138 = vmatmul.msk.f32.vlgmr.msra.gmra.mxu2 %vm257_vm8, %v3186_v2  ;;  %v3190_v18 = vmul.f32 %v4416_v54, %v3189_v29 }
0x180f   :  { %3335 = vmatpush.msra.mxu3 %v3068_v31 }
0x1810   :  { %v3191_v35 = vadd.f32 %v4416_v54, %v3190_v18 }
0x1811   :  { %v3169_v42 = vpop.f32.mrf.mxu3 }
0x1812   :  { %v3195_v41 = vsel %vm3194_vm2, %v4416_v54, %v3191_v35  ;;  %4143 = vmatmul.msk.f32.gmra.mxu0 %vm257_vm8, %v3375_v36 }
0x1813   :  { %v3200_v13 = vsel %vm3197_vm3, %v3199_v39, %v3195_v41  ;;  %v3227_v27 = vpop.f32.mrf.mxu0 }
0x1814   :  { %v3201_v56 = vmul.f32 %v3200_v13, %v3169_v42  ;;  %v3233_v43 = vmul.f32 0.25, %v3227_v27 }
0x1816   :  { %4139 = vmatmul.msk.f32.gmra.mxu2 %vm257_vm8, %v3201_v56  ;;  %v3235_v47 = vsel %vm4763_vm9, %v3233_v43, -3.4028235e+38 }
0x1817   :  { %v3237_v49 = vsel %vm257_vm8, %v3235_v47, -inf }
0x1818   :  { %3238 = vmax.xlane.f32.xlu1 %v3237_v49 }
0x181a   :  { %v3530_v30 = vpop.permute.xlu1 %3529 }
0x181b   :  { %v3230_v50 = vpop.f32.mrf.mxu0 }
0x181c   :  { %v3234_v46 = vmul.f32 0.25, %v3230_v50 }
0x181e   :  { %4150 = vmatmul.msk.f32.vlgmr.msrb.gmra.mxu2 %vm257_vm8, %v3530_v30  ;;  %v3236_v61 = vsel %vm4770_vm10, %v3234_v46, -3.4028235e+38 }
0x181f   :  { %v3240_v34 = vsel %vm257_vm8, %v3236_v61, -inf }
0x1820   :  { %3241 = vmax.xlane.f32.xlu2 %v3240_v34 }
0x1826   :  { %4151 = vmatmul.msk.f32.gmra.mxu2 %vm257_vm8, %v3532_v1 }
0x1887   :  { %v3405_v52 = vpop.f32.mrf.mxu0 }
0x1888   :  { %v3411_v51 = vmul.f32 0.25, %v3405_v52 }
0x188a   :  { %v3413_v53 = vsel %vm4763_vm9, %v3411_v51, -3.4028235e+38 }
0x188b   :  { %v3239_v5 = vpop.xlane.xlu1 %3238  ;;  %v3415_v45 = vsel %vm257_vm8, %v3413_v53, -inf }
0x188c   :  { %v3243_v57 = vsub.f32 %v3235_v47, %v3239_v5  ;;  %3416 = vmax.xlane.f32.xlu0 %v3415_v45 }
0x188e   :  { %v3245_v58 = vmul.f32 1.442695, %v3243_v57 }
0x188f   :  { %v3408_v10 = vpop.f32.mrf.mxu0 }
0x1890   :  { %4417 = vpow2.f32 %v3245_v58  ;;  %v3412_v55 = vmul.f32 0.25, %v3408_v10 }
0x1891   :  { %v5790_v62 = vpop.f32.mrf.mxu2 }
0x1892   :  { %v3414_v14 = vsel %vm4770_vm10, %v3412_v55, -3.4028235e+38 }
0x1893   :  { %v3242_v3 = vpop.xlane.xlu2 %3241  ;;  %v3418_v4 = vsel %vm257_vm8, %v3414_v14, -inf }
0x1894   :  { %v3244_v9 = vsub.f32 %v3236_v61, %v3242_v3  ;;  %3419 = vmax.xlane.f32.xlu1 %v3418_v4 }
0x1896   :  { %v4418_v11 = vpop.eup %4417  ;;  %v3247_v12 = vmul.f32 1.442695, %v3244_v9 }
0x1897   :  { %4134 = vmatmul.msk.f32.vlgmr.msrb.gmra.mxu1 %vm257_vm8, %v4418_v11  ;;  %v3249_v7 = vsel %vm257_vm8, %v4418_v11, 0.0 }
0x1898   :  { %4419 = vpow2.f32 %v3247_v12 }
0x1899   :  { %v5796_v60 = vpop.f32.mrf.mxu2 }
0x189e   :  { %v4420_v16 = vpop.eup %4419 }
0x189f   :  { %4135 = vmatmul.msk.f32.gmra.mxu1 %vm257_vm8, %v4420_v16 }
0x18a0   :  { %4245 = vrot.lane.b32.xlu0 %v5519_v24, %s4525_s23  ;;  %v3252_v24 = vsel %vm257_vm8, %v4420_v16, 0.0 }
0x18a1   :  { %v3554_v17 = vpop.f32.mrf.mxu2 }
0x18a2   :  { %v3560_v20 = vmul.f32 0.25, %v3554_v17 }
0x18a4   :  { %v3562_v6 = vsel %vm4763_vm9, %v3560_v20, -3.4028235e+38 }
0x18a5   :  { %v3564_v59 = vsel %vm257_vm8, %v3562_v6, -inf }
0x18a6   :  { %3565 = vmax.xlane.f32.xlu2 %v3564_v59  ;;  %v3070_v59 = vld [vmem:[#allocation2 + $0x60] sm:$0xff] }
0x18a9   :  { %v3557_v19 = vpop.f32.mrf.mxu2 }
0x18aa   :  { %v3561_v21 = vmul.f32 0.25, %v3557_v19 }
0x18ac   :  { %v3563_v22 = vsel %vm4770_vm10, %v3561_v21, -3.4028235e+38 }
0x18ad   :  { %v3567_v8 = vsel %vm257_vm8, %v3563_v22, -inf }
0x18ae   :  { %3250 = vadd.xlane.f32.xlu2 %v3249_v7  ;;  %3568 = vmax.xlane.f32.xlu1 %v3567_v8 }
0x18b6   :  { %3253 = vadd.xlane.f32.xlu1 %v3252_v24 }
0x18ff   :  { %v3417_v25 = vpop.xlane.xlu0 %3416 }
0x1900   :  { %v3421_v32 = vsub.f32 %v3413_v53, %v3417_v25  ;;  %v3073_v25 = vld [vmem:[#allocation2 + $0x78] sm:$0xff] }
0x1902   :  { %v3423_v48 = vmul.f32 1.442695, %v3421_v32  ;;  %v3072_v32 = vld [vmem:[#allocation2 + $0x70] sm:$0xff] }
0x1904   :  { %4421 = vpow2.f32 %v3423_v48 }
0x1907   :  { %v3420_v54 = vpop.xlane.xlu1 %3419 }
0x1908   :  { %v3422_v63 = vsub.f32 %v3414_v14, %v3420_v54 }
0x190a   :  { %v4422_v26 = vpop.eup %4421  ;;  %v3425_v15 = vmul.f32 1.442695, %v3422_v63 }
0x190b   :  { %v3427_v38 = vsel %vm257_vm8, %v4422_v26, 0.0 }
0x190c   :  { %4423 = vpow2.f32 %v3425_v15  ;;  %3428 = vadd.xlane.f32.xlu2 %v3427_v38 }
0x1912   :  { %v4424_v28 = vpop.eup %4423  ;;  %v4246_v0 = vpop.permute.xlu0 %4245 }
0x1913   :  { %v4247_v29 = vunpack.i.l.bf16 %v4246_v0  ;;  %v3430_v2 = vsel %vm257_vm8, %v4424_v28, 0.0  ;;  %v4248_v18 = vunpack.i.h.bf16 %v4246_v0 }
0x1914   :  { %3431 = vadd.xlane.f32.xlu1 %v3430_v2  ;;  %v3278_v53 = vpop.f32.mrf.mxu1 }
0x1915   :  { %3459 = vmatpush.msra.mxu1 %v4247_v29  ;;  %3602 = vmatpush.msrb.mxu0 %v4247_v29 }
0x1917   :  { %3460 = vmatpush.msra.mxu1 %v4248_v18  ;;  %3603 = vmatpush.msrb.mxu0 %v4248_v18 }
0x1918   :  { %4144 = vmatmul.msk.f32.vlgmr.msra.gmra.mxu1 %vm257_vm8, %v4422_v26 }
0x1919   :  { %v3566_v33 = vpop.xlane.xlu2 %3565  ;;  %3661 = vmatpush.msrb.mxu1 %v3073_v25 }
0x191a   :  { %v3570_v35 = vsub.f32 %v3562_v6, %v3566_v33  ;;  %v3071_v6 = vld [vmem:[#allocation2 + $0x68] sm:$0xff] }
0x191b   :  { %3518 = vmatpush.msrb.mxu3 %v3071_v6  ;;  %3662 = vmatpush.msrb.mxu1 %v3072_v32 }
0x191c   :  { %v3572_v36 = vmul.f32 1.442695, %v3570_v35  ;;  %v3281_v16 = vpop.f32.mrf.mxu1 }
0x191d   :  { %3519 = vmatpush.msrb.mxu3 %v3070_v59 }
0x191e   :  { %4425 = vpow2.f32 %v3572_v36 }
0x1920   :  { %4145 = vmatmul.msk.f32.gmra.mxu1 %vm257_vm8, %v4424_v28 }
0x1921   :  { %v3251_v39 = vpop.xlane.xlu2 %3250  ;;  %v3569_v41 = vpop.xlane.xlu1 %3568 }
0x1922   :  { %4427 = vrcp.f32 %v3251_v39  ;;  %v3571_v42 = vsub.f32 %v3563_v22, %v3569_v41  ;;  %v3295_v46 = vand.u32 2147483648, %v3251_v39  ;;  %v3293_v34 = vand.u32 2147483647, %v3251_v39 }
0x1923   :  { %vm3289_vm10 = vweird.f32 %v3251_v39 }
0x1924   :  { %v4426_v13 = vpop.eup %4425  ;;  %v3574_v27 = vmul.f32 1.442695, %v3571_v42  ;;  %v3296_v5 = vor.u32 1.1754944e-38, %v3295_v46  ;;  %vm3294_vm5 = vcmp.eq.f32.partialorder %v3293_v34, 8.507059e+37 }
0x1925   :  { %4152 = vmatmul.msk.f32.vlgmr.msrb.gmra.mxu0 %vm257_vm8, %v4426_v13  ;;  %v3576_v56 = vsel %vm257_vm8, %v4426_v13, 0.0 }
0x1926   :  { %3577 = vadd.xlane.f32.xlu2 %v3576_v56  ;;  %4429 = vpow2.f32 %v3574_v27 }
0x1928   :  { %v4428_v43 = vpop.eup %4427 }
0x1929   :  { %v3285_v47 = vmul.f32 %v4428_v43, %v3251_v39  ;;  %v3254_v49 = vpop.xlane.xlu1 %3253  ;;  %vm3290_vm9 = vweird.f32 %v4428_v43 }
0x192a   :  { %4431 = vrcp.f32 %v3254_v49  ;;  %vm3291_vm4 = vmor %vm3289_vm10, %vm3290_vm9  ;;  %v3310_v14 = vand.u32 2147483648, %v3254_v49  ;;  %v3308_v4 = vand.u32 2147483647, %v3254_v49  ;;  %vm3304_vm7 = vweird.f32 %v3254_v49 }
0x192b   :  { %v3286_v50 = vsub.f32 1.0, %v3285_v47 }
0x192c   :  { %v4430_v30 = vpop.eup %4429  ;;  %v3311_v11 = vor.u32 1.1754944e-38, %v3310_v14  ;;  %vm3309_vm12 = vcmp.eq.f32.partialorder %v3308_v4, 8.507059e+37 }
0x192d   :  { %v3287_v61 = vmul.f32 %v4428_v43, %v3286_v50  ;;  %4153 = vmatmul.msk.f32.gmra.mxu0 %vm257_vm8, %v4430_v30  ;;  %v3579_v1 = vsel %vm257_vm8, %v4430_v30, 0.0 }
0x192e   :  { %3580 = vadd.xlane.f32.xlu0 %v3579_v1 }
0x192f   :  { %v3288_v52 = vadd.f32 %v4428_v43, %v3287_v61 }
0x1930   :  { %v4432_v51 = vpop.eup %4431 }
0x1931   :  { %v3292_v45 = vsel %vm3291_vm4, %v4428_v43, %v3288_v52  ;;  %v3300_v57 = vmul.f32 %v4432_v51, %v3254_v49  ;;  %vm3305_vm6 = vweird.f32 %v4432_v51 }
0x1932   :  { %v3297_v58 = vsel %vm3294_vm5, %v3296_v5, %v3292_v45  ;;  %vm3306_vm11 = vmor %vm3304_vm7, %vm3305_vm6 }
0x1933   :  { %v3298_v10 = vmul.f32 %v3297_v58, %v3278_v53  ;;  %v3301_v55 = vsub.f32 1.0, %v3300_v57 }
0x1935   :  { %v3302_v3 = vmul.f32 %v4432_v51, %v3301_v55  ;;  %4136 = vmatmul.msk.f32.vlgmr.msra.gmra.mxu3 %vm257_vm8, %v3298_v10 }
0x1937   :  { %v3303_v9 = vadd.f32 %v4432_v51, %v3302_v3 }
0x1939   :  { %v3307_v12 = vsel %vm3306_vm11, %v4432_v51, %v3303_v9 }
0x193a   :  { %v3312_v17 = vsel %vm3309_vm12, %v3311_v11, %v3307_v12 }
0x193b   :  { %v3313_v20 = vmul.f32 %v3312_v17, %v3281_v16 }
0x193d   :  { %4137 = vmatmul.msk.f32.gmra.mxu3 %vm257_vm8, %v3313_v20 }
0x197f   :  { %v3429_v19 = vpop.xlane.xlu2 %3428 }
0x1980   :  { %4433 = vrcp.f32 %v3429_v19  ;;  %v3479_v26 = vand.u32 2147483648, %v3429_v19  ;;  %vm3473_vm14 = vweird.f32 %v3429_v19  ;;  %v3477_v15 = vand.u32 2147483647, %v3429_v19 }
0x1982   :  { %v3480_v0 = vor.u32 1.1754944e-38, %v3479_v26  ;;  %vm3478_vm1 = vcmp.eq.f32.partialorder %v3477_v15, 8.507059e+37  ;;  %v4171_v26 = vld [vmem:[%s5976_s15 + $0xf0] sm:$0xff]  ;;  %v4170_v15 = vld [vmem:[%s5976_s15 + $0xe8] sm:$0xff] }
0x1983   :  { %3763 = vmatpush.msra.mxu3 %v4171_v26 }
0x1986   :  { %v4434_v21 = vpop.eup %4433 }
0x1987   :  { %v3469_v22 = vmul.f32 %v4434_v21, %v3429_v19  ;;  %v3432_v7 = vpop.xlane.xlu1 %3431  ;;  %vm3474_vm13 = vweird.f32 %v4434_v21 }
0x1988   :  { %4435 = vrcp.f32 %v3432_v7  ;;  %vm3475_vm15 = vmor %vm3473_vm14, %vm3474_vm13  ;;  %v3494_v33 = vand.u32 2147483648, %v3432_v7  ;;  %vm3488_vm3 = vweird.f32 %v3432_v7  ;;  %v3492_v35 = vand.u32 2147483647, %v3432_v7 }
0x1989   :  { %v3470_v8 = vsub.f32 1.0, %v3469_v22 }
0x198a   :  { %v3495_v41 = vor.u32 1.1754944e-38, %v3494_v33  ;;  %vm3493_vm10 = vcmp.eq.f32.partialorder %v3492_v35, 8.507059e+37  ;;  %v4159_v33 = vld [vmem:[%s5976_s15 + $0x90] sm:$0xff]  ;;  %v4160_v35 = vld [vmem:[%s5976_s15 + $0x98] sm:$0xff] }
0x198b   :  { %v3471_v24 = vmul.f32 %v4434_v21, %v3470_v8 }
0x198d   :  { %v3472_v54 = vadd.f32 %v4434_v21, %v3471_v24 }
0x198e   :  { %v4436_v48 = vpop.eup %4435 }
0x198f   :  { %v3484_v63 = vmul.f32 %v4436_v48, %v3432_v7  ;;  %v3476_v28 = vsel %vm3475_vm15, %v4434_v21, %v3472_v54  ;;  %vm3489_vm2 = vweird.f32 %v4436_v48 }
0x1990   :  { %v3481_v2 = vsel %vm3478_vm1, %v3480_v0, %v3476_v28  ;;  %vm3490_vm9 = vmor %vm3488_vm3, %vm3489_vm2  ;;  %v4168_v28 = vld [vmem:[%s5976_s15 + $0xd8] sm:$0xff]  ;;  %v4165_v0 = vld [vmem:[%s5976_s15 + $0xc0] sm:$0xff] }
0x1991   :  { %v3485_v38 = vsub.f32 1.0, %v3484_v63 }
0x1993   :  { %v3486_v37 = vmul.f32 %v4436_v48, %v3485_v38  ;;  %v4167_v38 = vld [vmem:[%s5976_s15 + $0xd0] sm:$0xff] }
0x1995   :  { %v3462_v29 = vpop.f32.mrf.mxu1  ;;  %v3487_v18 = vadd.f32 %v4436_v48, %v3486_v37  ;;  %v4166_v37 = vld [vmem:[%s5976_s15 + $0xc8] sm:$0xff] }
0x1996   :  { %v3482_v31 = vmul.f32 %v3481_v2, %v3462_v29  ;;  %v4163_v29 = vld [vmem:[%s5976_s15 + $0xb0] sm:$0xff]  ;;  %v4164_v2 = vld [vmem:[%s5976_s15 + $0xb8] sm:$0xff] }
0x1997   :  { %v3491_v39 = vsel %vm3490_vm9, %v4436_v48, %v3487_v18  ;;  %v4162_v18 = vld [vmem:[%s5976_s15 + $0xa8] sm:$0xff] }
0x1998   :  { %4146 = vmatmul.msk.f32.vlgmr.msrb.gmra.mxu3 %vm257_vm8, %v3482_v31  ;;  %v3496_v13 = vsel %vm3493_vm10, %v3495_v41, %v3491_v39  ;;  %v4161_v31 = vld [vmem:[%s5976_s15 + $0xa0] sm:$0xff]  ;;  %v4158_v39 = vld [vmem:[%s5976_s15 + $0x88] sm:$0xff] }
0x1999   :  { %v3578_v36 = vpop.xlane.xlu2 %3577 }
0x199a   :  { %4437 = vrcp.f32 %v3578_v36  ;;  %v3622_v50 = vand.u32 2147483648, %v3578_v36  ;;  %v3620_v30 = vand.u32 2147483647, %v3578_v36  ;;  %vm3616_vm5 = vweird.f32 %v3578_v36 }
0x199c   :  { %v3623_v34 = vor.u32 1.1754944e-38, %v3622_v50  ;;  %vm3621_vm7 = vcmp.eq.f32.partialorder %v3620_v30, 8.507059e+37 }
0x199d   :  { %v3465_v42 = vpop.f32.mrf.mxu1 }
0x199e   :  { %v3497_v27 = vmul.f32 %v3496_v13, %v3465_v42 }
0x19a0   :  { %v4438_v56 = vpop.eup %4437  ;;  %4147 = vmatmul.msk.f32.gmra.mxu3 %vm257_vm8, %v3497_v27 }
0x19a1   :  { %v3612_v43 = vmul.f32 %v4438_v56, %v3578_v36  ;;  %v3581_v47 = vpop.xlane.xlu0 %3580  ;;  %vm3617_vm4 = vweird.f32 %v4438_v56  ;;  %v4157_v36 = vld [vmem:[%s5976_s15 + $0x80] sm:$0xff] }
0x19a2   :  { %4439 = vrcp.f32 %v3581_v47  ;;  %vm3618_vm6 = vmor %vm3616_vm5, %vm3617_vm4  ;;  %v3605_v52 = vpop.f32.mrf.mxu0  ;;  %v3637_v58 = vand.u32 2147483648, %v3581_v47  ;;  %v3635_v55 = vand.u32 2147483647, %v3581_v47  ;;  %vm3631_vm12 = vweird.f32 %v3581_v47 }
0x19a3   :  { %v3613_v49 = vsub.f32 1.0, %v3612_v43 }
0x19a4   :  { %v3638_v3 = vor.u32 1.1754944e-38, %v3637_v58  ;;  %vm3636_vm14 = vcmp.eq.f32.partialorder %v3635_v55, 8.507059e+37 }
0x19a5   :  { %v3614_v46 = vmul.f32 %v4438_v56, %v3613_v49 }
0x19a7   :  { %v3615_v61 = vadd.f32 %v4438_v56, %v3614_v46 }
0x19a8   :  { %v4440_v1 = vpop.eup %4439 }
0x19a9   :  { %v3619_v51 = vsel %vm3618_vm6, %v4438_v56, %v3615_v61  ;;  %v3627_v53 = vmul.f32 %v4440_v1, %v3581_v47  ;;  %vm3632_vm11 = vweird.f32 %v4440_v1 }
0x19aa   :  { %v3624_v5 = vsel %vm3621_vm7, %v3623_v34, %v3619_v51  ;;  %vm3633_vm13 = vmor %vm3631_vm12, %vm3632_vm11  ;;  %v3608_v9 = vpop.f32.mrf.mxu0 }
0x19ab   :  { %v3625_v45 = vmul.f32 %v3624_v5, %v3605_v52  ;;  %v3628_v57 = vsub.f32 1.0, %v3627_v53 }
0x19ad   :  { %4154 = vmatmul.msk.f32.vlgmr.msrb.gmra.mxu1 %vm257_vm8, %v3625_v45  ;;  %v3629_v10 = vmul.f32 %v4440_v1, %v3628_v57 }
0x19af   :  { %v3630_v14 = vadd.f32 %v4440_v1, %v3629_v10 }
0x19b1   :  { %v3634_v4 = vsel %vm3633_vm13, %v4440_v1, %v3630_v14  ;;  %v4257_v1 = vld [vmem:[%s5975_s14 + $0x1] ss:$0 sm:$0xff] }
0x19b2   :  { %v3639_v11 = vsel %vm3636_vm14, %v3638_v3, %v3634_v4  ;;  %v4188_v4 = vld [vmem:[%s5977_s16 + $0xf8] sm:$0xff] }
0x19b3   :  { %v3640_v12 = vmul.f32 %v3639_v11, %v3608_v9  ;;  %3843 = vmatpush.msra.mxu0 %v4188_v4  ;;  %v4187_v9 = vld [vmem:[%s5977_s16 + $0xf0] sm:$0xff]  ;;  %v4186_v11 = vld [vmem:[%s5977_s16 + $0xe8] sm:$0xff] }
0x19b5   :  { %4155 = vmatmul.msk.f32.gmra.mxu1 %vm257_vm8, %v3640_v12  ;;  %3844 = vmatpush.msra.mxu0 %v4187_v9  ;;  %v4185_v12 = vld [vmem:[%s5977_s16 + $0xe0] sm:$0xff] }
0x19b7   :  { %3845 = vmatpush.msra.mxu0 %v4186_v11 }
0x19b8   :  { %v3337_v16 = vpop.f32.mrf.mxu3 }
0x19b9   :  { %v3367_v6 = vadd.f32 %v5790_v62, %v3337_v16  ;;  %3846 = vmatpush.msra.mxu0 %v4185_v12  ;;  %v4184_v16 = vld [vmem:[%s5977_s16 + $0xd8] sm:$0xff] }
0x19bb   :  { %3847 = vmatpush.msra.mxu0 %v4184_v16 }
0x19c0   :  { %v3340_v17 = vpop.f32.mrf.mxu3 }
0x19c1   :  { %v3370_v24 = vadd.f32 %v5796_v60, %v3340_v17  ;;  %v4172_v60 = vld [vmem:[%s5976_s15 + $0xf8] sm:$0xff]  ;;  %v4183_v17 = vld [vmem:[%s5977_s16 + $0xd0] sm:$0xff] }
0x19c2   :  { %3786 = vmatpush.msra.mxu2 %v4172_v60  ;;  %3848 = vmatpush.msra.mxu0 %v4183_v17 }
0x19c4   :  { %3787 = vmatpush.msra.mxu2 %v4170_v15 }
0x19c6   :  { %3788 = vmatpush.msra.mxu2 %v4168_v28 }
0x19c8   :  { %3789 = vmatpush.msra.mxu2 %v4166_v37 }
0x19ca   :  { %3790 = vmatpush.msra.mxu2 %v4164_v2 }
0x19cc   :  { %3791 = vmatpush.msra.mxu2 %v4162_v18 }
0x19ce   :  { %3792 = vmatpush.msra.mxu2 %v4160_v35 }
0x19d0   :  { %3793 = vmatpush.msra.mxu2 %v4158_v39 }
0x1a1b   :  { %v3521_v20 = vpop.f32.mrf.mxu3 }
0x1a1c   :  { %v3527_v59 = vadd.f32 %v3521_v20, %v3367_v6  ;;  %v4182_v20 = vld [vmem:[%s5977_s16 + $0xc8] sm:$0xff]  ;;  %v4181_v6 = vld [vmem:[%s5977_s16 + $0xc0] sm:$0xff] }
0x1a1d   :  { %3849 = vmatpush.msra.mxu0 %v4182_v20 }
0x1a1f   :  { %3850 = vmatpush.msra.mxu0 %v4181_v6 }
0x1a23   :  { %v3524_v7 = vpop.f32.mrf.mxu3 }
0x1a24   :  { %v3528_v32 = vadd.f32 %v3524_v7, %v3370_v24  ;;  %v4177_v7 = vld [vmem:[%s5977_s16 + $0xa0] sm:$0xff]  ;;  %v4175_v24 = vld [vmem:[%s5977_s16 + $0x90] sm:$0xff] }
0x1a2a   :  { %v3664_v19 = vpop.f32.mrf.mxu1 }
0x1a2b   :  { %v3670_v21 = vadd.f32 %v3664_v19, %v3527_v59  ;;  %v4180_v59 = vld [vmem:[%s5977_s16 + $0xb8] sm:$0xff]  ;;  %v4179_v19 = vld [vmem:[%s5977_s16 + $0xb0] sm:$0xff] }
0x1a2c   :  { %3851 = vmatpush.msra.mxu0 %v4180_v59  ;;  %v4258_v59 = vld [vmem:[%s5978_s17] ss:$0 sm:$0xff]  ;;  %s3914_s17 = sshll.u32 %s5979_s18, 4  ;;  %s3915_s17 = int_to_ptr.hbm [resolvable:$true] %s3914_s17 }
0x1a2d   :  { %v5825_v22 = vadd.f32 %v3670_v21, %v5665_v40  ;;  %v4178_v21 = vld [vmem:[%s5977_s16 + $0xa8] sm:$0xff] }
0x1a2e   :  { %3852 = vmatpush.msra.mxu0 %v4179_v19 }
0x1a2f   :  { %v3676_v8 = vmul.f32 %v5825_v22, %v5825_v22 }
0x1a30   :  { %3853 = vmatpush.msra.mxu0 %v4178_v21 }
0x1a31   :  { %v3678_v25 = vsel %vm94_vm0, %v3676_v8, 0.0  ;;  %v4176_v8 = vld [vmem:[%s5977_s16 + $0x98] sm:$0xff] }
0x1a32   :  { %3679 = vadd.xlane.f32.xlu1 %v3678_v25  ;;  %v3667_v48 = vpop.f32.mrf.mxu1  ;;  %3854 = vmatpush.msra.mxu0 %v4177_v7  ;;  %v4174_v25 = vld [vmem:[%s5977_s16 + $0x88] sm:$0xff] }
0x1a33   :  { %v3671_v54 = vadd.f32 %v3667_v48, %v3528_v32 }
0x1a34   :  { %3855 = vmatpush.msra.mxu0 %v4176_v8 }
0x1a35   :  { %v5832_v62 = vadd.f32 %v3671_v54, %v5671_v44  ;;  %v4169_v44 = vld [vmem:[%s5976_s15 + $0xe0] sm:$0xff] }
0x1a36   :  { %3764 = vmatpush.msra.mxu3 %v4169_v44  ;;  %3856 = vmatpush.msra.mxu0 %v4175_v24  ;;  %v4173_v54 = vld [vmem:[%s5977_s16 + $0x80] sm:$0xff] }
0x1a37   :  { %v3677_v63 = vmul.f32 %v5832_v62, %v5832_v62 }
0x1a38   :  { %3765 = vmatpush.msra.mxu3 %v4167_v38  ;;  %3857 = vmatpush.msra.mxu0 %v4174_v25 }
0x1a39   :  { %v3681_v40 = vsel %vm94_vm0, %v3677_v63, 0.0 }
0x1a3a   :  { %3682 = vadd.xlane.f32.xlu2 %v3681_v40  ;;  %3766 = vmatpush.msra.mxu3 %v4165_v0 }
0x1a3b   :  { %3858 = vmatpush.msra.mxu0 %v4173_v54 }
0x1a3c   :  { %3767 = vmatpush.msra.mxu3 %v4163_v29 }
0x1a3e   :  { %3768 = vmatpush.msra.mxu3 %v4161_v31 }
0x1a40   :  { %3769 = vmatpush.msra.mxu3 %v4159_v33 }
0x1a42   :  { %3770 = vmatpush.msra.mxu3 %v4157_v36 }
0x1aa5   :  { %v3680_v41 = vpop.xlane.xlu1 %3679 }
0x1aa6   :  { %v3684_v42 = vmul.f32 %v3680_v41, %v4679_v23 }
0x1aa8   :  { %v3686_v13 = vadd.f32 1e-06, %v3684_v42 }
0x1aaa   :  { %4441 = vrsqrt.f32 %v3686_v13  ;;  %vm3694_vm15 = vweird.f32 %v3686_v13 }
0x1aad   :  { %v3683_v27 = vpop.xlane.xlu2 %3682 }
0x1aae   :  { %v3685_v56 = vmul.f32 %v3683_v27, %v4679_v23 }
0x1ab0   :  { %v4442_v43 = vpop.eup %4441  ;;  %v3687_v49 = vadd.f32 1e-06, %v3685_v56 }
0x1ab1   :  { %v3689_v47 = vmul.f32 %v4442_v43, %v3686_v13  ;;  %vm3695_vm8 = vweird.f32 %v4442_v43 }
0x1ab2   :  { %4443 = vrsqrt.f32 %v3687_v49  ;;  %vm3696_vm1 = vmor %vm3694_vm15, %vm3695_vm8  ;;  %vm3704_vm3 = vweird.f32 %v3687_v49 }
0x1ab3   :  { %v3690_v50 = vmul.f32 %v4442_v43, %v3689_v47 }
0x1ab5   :  { %v3691_v46 = vmul.f32 0.5, %v3690_v50 }
0x1ab7   :  { %v3692_v30 = vsub.f32 1.5, %v3691_v46 }
0x1ab8   :  { %v4444_v61 = vpop.eup %4443 }
0x1ab9   :  { %v3693_v34 = vmul.f32 %v4442_v43, %v3692_v30  ;;  %v3699_v52 = vmul.f32 %v4444_v61, %v3687_v49  ;;  %vm3705_vm2 = vweird.f32 %v4444_v61 }
0x1aba   :  { %vm3706_vm9 = vmor %vm3704_vm3, %vm3705_vm2 }
0x1abb   :  { %v3697_v51 = vsel %vm3696_vm1, %v4442_v43, %v3693_v34  ;;  %v3700_v5 = vmul.f32 %v4444_v61, %v3699_v52 }
0x1abc   :  { %v3708_v53 = vmul.f32 %v3697_v51, %v5825_v22 }
0x1abd   :  { %v3701_v57 = vmul.f32 0.5, %v3700_v5 }
0x1abe   :  { %v3713_v45 = vmul.f32 %v4257_v1, %v3708_v53 }
0x1abf   :  { %v3702_v58 = vsub.f32 1.5, %v3701_v57 }
0x1ac0   :  { %4189 = vmatmul.msk.f32.vlgmr.msra.gmra.mxu3 %vm94_vm0, %v3713_v45  ;;  %4191 = vmatmul.msk.f32.vlgmr.msra.gmra.mxu2 %vm94_vm0, %v3713_v45 }
0x1ac1   :  { %v3703_v10 = vmul.f32 %v4444_v61, %v3702_v58 }
0x1ac3   :  { %v3707_v55 = vsel %vm3706_vm9, %v4444_v61, %v3703_v10 }
0x1ac4   :  { %v3709_v14 = vmul.f32 %v3707_v55, %v5832_v62 }
0x1ac6   :  { %v3714_v3 = vmul.f32 %v4257_v1, %v3709_v14 }
0x1ac8   :  { %4190 = vmatmul.msk.f32.gmra.mxu3 %vm94_vm0, %v3714_v3  ;;  %4192 = vmatmul.msk.f32.gmra.mxu2 %vm94_vm0, %v3714_v3 }
0x1b43   :  { %v3772_v32 = vpop.f32.mrf.mxu3  ;;  %v3795_v42 = vpop.f32.mrf.mxu2 }
0x1b44   :  { %v4193_v48 = vmul.f32 -1.442695, %v3772_v32 }
0x1b46   :  { %4445 = vpow2.f32 %v4193_v48 }
0x1b4b   :  { %v3775_v40 = vpop.f32.mrf.mxu3  ;;  %v3798_v34 = vpop.f32.mrf.mxu2 }
0x1b4c   :  { %v4446_v63 = vpop.eup %4445  ;;  %v4194_v60 = vmul.f32 -1.442695, %v3775_v40 }
0x1b4d   :  { %v3807_v26 = vadd.f32 1.0, %v4446_v63 }
0x1b4f   :  { %4447 = vrcp.f32 %v3807_v26  ;;  %v3820_v37 = vand.u32 2147483648, %v3807_v26  ;;  %v3818_v2 = vand.u32 2147483647, %v3807_v26  ;;  %vm3814_vm4 = vweird.f32 %v3807_v26 }
0x1b50   :  { %4449 = vpow2.f32 %v4194_v60 }
0x1b51   :  { %v3821_v18 = vor.u32 1.1754944e-38, %v3820_v37  ;;  %vm3819_vm6 = vcmp.eq.f32.partialorder %v3818_v2, 8.507059e+37 }
0x1b55   :  { %v4448_v44 = vpop.eup %4447 }
0x1b56   :  { %v4450_v15 = vpop.eup %4449  ;;  %v3810_v38 = vmul.f32 %v4448_v44, %v3807_v26  ;;  %vm3815_vm10 = vweird.f32 %v4448_v44 }
0x1b57   :  { %v3808_v28 = vadd.f32 1.0, %v4450_v15  ;;  %vm3816_vm5 = vmor %vm3814_vm4, %vm3815_vm10 }
0x1b58   :  { %v3811_v0 = vsub.f32 1.0, %v3810_v38 }
0x1b59   :  { %4451 = vrcp.f32 %v3808_v28  ;;  %v3835_v56 = vand.u32 2147483648, %v3808_v28  ;;  %v3833_v47 = vand.u32 2147483647, %v3808_v28  ;;  %vm3829_vm11 = vweird.f32 %v3808_v28 }
0x1b5a   :  { %v3812_v29 = vmul.f32 %v4448_v44, %v3811_v0 }
0x1b5b   :  { %v3836_v50 = vor.u32 1.1754944e-38, %v3835_v56  ;;  %vm3834_vm13 = vcmp.eq.f32.partialorder %v3833_v47, 8.507059e+37 }
0x1b5c   :  { %v3813_v31 = vadd.f32 %v4448_v44, %v3812_v29 }
0x1b5e   :  { %v3817_v33 = vsel %vm3816_vm5, %v4448_v44, %v3813_v31 }
0x1b5f   :  { %v4452_v35 = vpop.eup %4451  ;;  %v3822_v36 = vsel %vm3819_vm6, %v3821_v18, %v3817_v33 }
0x1b60   :  { %v3839_v39 = vmul.f32 %v3822_v36, %v3772_v32  ;;  %v3825_v41 = vmul.f32 %v4452_v35, %v3808_v28  ;;  %vm3830_vm7 = vweird.f32 %v4452_v35 }
0x1b61   :  { %vm3831_vm12 = vmor %vm3829_vm11, %vm3830_vm7 }
0x1b62   :  { %v3841_v13 = vmul.f32 %v3839_v39, %v3795_v42  ;;  %v3826_v27 = vsub.f32 1.0, %v3825_v41 }
0x1b64   :  { %v3827_v43 = vmul.f32 %v4452_v35, %v3826_v27  ;;  %3859 = vmatmul.f32.vlgmr.msra.gmra.mxu0 %v3841_v13 }
0x1b66   :  { %v3828_v49 = vadd.f32 %v4452_v35, %v3827_v43 }
0x1b68   :  { %v3832_v46 = vsel %vm3831_vm12, %v4452_v35, %v3828_v49 }
0x1b69   :  { %v3837_v30 = vsel %vm3834_vm13, %v3836_v50, %v3832_v46 }
0x1b6a   :  { %v3840_v61 = vmul.f32 %v3837_v30, %v3775_v40 }
0x1b6c   :  { %v3842_v1 = vmul.f32 %v3840_v61, %v3798_v34 }
0x1b6e   :  { %3862 = vmatmul.f32.gmra.mxu0 %v3842_v1 }
0x1be1   :  { %v3860_v52 = vpop.f32.mrf.mxu0 }
0x1be2   :  { %v3861_v51 = vadd.f32 %v3860_v52, %v5825_v22 }
0x1be4   :  { %v3867_v53 = vmul.f32 %v3861_v51, %v3861_v51 }
0x1be6   :  { %v3869_v5 = vsel %vm94_vm0, %v3867_v53, 0.0 }
0x1be7   :  { %3870 = vadd.xlane.f32.xlu1 %v3869_v5 }
0x1beb   :  { %v3863_v45 = vpop.f32.mrf.mxu0 }
0x1bec   :  { %v3864_v57 = vadd.f32 %v3863_v45, %v5832_v62 }
0x1bee   :  { %v3868_v58 = vmul.f32 %v3864_v57, %v3864_v57 }
0x1bf0   :  { %v3872_v10 = vsel %vm94_vm0, %v3868_v58, 0.0 }
0x1bf1   :  { %3873 = vadd.xlane.f32.xlu2 %v3872_v10 }
0x1c5a   :  { %v3871_v55 = vpop.xlane.xlu1 %3870 }
0x1c5b   :  { %v3875_v14 = vmul.f32 %v3871_v55, %v4679_v23 }
0x1c5d   :  { %v3877_v3 = vadd.f32 1e-06, %v3875_v14 }
0x1c5f   :  { %4453 = vrsqrt.f32 %v3877_v3  ;;  %vm3885_vm8 = vweird.f32 %v3877_v3 }
0x1c64   :  { %v3874_v4 = vpop.xlane.xlu2 %3873 }
0x1c65   :  { %v4454_v9 = vpop.eup %4453  ;;  %v3876_v22 = vmul.f32 %v3874_v4, %v4679_v23 }
0x1c66   :  { %v3880_v11 = vmul.f32 %v4454_v9, %v3877_v3  ;;  %vm3886_vm14 = vweird.f32 %v4454_v9 }
0x1c67   :  { %v3878_v12 = vadd.f32 1e-06, %v3876_v22  ;;  %vm3887_vm15 = vmor %vm3885_vm8, %vm3886_vm14 }
0x1c68   :  { %v3881_v16 = vmul.f32 %v4454_v9, %v3880_v11 }
0x1c69   :  { %4455 = vrsqrt.f32 %v3878_v12  ;;  %vm3895_vm2 = vweird.f32 %v3878_v12 }
0x1c6a   :  { %v3882_v17 = vmul.f32 0.5, %v3881_v16 }
0x1c6c   :  { %v3883_v20 = vsub.f32 1.5, %v3882_v17 }
0x1c6e   :  { %v3884_v62 = vmul.f32 %v4454_v9, %v3883_v20 }
0x1c6f   :  { %v4456_v6 = vpop.eup %4455 }
0x1c70   :  { %v3888_v19 = vsel %vm3887_vm15, %v4454_v9, %v3884_v62  ;;  %v3890_v21 = vmul.f32 %v4456_v6, %v3878_v12  ;;  %vm3896_vm1 = vweird.f32 %v4456_v6 }
0x1c71   :  { %v3899_v7 = vmul.f32 %v3888_v19, %v3861_v51  ;;  %vm3897_vm3 = vmor %vm3895_vm2, %vm3896_vm1 }
0x1c72   :  { %v3891_v8 = vmul.f32 %v4456_v6, %v3890_v21 }
0x1c73   :  { %v3904_v23 = vmul.f32 %v4258_v59, %v3899_v7 }
0x1c74   :  { %v3892_v24 = vmul.f32 0.5, %v3891_v8 }
0x1c75   :  { %3906 = vst.msk [vmem:[#allocation5] sm:$0xff] %vm94_vm0, %v3904_v23 }
0x1c76   :  { %v3893_v25 = vsub.f32 1.5, %v3892_v24 }
0x1c78   :  { %v3894_v32 = vmul.f32 %v4456_v6, %v3893_v25 }
0x1c7a   :  { %v3898_v48 = vsel %vm3897_vm3, %v4456_v6, %v3894_v32 }
0x1c7b   :  { %v3900_v54 = vmul.f32 %v3898_v48, %v3864_v57 }
0x1c7d   :  { %v3905_v63 = vmul.f32 %v4258_v59, %v3900_v54 }
0x1c7f   :  { %3907 = vst.msk [vmem:[#allocation5 + $0x8] sm:$0xff] %vm94_vm0, %v3905_v63 }
0x1c80   :  { %3920 = dma.vmem_to_hbm [thread:$0]  %s3913_s0, 256, %s3915_s17, [#allocation4], %s6004_s10, %s6004_s10, %s6003_s4  }
0x1c81   :  { %4515 = dma.done.wait [#allocation4], 256  }
0x1c82   :  { %4516 = vsyncadd [#allocation4], 4294967040 }
0x1c83   :  { %3925 = vsyncpa [#allocation3], 1 }
0x1c84   :  { %3926 = vsyncpa [#allocation4], 1 }

</bundles_post_ra>
